<compile_context>
chip_gen: v7x
topology: tpu7x:2x2x1
jax: 0.10.0
libtpu: 0.0.40
codegen_flags: <defaults>
</compile_context>

<pallas_src>
import functools
import math

import jax
import jax.numpy as jnp
from jax.experimental import pallas as pl
from jax.experimental.pallas import tpu as pltpu

_VMEM = pl.BlockSpec(memory_space=pltpu.MemorySpace.VMEM)

# ----------------------------- configuration (small) -----------------------------
B = 2
SEQ_LEN = 8          # photometry sequence length
P_ENC_IN = 4         # photometry input features
P_D_MODEL = 32
P_N_HEADS = 4
P_D_FF = 64
P_E_LAYERS = 1
P_ACTIVATION = "relu"

S_CONV_CHANNELS = [1, 4, 8]   # spectra 1D-CNN channels
S_KERNEL = 3
S_MP_KERNEL = 2
SPECTRA_LEN = 302             # so flattened spectra features == 1184 (hard-coded in module)

M_INPUT_DIM = 10
M_HIDDEN_DIM = 32
HIDDEN_DIM = 64               # shared embedding dim


# ----------------------------- the single fused kernel -----------------------------
def _astro_kernel(p_x_ref, p_wemb_ref, enc_mats_ref, enc_vecs_ref,
                  spec_ref, gw_ref, s_proj_w_ref,
                  meta_x_ref, head_ref,
                  out_ref, *,
                  n_layers, n_heads, d_head, d_ff, enc_in, bs, seq_len, activation,
                  c_mid, c_out, ksz, l1, l2, hidden, m_in, m_hid, ln_eps, l2_eps):
    d_model = n_heads * d_head
    n = bs * seq_len
    scale = 1.0 / math.sqrt(d_head)

    def layernorm(v, g, beta):
        mu = jnp.mean(v, axis=-1, keepdims=True)
        vc = v - mu
        var = jnp.mean(vc * vc, axis=-1, keepdims=True)
        return vc * jax.lax.rsqrt(var + ln_eps) * g + beta

    def l2norm(v):
        return v * jax.lax.rsqrt(jnp.sum(v * v, axis=-1, keepdims=True) + l2_eps)

    # ================= Informer (photometry encoder), rows time-major (t*B + b) =================
    p_x = p_x_ref[...]                                   # (N, 3*enc_in + 1)
    x_cat = p_x[:, 0:3 * enc_in]
    mask = p_x[:, 3 * enc_in:3 * enc_in + 1]

    wemb = p_wemb_ref[...]                               # (3*enc_in + 2 + N, d_model)
    tok_w = wemb[0:3 * enc_in, :]
    norm_g = wemb[3 * enc_in:3 * enc_in + 1, :]
    norm_b = wemb[3 * enc_in + 1:3 * enc_in + 2, :]
    pos_emb = wemb[3 * enc_in + 2:3 * enc_in + 2 + n, :]

    # DataEmbedding: circular token conv (one matmul on the pre-shifted input) + sinusoidal PE
    x = jnp.dot(x_cat, tok_w, preferred_element_type=jnp.float32) + pos_emb

    # block-diagonal batch mask built in-kernel (time-major rows -> batch id = row % bs)
    rb = jax.lax.broadcasted_iota(jnp.int32, (n, n), 0) % bs
    cb = jax.lax.broadcasted_iota(jnp.int32, (n, n), 1) % bs
    bias = jnp.where(rb == cb, 0.0, -1e30)

    for li in range(n_layers):
        mats = enc_mats_ref[li]                          # (d_ff, 4*d_model + d_ff + d_model)
        vecs = enc_vecs_ref[li]                          # (4, 3*d_model)
        wqkv = mats[0:d_model, 0:3 * d_model]
        wo = mats[0:d_model, 3 * d_model:4 * d_model]
        w1 = mats[0:d_model, 4 * d_model:4 * d_model + d_ff]
        w2 = mats[0:d_ff, 4 * d_model + d_ff:4 * d_model + d_ff + d_model]
        bqkv = vecs[0:1, 0:3 * d_model]
        bo = vecs[1:2, 0:d_model]
        ln1_g = vecs[1:2, d_model:2 * d_model]
        ln1_b = vecs[1:2, 2 * d_model:3 * d_model]
        b1 = vecs[2:3, 0:d_ff]
        b2 = vecs[3:4, 0:d_model]
        ln2_g = vecs[3:4, d_model:2 * d_model]
        ln2_b = vecs[3:4, 2 * d_model:3 * d_model]

        # fused QKV projection (one matmul), per-head softmax attention
        qkv = jnp.dot(x, wqkv, preferred_element_type=jnp.float32) + bqkv      # (N, 3*d_model)
        heads = []
        for h in range(n_heads):
            q = qkv[:, h * d_head:(h + 1) * d_head]
            kh = qkv[:, d_model + h * d_head:d_model + (h + 1) * d_head]
            vh = qkv[:, 2 * d_model + h * d_head:2 * d_model + (h + 1) * d_head]
            s = jax.lax.dot_general(q, kh, (((1,), (1,)), ((), ())),
                                    preferred_element_type=jnp.float32) * scale + bias
            s = s - jnp.max(s, axis=-1, keepdims=True)
            p = jnp.exp(s)
            p = p * pl.reciprocal(jnp.sum(p, axis=-1, keepdims=True), approx=True)
            heads.append(jnp.dot(p, vh, preferred_element_type=jnp.float32))   # (N, d_head)
        attn = jnp.concatenate(heads, axis=-1)                                 # (N, d_model)
        x = x + jnp.dot(attn, wo, preferred_element_type=jnp.float32) + bo     # single out-proj
        x = layernorm(x, ln1_g, ln1_b)
        y = jnp.dot(x, w1, preferred_element_type=jnp.float32) + b1
        if activation == "relu":
            y = jnp.maximum(y, 0.0)
        else:
            y = jax.nn.gelu(y, approximate=False)
        y = jnp.dot(y, w2, preferred_element_type=jnp.float32) + b2
        x = layernorm(x + y, ln2_g, ln2_b)

    x = layernorm(x, norm_g, norm_b) * mask              # final encoder LN + padding mask

    # head-blob row offsets
    r0 = seq_len * d_model                               # end of photometry projection weight
    r1 = r0 + m_in
    r2 = r1 + m_hid
    r3 = r2 + m_hid
    hv = head_ref[r3:r3 + 6, :]                          # (6, hidden) bias / scale rows
    mb1 = hv[0:1, 0:m_hid]
    mb2 = hv[1:2, 0:m_hid]
    p_proj_b = hv[2:3, :]
    s_proj_b = hv[3:4, :]
    m_proj_b = hv[4:5, :]
    scales = hv[5:6, :]

    # photometry projection: p_emb[b] = sum_t x[t*bs+b, :] @ Wp[t*d_model:(t+1)*d_model, :]
    p_acc = jnp.zeros((bs, hidden), jnp.float32)
    for t in range(seq_len):
        p_acc = p_acc + jnp.dot(x[t * bs:(t + 1) * bs, :],
                                head_ref[t * d_model:(t + 1) * d_model, :],
                                preferred_element_type=jnp.float32)
    p_emb = p_acc + p_proj_b                             # (B, hidden)

    # ================= GalSpecNet (spectra encoder), sublane-packed =================
    spec = spec_ref[...]                                 # (2*c_mid*bs, l1+1): [even; odd] taps
    gw = gw_ref[...]                                     # (c_out*bs, c_mid*ksz + 2 + ksz)
    cmb = c_mid * bs
    w0_start = c_mid * ksz + 1
    xe = spec[0:cmb, :]
    xo = spec[cmb:2 * cmb, :]
    w0_0 = gw[0:cmb, w0_start + 0:w0_start + 1]
    w0_1 = gw[0:cmb, w0_start + 1:w0_start + 2]
    w0_2 = gw[0:cmb, w0_start + 2:w0_start + 3]
    b0c = gw[0:cmb, w0_start + ksz:w0_start + ksz + 1]

    # conv0 (k=3) + ReLU + MaxPool1d(2): even/odd output streams on (c_mid*B, l1) tiles
    h_even = w0_0 * xe[:, 0:l1] + w0_1 * xo[:, 0:l1] + w0_2 * xe[:, 1:l1 + 1] + b0c
    h_odd = w0_0 * xo[:, 0:l1] + w0_1 * xe[:, 1:l1 + 1] + w0_2 * xo[:, 1:l1 + 1] + b0c
    pooled = jnp.maximum(jnp.maximum(h_even, h_odd), 0.0)        # (c_mid*bs, l1), rows ci*bs+b

    # conv1 (k=3) + ReLU, vectorised over all output channels on the sublane axis
    b1c = gw[:, c_mid * ksz:c_mid * ksz + 1]                     # (c_out*bs, 1)
    hsum = None
    for ci in range(c_mid):
        p_tile = jnp.concatenate([pooled[ci * bs:(ci + 1) * bs, :]] * c_out, axis=0)  # (c_out*bs, l1)
        for j in range(ksz):
            term = gw[:, ci * ksz + j:ci * ksz + j + 1] * p_tile[:, j:j + l2]
            hsum = term if hsum is None else hsum + term
    hgs = jnp.maximum(hsum + b1c, 0.0)                           # (c_out*bs, l2), rows co*bs+b

    # flatten + spectra projection fused: per-channel accumulated matmuls (1184 never built)
    s_acc = jnp.zeros((bs, hidden), jnp.float32)
    for co in range(c_out):
        s_acc = s_acc + jnp.dot(hgs[co * bs:(co + 1) * bs, :], s_proj_w_ref[co],
                                preferred_element_type=jnp.float32)
    s_emb = s_acc + s_proj_b                             # (B, hidden)

    # ================= MetaModel (MLP) + metadata projection =================
    mw1 = head_ref[r0:r1, 0:m_hid]
    mw2 = head_ref[r1:r2, 0:m_hid]
    m_proj_w = head_ref[r2:r3, :]
    m = jnp.dot(meta_x_ref[...], mw1, preferred_element_type=jnp.float32) + mb1
    m = jnp.maximum(m, 0.0)
    m = jnp.dot(m, mw2, preferred_element_type=jnp.float32) + mb2
    m = jnp.maximum(m, 0.0)
    m_emb = jnp.dot(m, m_proj_w, preferred_element_type=jnp.float32) + m_proj_b

    # ================= L2-normalise + contrastive logits (packed output) =================
    pe_n = l2norm(p_emb)
    se_n = l2norm(s_emb)
    me_n = l2norm(m_emb)
    dims = (((1,), (1,)), ((), ()))                      # A @ B.T
    ps = scales[:, 0:1] * jax.lax.dot_general(pe_n, se_n, dims, preferred_element_type=jnp.float32)
    sm = scales[:, 1:2] * jax.lax.dot_general(se_n, me_n, dims, preferred_element_type=jnp.float32)
    mp = scales[:, 2:3] * jax.lax.dot_general(me_n, pe_n, dims, preferred_element_type=jnp.float32)
    out_ref[...] = jnp.concatenate([ps, sm, mp], axis=-1)        # (B, 3*B)


# ----------------------------- one-time weight packing (outside jit) -----------------------------
def sinusoidal_pe(length, d_model):
    pos = jnp.arange(length, dtype=jnp.float32)[:, None]
    div = jnp.exp(jnp.arange(0, d_model, 2, dtype=jnp.float32) * (-math.log(10000.0) / d_model))
    pe = jnp.zeros((length, d_model), jnp.float32)
    pe = pe.at[:, 0::2].set(jnp.sin(pos * div))
    pe = pe.at[:, 1::2].set(jnp.cos(pos * div))
    return pe


def pack_params(params, batch_size):
    inf = params["informer"]
    d_model, d_ff = P_D_MODEL, P_D_FF
    assert d_ff >= d_model

    # token-conv weight + final LN + time-major positional embedding, one blob
    tok_w = jnp.transpose(inf["tok_w"], (2, 1, 0)).reshape(3 * P_ENC_IN, d_model)
    pe_tm = jnp.repeat(sinusoidal_pe(SEQ_LEN, d_model), batch_size, axis=0)     # rows t*B+b
    p_wemb = jnp.concatenate([tok_w, inf["norm_g"][None, :], inf["norm_b"][None, :], pe_tm], axis=0)

    def layer_mats(lp):
        top = jnp.concatenate([lp["wq"], lp["wk"], lp["wv"], lp["wo"], lp["w1"]], axis=1)
        top = jnp.concatenate([top, jnp.zeros((d_ff - d_model, top.shape[1]), jnp.float32)], axis=0)
        return jnp.concatenate([top, lp["w2"]], axis=1)          # (d_ff, 4*d_model + d_ff + d_model)

    def layer_vecs(lp):
        w = 3 * d_model
        pad = lambda v: jnp.concatenate([v, jnp.zeros((w - v.shape[0],), jnp.float32)])
        return jnp.stack([
            jnp.concatenate([lp["bq"], lp["bk"], lp["bv"]]),
            jnp.concatenate([lp["bo"], lp["ln1_g"], lp["ln1_b"]]),
            pad(lp["b1"]),
            jnp.concatenate([lp["b2"], lp["ln2_g"], lp["ln2_b"]]),
        ])

    enc_mats = jnp.stack([layer_mats(lp) for lp in inf["enc_layers"]])
    enc_vecs = jnp.stack([layer_vecs(lp) for lp in inf["enc_layers"]])

    # GalSpecNet conv weights, (out-channel x batch) on the sublane axis
    gs = params["galspec"]
    c_mid, c_out, ksz = S_CONV_CHANNELS[1], S_CONV_CHANNELS[2], S_KERNEL
    w1cols = jnp.repeat(gs["conv1_w"].reshape(c_out, c_mid * ksz), batch_size, axis=0)
    b1col = jnp.repeat(gs["conv1_b"], batch_size)[:, None]
    w0cols = jnp.repeat(gs["conv0_w"].reshape(c_mid, ksz), batch_size, axis=0)
    b0col = jnp.repeat(gs["conv0_b"], batch_size)[:, None]
    right = jnp.concatenate([w0cols, b0col], axis=1)
    right = jnp.concatenate(
        [right, jnp.zeros(((c_out - c_mid) * batch_size, ksz + 1), jnp.float32)], axis=0)
    gw = jnp.concatenate([w1cols, b1col, right], axis=1)          # (c_out*B, c_mid*k + 2 + k)

    l1 = (SPECTRA_LEN - ksz + 1) // S_MP_KERNEL
    l2 = l1 - ksz + 1
    s_proj_w3 = params["s_proj_w"].reshape(c_out, l2, HIDDEN_DIM)

    # head blob: photometry projection + metadata MLP + metadata projection + bias/scale rows
    mm = params["meta"]
    padh = lambda v: jnp.concatenate([v, jnp.zeros((HIDDEN_DIM - v.shape[0],), jnp.float32)])
    padw = lambda w: jnp.concatenate(
        [w, jnp.zeros((w.shape[0], HIDDEN_DIM - w.shape[1]), jnp.float32)], axis=1)
    scales = jnp.clip(jnp.exp(jnp.stack([params["logit_scale_ps"],
                                         params["logit_scale_sm"],
                                         params["logit_scale_mp"]])), 1.0, 100.0)
    vec_rows = jnp.stack([padh(mm["b1"]), padh(mm["b2"]),
                          params["p_proj_b"], params["s_proj_b"], params["m_proj_b"],
                          padh(scales)])
    head_blob = jnp.concatenate([params["p_proj_w"], padw(mm["w1"]), padw(mm["w2"]),
                                 params["m_proj_w"], vec_rows], axis=0)

    return {"p_wemb": p_wemb, "enc_mats": enc_mats, "enc_vecs": enc_vecs,
            "gw": gw, "s_proj_w3": s_proj_w3, "head_blob": head_blob}


# ----------------------------- forward (one pallas_call) -----------------------------
def astro_m3_forward(packed, photometry, photometry_mask, spectra, metadata):
    bsz, seq_len, enc_in = photometry.shape

    # photometry: circular-shifted token-conv input + padding mask, rows time-major (t*B + b)
    x_shift = jnp.concatenate([jnp.roll(photometry, 1, axis=1), photometry,
                               jnp.roll(photometry, -1, axis=1)], axis=-1)      # (B, L, 3*enc_in)
    x_cat = jnp.transpose(x_shift, (1, 0, 2)).reshape(seq_len * bsz, 3 * enc_in)
    mask = jnp.transpose(photometry_mask.astype(jnp.float32), (1, 0)).reshape(seq_len * bsz, 1)
    p_x = jnp.concatenate([x_cat, mask], axis=1)                                # (L*B, 3*enc_in+1)

    # spectra: even/odd taps pre-tiled over conv0 output channels on the sublane axis
    c_mid, c_out, ksz = S_CONV_CHANNELS[1], S_CONV_CHANNELS[2], S_KERNEL
    sp = spectra[:, 0, :]
    spec_eo = jnp.concatenate([jnp.tile(sp[:, 0::2], (c_mid, 1)),
                               jnp.tile(sp[:, 1::2], (c_mid, 1))], axis=0)      # (2*c_mid*B, L/2)

    l1 = (spectra.shape[2] - ksz + 1) // S_MP_KERNEL
    l2 = l1 - ksz + 1

    kern = functools.partial(
        _astro_kernel,
        n_layers=P_E_LAYERS, n_heads=P_N_HEADS, d_head=P_D_MODEL // P_N_HEADS,
        d_ff=P_D_FF, enc_in=enc_in, bs=bsz, seq_len=seq_len, activation=P_ACTIVATION,
        c_mid=c_mid, c_out=c_out, ksz=ksz, l1=l1, l2=l2,
        hidden=HIDDEN_DIM, m_in=M_INPUT_DIM, m_hid=M_HIDDEN_DIM,
        ln_eps=1e-5, l2_eps=1e-12)

    out = pl.pallas_call(
        kern,
        out_shape=jax.ShapeDtypeStruct((bsz, 3 * bsz), jnp.float32),
        in_specs=[_VMEM] * 9,
        out_specs=_VMEM,
    )(p_x, packed["p_wemb"], packed["enc_mats"], packed["enc_vecs"],
      spec_eo, packed["gw"], packed["s_proj_w3"],
      metadata.astype(jnp.float32), packed["head_blob"])

    return out[:, 0:bsz], out[:, bsz:2 * bsz], out[:, 2 * bsz:3 * bsz]


# ----------------------------- deterministic parameter init -----------------------------
def _uniform(key, shape, bound):
    return jax.random.uniform(key, shape, jnp.float32, -bound, bound)


def init_linear(key, fan_in, fan_out):
    kw, kb = jax.random.split(key)
    bound = 1.0 / math.sqrt(fan_in)
    return _uniform(kw, (fan_in, fan_out), bound), _uniform(kb, (fan_out,), bound)


def init_conv(key, cout, cin, k, bias=True):
    kw, kb = jax.random.split(key)
    bound = 1.0 / math.sqrt(cin * k)
    w = _uniform(kw, (cout, cin, k), bound)
    b = _uniform(kb, (cout,), bound) if bias else None
    return w, b


def init_params(key):
    keys = iter(jax.random.split(key, 64))
    params = {}

    inf = {}
    inf["tok_w"], _ = init_conv(next(keys), P_D_MODEL, P_ENC_IN, 3, bias=False)
    layers = []
    for _ in range(P_E_LAYERS):
        lp = {}
        lp["wq"], lp["bq"] = init_linear(next(keys), P_D_MODEL, P_D_MODEL)
        lp["wk"], lp["bk"] = init_linear(next(keys), P_D_MODEL, P_D_MODEL)
        lp["wv"], lp["bv"] = init_linear(next(keys), P_D_MODEL, P_D_MODEL)
        lp["wo"], lp["bo"] = init_linear(next(keys), P_D_MODEL, P_D_MODEL)
        lp["ln1_g"] = jnp.ones((P_D_MODEL,), jnp.float32)
        lp["ln1_b"] = jnp.zeros((P_D_MODEL,), jnp.float32)
        lp["w1"], lp["b1"] = init_linear(next(keys), P_D_MODEL, P_D_FF)
        lp["w2"], lp["b2"] = init_linear(next(keys), P_D_FF, P_D_MODEL)
        lp["ln2_g"] = jnp.ones((P_D_MODEL,), jnp.float32)
        lp["ln2_b"] = jnp.zeros((P_D_MODEL,), jnp.float32)
        layers.append(lp)
    inf["enc_layers"] = layers
    inf["norm_g"] = jnp.ones((P_D_MODEL,), jnp.float32)
    inf["norm_b"] = jnp.zeros((P_D_MODEL,), jnp.float32)
    params["informer"] = inf

    gs = {}
    gs["conv0_w"], gs["conv0_b"] = init_conv(next(keys), S_CONV_CHANNELS[1], S_CONV_CHANNELS[0], S_KERNEL)
    gs["conv1_w"], gs["conv1_b"] = init_conv(next(keys), S_CONV_CHANNELS[2], S_CONV_CHANNELS[1], S_KERNEL)
    params["galspec"] = gs

    mm = {}
    mm["w1"], mm["b1"] = init_linear(next(keys), M_INPUT_DIM, M_HIDDEN_DIM)
    mm["w2"], mm["b2"] = init_linear(next(keys), M_HIDDEN_DIM, M_HIDDEN_DIM)
    params["meta"] = mm

    params["p_proj_w"], params["p_proj_b"] = init_linear(next(keys), SEQ_LEN * P_D_MODEL, HIDDEN_DIM)
    params["s_proj_w"], params["s_proj_b"] = init_linear(next(keys), 1184, HIDDEN_DIM)
    params["m_proj_w"], params["m_proj_b"] = init_linear(next(keys), M_HIDDEN_DIM, HIDDEN_DIM)

    params["logit_scale_ps"] = jnp.asarray(math.log(100.0), jnp.float32)
    params["logit_scale_sm"] = jnp.asarray(math.log(100.0), jnp.float32)
    params["logit_scale_mp"] = jnp.asarray(math.log(100.0), jnp.float32)
    return params


# ----------------------------- main -----------------------------
if __name__ == "__main__":
    key = jax.random.PRNGKey(0)
    k_param, k_p, k_m, k_s, k_meta = jax.random.split(key, 5)

    params = init_params(k_param)
    packed = pack_params(params, B)        # one-time weight packing (outside jit)

    photometry = jax.random.normal(k_p, (B, SEQ_LEN, P_ENC_IN), jnp.float32)
    photometry_mask = jax.random.bernoulli(k_m, 0.8, (B, SEQ_LEN)).astype(jnp.float32)
    spectra = jax.random.normal(k_s, (B, S_CONV_CHANNELS[0], SPECTRA_LEN), jnp.float32)
    metadata = jax.random.normal(k_meta, (B, M_INPUT_DIM), jnp.float32)

    fwd = jax.jit(astro_m3_forward)
    logits_ps, logits_sm, logits_mp = fwd(packed, photometry, photometry_mask, spectra, metadata)
    jax.block_until_ready((logits_ps, logits_sm, logits_mp))

    assert logits_ps.shape == (B, B) and logits_sm.shape == (B, B) and logits_mp.shape == (B, B)
    assert jnp.all(jnp.isfinite(logits_ps)) and jnp.all(jnp.isfinite(logits_sm)) and jnp.all(jnp.isfinite(logits_mp))
    print("KERNEL_OK")
</pallas_src>

<mosaic_0001>
module attributes {stable_mosaic.version = 11 : i64} {
  func.func @_astro_kernel(%arg0: memref<16x13xf32, #tpu.memory_space<vmem>>, %arg1: memref<30x32xf32, #tpu.memory_space<vmem>>, %arg2: memref<1x64x224xf32, #tpu.memory_space<vmem>>, %arg3: memref<1x4x96xf32, #tpu.memory_space<vmem>>, %arg4: memref<16x151xf32, #tpu.memory_space<vmem>>, %arg5: memref<16x17xf32, #tpu.memory_space<vmem>>, %arg6: memref<8x148x64xf32, #tpu.memory_space<vmem>>, %arg7: memref<2x10xf32, #tpu.memory_space<vmem>>, %arg8: memref<336x64xf32, #tpu.memory_space<vmem>>, %arg9: memref<2x6xf32, #tpu.memory_space<vmem>>) attributes {dimension_semantics = [], scalar_prefetch = 0 : i64, scratch_operands = 0 : i64, tpu.core_type = #tpu.core_type<tc>} {
    %c0 = arith.constant 0 : index
    %c0_0 = arith.constant 0 : index
    %0 = vector.load %arg0[%c0, %c0_0] : memref<16x13xf32, #tpu.memory_space<vmem>>, vector<16x13xf32>
    %1 = vector.extract_strided_slice %0 {offsets = [0, 0], sizes = [16, 12], strides = [1, 1]} : vector<16x13xf32> to vector<16x12xf32>
    %2 = vector.extract_strided_slice %0 {offsets = [0, 12], sizes = [16, 1], strides = [1, 1]} : vector<16x13xf32> to vector<16x1xf32>
    %c0_1 = arith.constant 0 : index
    %c0_2 = arith.constant 0 : index
    %3 = vector.load %arg1[%c0_1, %c0_2] : memref<30x32xf32, #tpu.memory_space<vmem>>, vector<30x32xf32>
    %4 = vector.extract_strided_slice %3 {offsets = [0, 0], sizes = [12, 32], strides = [1, 1]} : vector<30x32xf32> to vector<12x32xf32>
    %5 = vector.extract_strided_slice %3 {offsets = [12, 0], sizes = [1, 32], strides = [1, 1]} : vector<30x32xf32> to vector<1x32xf32>
    %6 = vector.extract_strided_slice %3 {offsets = [13, 0], sizes = [1, 32], strides = [1, 1]} : vector<30x32xf32> to vector<1x32xf32>
    %7 = vector.extract_strided_slice %3 {offsets = [14, 0], sizes = [16, 32], strides = [1, 1]} : vector<30x32xf32> to vector<16x32xf32>
    %cst = arith.constant dense<0.000000e+00> : vector<16x32xf32>
    %8 = tpu.matmul %1, %4, %cst {dimension_numbers = #tpu.dot_dimension_numbers<[1], [0], [0], [1], [0, 0, 1, 1], [], []>} : vector<16x12xf32>, vector<12x32xf32>, vector<16x32xf32> -> vector<16x32xf32>
    %9 = arith.addf %8, %7 : vector<16x32xf32>
    %10 = tpu.iota {dimensions = array<i32: 0>} : vector<16x16xi32>
    %c2_i32 = arith.constant 2 : i32
    %c0_i32 = arith.constant 0 : i32
    %11 = arith.cmpi eq, %c2_i32, %c0_i32 : i32
    %c1_i32 = arith.constant 1 : i32
    %12 = arith.select %11, %c1_i32, %c2_i32 : i32
    %13 = vector.broadcast %12 : i32 to vector<16x16xi32>
    %14 = arith.remsi %10, %13 : vector<16x16xi32>
    %c0_i32_3 = arith.constant 0 : i32
    %15 = vector.broadcast %c0_i32_3 : i32 to vector<16x16xi32>
    %16 = arith.cmpi ne, %14, %15 : vector<16x16xi32>
    %c0_i32_4 = arith.constant 0 : i32
    %17 = vector.broadcast %c0_i32_4 : i32 to vector<16x16xi32>
    %18 = arith.cmpi slt, %14, %17 : vector<16x16xi32>
    %c0_i32_5 = arith.constant 0 : i32
    %19 = arith.cmpi slt, %12, %c0_i32_5 : i32
    %20 = vector.broadcast %19 : i1 to vector<16x16xi1>
    %21 = vector.broadcast %20 : vector<16x16xi1> to vector<16x16xi1>
    %22 = arith.xori %18, %21 : vector<16x16xi1>
    %23 = arith.andi %22, %16 : vector<16x16xi1>
    %24 = vector.broadcast %12 : i32 to vector<16x16xi32>
    %25 = arith.addi %14, %24 : vector<16x16xi32>
    %26 = arith.select %23, %25, %14 : vector<16x16xi1>, vector<16x16xi32>
    %27 = tpu.iota {dimensions = array<i32: 1>} : vector<16x16xi32>
    %c2_i32_6 = arith.constant 2 : i32
    %c0_i32_7 = arith.constant 0 : i32
    %28 = arith.cmpi eq, %c2_i32_6, %c0_i32_7 : i32
    %c1_i32_8 = arith.constant 1 : i32
    %29 = arith.select %28, %c1_i32_8, %c2_i32_6 : i32
    %30 = vector.broadcast %29 : i32 to vector<16x16xi32>
    %31 = arith.remsi %27, %30 : vector<16x16xi32>
    %c0_i32_9 = arith.constant 0 : i32
    %32 = vector.broadcast %c0_i32_9 : i32 to vector<16x16xi32>
    %33 = arith.cmpi ne, %31, %32 : vector<16x16xi32>
    %c0_i32_10 = arith.constant 0 : i32
    %34 = vector.broadcast %c0_i32_10 : i32 to vector<16x16xi32>
    %35 = arith.cmpi slt, %31, %34 : vector<16x16xi32>
    %c0_i32_11 = arith.constant 0 : i32
    %36 = arith.cmpi slt, %29, %c0_i32_11 : i32
    %37 = vector.broadcast %36 : i1 to vector<16x16xi1>
    %38 = vector.broadcast %37 : vector<16x16xi1> to vector<16x16xi1>
    %39 = arith.xori %35, %38 : vector<16x16xi1>
    %40 = arith.andi %39, %33 : vector<16x16xi1>
    %41 = vector.broadcast %29 : i32 to vector<16x16xi32>
    %42 = arith.addi %31, %41 : vector<16x16xi32>
    %43 = arith.select %40, %42, %31 : vector<16x16xi1>, vector<16x16xi32>
    %44 = arith.cmpi eq, %26, %43 : vector<16x16xi32>
    %cst_12 = arith.constant 0.000000e+00 : f32
    %cst_13 = arith.constant -1.000000e+30 : f32
    %45 = vector.broadcast %cst_12 : f32 to vector<16x16xf32>
    %46 = vector.broadcast %cst_13 : f32 to vector<16x16xf32>
    %47 = arith.select %44, %45, %46 : vector<16x16xi1>, vector<16x16xf32>
    %c0_14 = arith.constant 0 : index
    %c0_15 = arith.constant 0 : index
    %c0_16 = arith.constant 0 : index
    %48 = vector.load %arg2[%c0_14, %c0_15, %c0_16] : memref<1x64x224xf32, #tpu.memory_space<vmem>>, vector<1x64x224xf32>
    %49 = vector.shape_cast %48 : vector<1x64x224xf32> to vector<64x224xf32>
    %c0_17 = arith.constant 0 : index
    %c0_18 = arith.constant 0 : index
    %c0_19 = arith.constant 0 : index
    %50 = vector.load %arg3[%c0_17, %c0_18, %c0_19] : memref<1x4x96xf32, #tpu.memory_space<vmem>>, vector<1x4x96xf32>
    %51 = vector.shape_cast %50 : vector<1x4x96xf32> to vector<4x96xf32>
    %52 = vector.extract_strided_slice %49 {offsets = [0, 0], sizes = [32, 96], strides = [1, 1]} : vector<64x224xf32> to vector<32x96xf32>
    %53 = vector.extract_strided_slice %49 {offsets = [0, 96], sizes = [32, 32], strides = [1, 1]} : vector<64x224xf32> to vector<32x32xf32>
    %54 = vector.extract_strided_slice %49 {offsets = [0, 128], sizes = [32, 64], strides = [1, 1]} : vector<64x224xf32> to vector<32x64xf32>
    %55 = vector.extract_strided_slice %49 {offsets = [0, 192], sizes = [64, 32], strides = [1, 1]} : vector<64x224xf32> to vector<64x32xf32>
    %56 = vector.extract_strided_slice %51 {offsets = [0, 0], sizes = [1, 96], strides = [1, 1]} : vector<4x96xf32> to vector<1x96xf32>
    %57 = vector.extract_strided_slice %51 {offsets = [1, 0], sizes = [1, 32], strides = [1, 1]} : vector<4x96xf32> to vector<1x32xf32>
    %58 = vector.extract_strided_slice %51 {offsets = [1, 32], sizes = [1, 32], strides = [1, 1]} : vector<4x96xf32> to vector<1x32xf32>
    %59 = vector.extract_strided_slice %51 {offsets = [1, 64], sizes = [1, 32], strides = [1, 1]} : vector<4x96xf32> to vector<1x32xf32>
    %60 = vector.extract_strided_slice %51 {offsets = [2, 0], sizes = [1, 64], strides = [1, 1]} : vector<4x96xf32> to vector<1x64xf32>
    %61 = vector.extract_strided_slice %51 {offsets = [3, 0], sizes = [1, 32], strides = [1, 1]} : vector<4x96xf32> to vector<1x32xf32>
    %62 = vector.extract_strided_slice %51 {offsets = [3, 32], sizes = [1, 32], strides = [1, 1]} : vector<4x96xf32> to vector<1x32xf32>
    %63 = vector.extract_strided_slice %51 {offsets = [3, 64], sizes = [1, 32], strides = [1, 1]} : vector<4x96xf32> to vector<1x32xf32>
    %cst_20 = arith.constant dense<0.000000e+00> : vector<16x96xf32>
    %64 = tpu.matmul %9, %52, %cst_20 {dimension_numbers = #tpu.dot_dimension_numbers<[1], [0], [0], [1], [0, 0, 1, 1], [], []>} : vector<16x32xf32>, vector<32x96xf32>, vector<16x96xf32> -> vector<16x96xf32>
    %65 = vector.broadcast %56 : vector<1x96xf32> to vector<16x96xf32>
    %66 = arith.addf %64, %65 : vector<16x96xf32>
    %67 = vector.extract_strided_slice %66 {offsets = [0, 0], sizes = [16, 8], strides = [1, 1]} : vector<16x96xf32> to vector<16x8xf32>
    %68 = vector.extract_strided_slice %66 {offsets = [0, 32], sizes = [16, 8], strides = [1, 1]} : vector<16x96xf32> to vector<16x8xf32>
    %69 = vector.extract_strided_slice %66 {offsets = [0, 64], sizes = [16, 8], strides = [1, 1]} : vector<16x96xf32> to vector<16x8xf32>
    %cst_21 = arith.constant dense<0.000000e+00> : vector<16x16xf32>
    %70 = tpu.matmul %67, %68, %cst_21 {dimension_numbers = #tpu.dot_dimension_numbers<[1], [1], [0], [0], [0, 0, 1, 0], [], []>} : vector<16x8xf32>, vector<16x8xf32>, vector<16x16xf32> -> vector<16x16xf32>
    %cst_22 = arith.constant 0.353553385 : f32
    %71 = vector.broadcast %cst_22 : f32 to vector<16x16xf32>
    %72 = arith.mulf %70, %71 : vector<16x16xf32>
    %73 = arith.addf %72, %47 : vector<16x16xf32>
    %cst_23 = arith.constant dense<0xFF800000> : vector<16xf32>
    %74 = vector.multi_reduction <maximumf>, %73, %cst_23 [1] : vector<16x16xf32> to vector<16xf32>
    %75 = vector.shape_cast %74 : vector<16xf32> to vector<16x1xf32>
    %76 = vector.broadcast %75 : vector<16x1xf32> to vector<16x16xf32>
    %77 = arith.subf %73, %76 : vector<16x16xf32>
    %78 = math.exp %77 : vector<16x16xf32>
    %cst_24 = arith.constant dense<0.000000e+00> : vector<16xf32>
    %79 = vector.multi_reduction <add>, %78, %cst_24 [1] : vector<16x16xf32> to vector<16xf32>
    %80 = vector.shape_cast %79 : vector<16xf32> to vector<16x1xf32>
    %81 = tpu.reciprocal %80 {approx = true} : vector<16x1xf32> -> vector<16x1xf32>
    %82 = vector.broadcast %81 : vector<16x1xf32> to vector<16x16xf32>
    %83 = arith.mulf %78, %82 : vector<16x16xf32>
    %cst_25 = arith.constant dense<0.000000e+00> : vector<16x8xf32>
    %84 = tpu.matmul %83, %69, %cst_25 {dimension_numbers = #tpu.dot_dimension_numbers<[1], [0], [0], [1], [0, 0, 1, 1], [], []>} : vector<16x16xf32>, vector<16x8xf32>, vector<16x8xf32> -> vector<16x8xf32>
    %85 = vector.extract_strided_slice %66 {offsets = [0, 8], sizes = [16, 8], strides = [1, 1]} : vector<16x96xf32> to vector<16x8xf32>
    %86 = vector.extract_strided_slice %66 {offsets = [0, 40], sizes = [16, 8], strides = [1, 1]} : vector<16x96xf32> to vector<16x8xf32>
    %87 = vector.extract_strided_slice %66 {offsets = [0, 72], sizes = [16, 8], strides = [1, 1]} : vector<16x96xf32> to vector<16x8xf32>
    %cst_26 = arith.constant dense<0.000000e+00> : vector<16x16xf32>
    %88 = tpu.matmul %85, %86, %cst_26 {dimension_numbers = #tpu.dot_dimension_numbers<[1], [1], [0], [0], [0, 0, 1, 0], [], []>} : vector<16x8xf32>, vector<16x8xf32>, vector<16x16xf32> -> vector<16x16xf32>
    %cst_27 = arith.constant 0.353553385 : f32
    %89 = vector.broadcast %cst_27 : f32 to vector<16x16xf32>
    %90 = arith.mulf %88, %89 : vector<16x16xf32>
    %91 = arith.addf %90, %47 : vector<16x16xf32>
    %cst_28 = arith.constant dense<0xFF800000> : vector<16xf32>
    %92 = vector.multi_reduction <maximumf>, %91, %cst_28 [1] : vector<16x16xf32> to vector<16xf32>
    %93 = vector.shape_cast %92 : vector<16xf32> to vector<16x1xf32>
    %94 = vector.broadcast %93 : vector<16x1xf32> to vector<16x16xf32>
    %95 = arith.subf %91, %94 : vector<16x16xf32>
    %96 = math.exp %95 : vector<16x16xf32>
    %cst_29 = arith.constant dense<0.000000e+00> : vector<16xf32>
    %97 = vector.multi_reduction <add>, %96, %cst_29 [1] : vector<16x16xf32> to vector<16xf32>
    %98 = vector.shape_cast %97 : vector<16xf32> to vector<16x1xf32>
    %99 = tpu.reciprocal %98 {approx = true} : vector<16x1xf32> -> vector<16x1xf32>
    %100 = vector.broadcast %99 : vector<16x1xf32> to vector<16x16xf32>
    %101 = arith.mulf %96, %100 : vector<16x16xf32>
    %cst_30 = arith.constant dense<0.000000e+00> : vector<16x8xf32>
    %102 = tpu.matmul %101, %87, %cst_30 {dimension_numbers = #tpu.dot_dimension_numbers<[1], [0], [0], [1], [0, 0, 1, 1], [], []>} : vector<16x16xf32>, vector<16x8xf32>, vector<16x8xf32> -> vector<16x8xf32>
    %103 = vector.extract_strided_slice %66 {offsets = [0, 16], sizes = [16, 8], strides = [1, 1]} : vector<16x96xf32> to vector<16x8xf32>
    %104 = vector.extract_strided_slice %66 {offsets = [0, 48], sizes = [16, 8], strides = [1, 1]} : vector<16x96xf32> to vector<16x8xf32>
    %105 = vector.extract_strided_slice %66 {offsets = [0, 80], sizes = [16, 8], strides = [1, 1]} : vector<16x96xf32> to vector<16x8xf32>
    %cst_31 = arith.constant dense<0.000000e+00> : vector<16x16xf32>
    %106 = tpu.matmul %103, %104, %cst_31 {dimension_numbers = #tpu.dot_dimension_numbers<[1], [1], [0], [0], [0, 0, 1, 0], [], []>} : vector<16x8xf32>, vector<16x8xf32>, vector<16x16xf32> -> vector<16x16xf32>
    %cst_32 = arith.constant 0.353553385 : f32
    %107 = vector.broadcast %cst_32 : f32 to vector<16x16xf32>
    %108 = arith.mulf %106, %107 : vector<16x16xf32>
    %109 = arith.addf %108, %47 : vector<16x16xf32>
    %cst_33 = arith.constant dense<0xFF800000> : vector<16xf32>
    %110 = vector.multi_reduction <maximumf>, %109, %cst_33 [1] : vector<16x16xf32> to vector<16xf32>
    %111 = vector.shape_cast %110 : vector<16xf32> to vector<16x1xf32>
    %112 = vector.broadcast %111 : vector<16x1xf32> to vector<16x16xf32>
    %113 = arith.subf %109, %112 : vector<16x16xf32>
    %114 = math.exp %113 : vector<16x16xf32>
    %cst_34 = arith.constant dense<0.000000e+00> : vector<16xf32>
    %115 = vector.multi_reduction <add>, %114, %cst_34 [1] : vector<16x16xf32> to vector<16xf32>
    %116 = vector.shape_cast %115 : vector<16xf32> to vector<16x1xf32>
    %117 = tpu.reciprocal %116 {approx = true} : vector<16x1xf32> -> vector<16x1xf32>
    %118 = vector.broadcast %117 : vector<16x1xf32> to vector<16x16xf32>
    %119 = arith.mulf %114, %118 : vector<16x16xf32>
    %cst_35 = arith.constant dense<0.000000e+00> : vector<16x8xf32>
    %120 = tpu.matmul %119, %105, %cst_35 {dimension_numbers = #tpu.dot_dimension_numbers<[1], [0], [0], [1], [0, 0, 1, 1], [], []>} : vector<16x16xf32>, vector<16x8xf32>, vector<16x8xf32> -> vector<16x8xf32>
    %121 = vector.extract_strided_slice %66 {offsets = [0, 24], sizes = [16, 8], strides = [1, 1]} : vector<16x96xf32> to vector<16x8xf32>
    %122 = vector.extract_strided_slice %66 {offsets = [0, 56], sizes = [16, 8], strides = [1, 1]} : vector<16x96xf32> to vector<16x8xf32>
    %123 = vector.extract_strided_slice %66 {offsets = [0, 88], sizes = [16, 8], strides = [1, 1]} : vector<16x96xf32> to vector<16x8xf32>
    %cst_36 = arith.constant dense<0.000000e+00> : vector<16x16xf32>
    %124 = tpu.matmul %121, %122, %cst_36 {dimension_numbers = #tpu.dot_dimension_numbers<[1], [1], [0], [0], [0, 0, 1, 0], [], []>} : vector<16x8xf32>, vector<16x8xf32>, vector<16x16xf32> -> vector<16x16xf32>
    %cst_37 = arith.constant 0.353553385 : f32
    %125 = vector.broadcast %cst_37 : f32 to vector<16x16xf32>
    %126 = arith.mulf %124, %125 : vector<16x16xf32>
    %127 = arith.addf %126, %47 : vector<16x16xf32>
    %cst_38 = arith.constant dense<0xFF800000> : vector<16xf32>
    %128 = vector.multi_reduction <maximumf>, %127, %cst_38 [1] : vector<16x16xf32> to vector<16xf32>
    %129 = vector.shape_cast %128 : vector<16xf32> to vector<16x1xf32>
    %130 = vector.broadcast %129 : vector<16x1xf32> to vector<16x16xf32>
    %131 = arith.subf %127, %130 : vector<16x16xf32>
    %132 = math.exp %131 : vector<16x16xf32>
    %cst_39 = arith.constant dense<0.000000e+00> : vector<16xf32>
    %133 = vector.multi_reduction <add>, %132, %cst_39 [1] : vector<16x16xf32> to vector<16xf32>
    %134 = vector.shape_cast %133 : vector<16xf32> to vector<16x1xf32>
    %135 = tpu.reciprocal %134 {approx = true} : vector<16x1xf32> -> vector<16x1xf32>
    %136 = vector.broadcast %135 : vector<16x1xf32> to vector<16x16xf32>
    %137 = arith.mulf %132, %136 : vector<16x16xf32>
    %cst_40 = arith.constant dense<0.000000e+00> : vector<16x8xf32>
    %138 = tpu.matmul %137, %123, %cst_40 {dimension_numbers = #tpu.dot_dimension_numbers<[1], [0], [0], [1], [0, 0, 1, 1], [], []>} : vector<16x16xf32>, vector<16x8xf32>, vector<16x8xf32> -> vector<16x8xf32>
    %139 = tpu.concatenate %84, %102, %120, %138 in 1 : vector<16x8xf32>, vector<16x8xf32>, vector<16x8xf32>, vector<16x8xf32> -> vector<16x32xf32>
    %cst_41 = arith.constant dense<0.000000e+00> : vector<16x32xf32>
    %140 = tpu.matmul %139, %53, %cst_41 {dimension_numbers = #tpu.dot_dimension_numbers<[1], [0], [0], [1], [0, 0, 1, 1], [], []>} : vector<16x32xf32>, vector<32x32xf32>, vector<16x32xf32> -> vector<16x32xf32>
    %141 = arith.addf %9, %140 : vector<16x32xf32>
    %142 = vector.broadcast %57 : vector<1x32xf32> to vector<16x32xf32>
    %143 = arith.addf %141, %142 : vector<16x32xf32>
    %cst_42 = arith.constant dense<0.000000e+00> : vector<16xf32>
    %144 = vector.multi_reduction <add>, %143, %cst_42 [1] : vector<16x32xf32> to vector<16xf32>
    %145 = vector.shape_cast %144 : vector<16xf32> to vector<16x1xf32>
    %cst_43 = arith.constant 3.200000e+01 : f32
    %146 = vector.broadcast %cst_43 : f32 to vector<16x1xf32>
    %147 = arith.divf %145, %146 : vector<16x1xf32>
    %148 = vector.broadcast %147 : vector<16x1xf32> to vector<16x32xf32>
    %149 = arith.subf %143, %148 : vector<16x32xf32>
    %150 = arith.mulf %149, %149 : vector<16x32xf32>
    %cst_44 = arith.constant dense<0.000000e+00> : vector<16xf32>
    %151 = vector.multi_reduction <add>, %150, %cst_44 [1] : vector<16x32xf32> to vector<16xf32>
    %152 = vector.shape_cast %151 : vector<16xf32> to vector<16x1xf32>
    %cst_45 = arith.constant 3.200000e+01 : f32
    %153 = vector.broadcast %cst_45 : f32 to vector<16x1xf32>
    %154 = arith.divf %152, %153 : vector<16x1xf32>
    %cst_46 = arith.constant 9.99999974E-6 : f32
    %155 = vector.broadcast %cst_46 : f32 to vector<16x1xf32>
    %156 = arith.addf %154, %155 : vector<16x1xf32>
    %157 = math.rsqrt %156 : vector<16x1xf32>
    %158 = vector.broadcast %157 : vector<16x1xf32> to vector<16x32xf32>
    %159 = arith.mulf %149, %158 : vector<16x32xf32>
    %160 = vector.broadcast %58 : vector<1x32xf32> to vector<16x32xf32>
    %161 = arith.mulf %159, %160 : vector<16x32xf32>
    %162 = vector.broadcast %59 : vector<1x32xf32> to vector<16x32xf32>
    %163 = arith.addf %161, %162 : vector<16x32xf32>
    %cst_47 = arith.constant dense<0.000000e+00> : vector<16x64xf32>
    %164 = tpu.matmul %163, %54, %cst_47 {dimension_numbers = #tpu.dot_dimension_numbers<[1], [0], [0], [1], [0, 0, 1, 1], [], []>} : vector<16x32xf32>, vector<32x64xf32>, vector<16x64xf32> -> vector<16x64xf32>
    %165 = vector.broadcast %60 : vector<1x64xf32> to vector<16x64xf32>
    %166 = arith.addf %164, %165 : vector<16x64xf32>
    %cst_48 = arith.constant 0.000000e+00 : f32
    %167 = vector.broadcast %cst_48 : f32 to vector<16x64xf32>
    %168 = arith.maximumf %166, %167 : vector<16x64xf32>
    %cst_49 = arith.constant dense<0.000000e+00> : vector<16x32xf32>
    %169 = tpu.matmul %168, %55, %cst_49 {dimension_numbers = #tpu.dot_dimension_numbers<[1], [0], [0], [1], [0, 0, 1, 1], [], []>} : vector<16x64xf32>, vector<64x32xf32>, vector<16x32xf32> -> vector<16x32xf32>
    %170 = vector.broadcast %61 : vector<1x32xf32> to vector<16x32xf32>
    %171 = arith.addf %169, %170 : vector<16x32xf32>
    %172 = arith.addf %163, %171 : vector<16x32xf32>
    %cst_50 = arith.constant dense<0.000000e+00> : vector<16xf32>
    %173 = vector.multi_reduction <add>, %172, %cst_50 [1] : vector<16x32xf32> to vector<16xf32>
    %174 = vector.shape_cast %173 : vector<16xf32> to vector<16x1xf32>
    %cst_51 = arith.constant 3.200000e+01 : f32
    %175 = vector.broadcast %cst_51 : f32 to vector<16x1xf32>
    %176 = arith.divf %174, %175 : vector<16x1xf32>
    %177 = vector.broadcast %176 : vector<16x1xf32> to vector<16x32xf32>
    %178 = arith.subf %172, %177 : vector<16x32xf32>
    %179 = arith.mulf %178, %178 : vector<16x32xf32>
    %cst_52 = arith.constant dense<0.000000e+00> : vector<16xf32>
    %180 = vector.multi_reduction <add>, %179, %cst_52 [1] : vector<16x32xf32> to vector<16xf32>
    %181 = vector.shape_cast %180 : vector<16xf32> to vector<16x1xf32>
    %cst_53 = arith.constant 3.200000e+01 : f32
    %182 = vector.broadcast %cst_53 : f32 to vector<16x1xf32>
    %183 = arith.divf %181, %182 : vector<16x1xf32>
    %cst_54 = arith.constant 9.99999974E-6 : f32
    %184 = vector.broadcast %cst_54 : f32 to vector<16x1xf32>
    %185 = arith.addf %183, %184 : vector<16x1xf32>
    %186 = math.rsqrt %185 : vector<16x1xf32>
    %187 = vector.broadcast %186 : vector<16x1xf32> to vector<16x32xf32>
    %188 = arith.mulf %178, %187 : vector<16x32xf32>
    %189 = vector.broadcast %62 : vector<1x32xf32> to vector<16x32xf32>
    %190 = arith.mulf %188, %189 : vector<16x32xf32>
    %191 = vector.broadcast %63 : vector<1x32xf32> to vector<16x32xf32>
    %192 = arith.addf %190, %191 : vector<16x32xf32>
    %cst_55 = arith.constant dense<0.000000e+00> : vector<16xf32>
    %193 = vector.multi_reduction <add>, %192, %cst_55 [1] : vector<16x32xf32> to vector<16xf32>
    %194 = vector.shape_cast %193 : vector<16xf32> to vector<16x1xf32>
    %cst_56 = arith.constant 3.200000e+01 : f32
    %195 = vector.broadcast %cst_56 : f32 to vector<16x1xf32>
    %196 = arith.divf %194, %195 : vector<16x1xf32>
    %197 = vector.broadcast %196 : vector<16x1xf32> to vector<16x32xf32>
    %198 = arith.subf %192, %197 : vector<16x32xf32>
    %199 = arith.mulf %198, %198 : vector<16x32xf32>
    %cst_57 = arith.constant dense<0.000000e+00> : vector<16xf32>
    %200 = vector.multi_reduction <add>, %199, %cst_57 [1] : vector<16x32xf32> to vector<16xf32>
    %201 = vector.shape_cast %200 : vector<16xf32> to vector<16x1xf32>
    %cst_58 = arith.constant 3.200000e+01 : f32
    %202 = vector.broadcast %cst_58 : f32 to vector<16x1xf32>
    %203 = arith.divf %201, %202 : vector<16x1xf32>
    %cst_59 = arith.constant 9.99999974E-6 : f32
    %204 = vector.broadcast %cst_59 : f32 to vector<16x1xf32>
    %205 = arith.addf %203, %204 : vector<16x1xf32>
    %206 = math.rsqrt %205 : vector<16x1xf32>
    %207 = vector.broadcast %206 : vector<16x1xf32> to vector<16x32xf32>
    %208 = arith.mulf %198, %207 : vector<16x32xf32>
    %209 = vector.broadcast %5 : vector<1x32xf32> to vector<16x32xf32>
    %210 = arith.mulf %208, %209 : vector<16x32xf32>
    %211 = vector.broadcast %6 : vector<1x32xf32> to vector<16x32xf32>
    %212 = arith.addf %210, %211 : vector<16x32xf32>
    %213 = vector.broadcast %2 : vector<16x1xf32> to vector<16x32xf32>
    %214 = arith.mulf %212, %213 : vector<16x32xf32>
    %c330 = arith.constant 330 : index
    %c0_60 = arith.constant 0 : index
    %215 = vector.load %arg8[%c330, %c0_60] : memref<336x64xf32, #tpu.memory_space<vmem>>, vector<6x64xf32>
    %216 = vector.extract_strided_slice %215 {offsets = [0, 0], sizes = [1, 32], strides = [1, 1]} : vector<6x64xf32> to vector<1x32xf32>
    %217 = vector.extract_strided_slice %215 {offsets = [1, 0], sizes = [1, 32], strides = [1, 1]} : vector<6x64xf32> to vector<1x32xf32>
    %218 = vector.extract_strided_slice %215 {offsets = [2, 0], sizes = [1, 64], strides = [1, 1]} : vector<6x64xf32> to vector<1x64xf32>
    %219 = vector.extract_strided_slice %215 {offsets = [3, 0], sizes = [1, 64], strides = [1, 1]} : vector<6x64xf32> to vector<1x64xf32>
    %220 = vector.extract_strided_slice %215 {offsets = [4, 0], sizes = [1, 64], strides = [1, 1]} : vector<6x64xf32> to vector<1x64xf32>
    %221 = vector.extract_strided_slice %215 {offsets = [5, 0], sizes = [1, 64], strides = [1, 1]} : vector<6x64xf32> to vector<1x64xf32>
    %cst_61 = arith.constant 0.000000e+00 : f32
    %222 = vector.broadcast %cst_61 : f32 to vector<2x64xf32>
    %223 = vector.extract_strided_slice %214 {offsets = [0, 0], sizes = [2, 32], strides = [1, 1]} : vector<16x32xf32> to vector<2x32xf32>
    %c0_62 = arith.constant 0 : index
    %c0_63 = arith.constant 0 : index
    %224 = vector.load %arg8[%c0_62, %c0_63] : memref<336x64xf32, #tpu.memory_space<vmem>>, vector<32x64xf32>
    %cst_64 = arith.constant dense<0.000000e+00> : vector<2x64xf32>
    %225 = tpu.matmul %223, %224, %cst_64 {dimension_numbers = #tpu.dot_dimension_numbers<[1], [0], [0], [1], [0, 0, 1, 1], [], []>} : vector<2x32xf32>, vector<32x64xf32>, vector<2x64xf32> -> vector<2x64xf32>
    %226 = arith.addf %222, %225 : vector<2x64xf32>
    %227 = vector.extract_strided_slice %214 {offsets = [2, 0], sizes = [2, 32], strides = [1, 1]} : vector<16x32xf32> to vector<2x32xf32>
    %c32 = arith.constant 32 : index
    %c0_65 = arith.constant 0 : index
    %228 = vector.load %arg8[%c32, %c0_65] : memref<336x64xf32, #tpu.memory_space<vmem>>, vector<32x64xf32>
    %cst_66 = arith.constant dense<0.000000e+00> : vector<2x64xf32>
    %229 = tpu.matmul %227, %228, %cst_66 {dimension_numbers = #tpu.dot_dimension_numbers<[1], [0], [0], [1], [0, 0, 1, 1], [], []>} : vector<2x32xf32>, vector<32x64xf32>, vector<2x64xf32> -> vector<2x64xf32>
    %230 = arith.addf %226, %229 : vector<2x64xf32>
    %231 = vector.extract_strided_slice %214 {offsets = [4, 0], sizes = [2, 32], strides = [1, 1]} : vector<16x32xf32> to vector<2x32xf32>
    %c64 = arith.constant 64 : index
    %c0_67 = arith.constant 0 : index
    %232 = vector.load %arg8[%c64, %c0_67] : memref<336x64xf32, #tpu.memory_space<vmem>>, vector<32x64xf32>
    %cst_68 = arith.constant dense<0.000000e+00> : vector<2x64xf32>
    %233 = tpu.matmul %231, %232, %cst_68 {dimension_numbers = #tpu.dot_dimension_numbers<[1], [0], [0], [1], [0, 0, 1, 1], [], []>} : vector<2x32xf32>, vector<32x64xf32>, vector<2x64xf32> -> vector<2x64xf32>
    %234 = arith.addf %230, %233 : vector<2x64xf32>
    %235 = vector.extract_strided_slice %214 {offsets = [6, 0], sizes = [2, 32], strides = [1, 1]} : vector<16x32xf32> to vector<2x32xf32>
    %c96 = arith.constant 96 : index
    %c0_69 = arith.constant 0 : index
    %236 = vector.load %arg8[%c96, %c0_69] : memref<336x64xf32, #tpu.memory_space<vmem>>, vector<32x64xf32>
    %cst_70 = arith.constant dense<0.000000e+00> : vector<2x64xf32>
    %237 = tpu.matmul %235, %236, %cst_70 {dimension_numbers = #tpu.dot_dimension_numbers<[1], [0], [0], [1], [0, 0, 1, 1], [], []>} : vector<2x32xf32>, vector<32x64xf32>, vector<2x64xf32> -> vector<2x64xf32>
    %238 = arith.addf %234, %237 : vector<2x64xf32>
    %239 = vector.extract_strided_slice %214 {offsets = [8, 0], sizes = [2, 32], strides = [1, 1]} : vector<16x32xf32> to vector<2x32xf32>
    %c128 = arith.constant 128 : index
    %c0_71 = arith.constant 0 : index
    %240 = vector.load %arg8[%c128, %c0_71] : memref<336x64xf32, #tpu.memory_space<vmem>>, vector<32x64xf32>
    %cst_72 = arith.constant dense<0.000000e+00> : vector<2x64xf32>
    %241 = tpu.matmul %239, %240, %cst_72 {dimension_numbers = #tpu.dot_dimension_numbers<[1], [0], [0], [1], [0, 0, 1, 1], [], []>} : vector<2x32xf32>, vector<32x64xf32>, vector<2x64xf32> -> vector<2x64xf32>
    %242 = arith.addf %238, %241 : vector<2x64xf32>
    %243 = vector.extract_strided_slice %214 {offsets = [10, 0], sizes = [2, 32], strides = [1, 1]} : vector<16x32xf32> to vector<2x32xf32>
    %c160 = arith.constant 160 : index
    %c0_73 = arith.constant 0 : index
    %244 = vector.load %arg8[%c160, %c0_73] : memref<336x64xf32, #tpu.memory_space<vmem>>, vector<32x64xf32>
    %cst_74 = arith.constant dense<0.000000e+00> : vector<2x64xf32>
    %245 = tpu.matmul %243, %244, %cst_74 {dimension_numbers = #tpu.dot_dimension_numbers<[1], [0], [0], [1], [0, 0, 1, 1], [], []>} : vector<2x32xf32>, vector<32x64xf32>, vector<2x64xf32> -> vector<2x64xf32>
    %246 = arith.addf %242, %245 : vector<2x64xf32>
    %247 = vector.extract_strided_slice %214 {offsets = [12, 0], sizes = [2, 32], strides = [1, 1]} : vector<16x32xf32> to vector<2x32xf32>
    %c192 = arith.constant 192 : index
    %c0_75 = arith.constant 0 : index
    %248 = vector.load %arg8[%c192, %c0_75] : memref<336x64xf32, #tpu.memory_space<vmem>>, vector<32x64xf32>
    %cst_76 = arith.constant dense<0.000000e+00> : vector<2x64xf32>
    %249 = tpu.matmul %247, %248, %cst_76 {dimension_numbers = #tpu.dot_dimension_numbers<[1], [0], [0], [1], [0, 0, 1, 1], [], []>} : vector<2x32xf32>, vector<32x64xf32>, vector<2x64xf32> -> vector<2x64xf32>
    %250 = arith.addf %246, %249 : vector<2x64xf32>
    %251 = vector.extract_strided_slice %214 {offsets = [14, 0], sizes = [2, 32], strides = [1, 1]} : vector<16x32xf32> to vector<2x32xf32>
    %c224 = arith.constant 224 : index
    %c0_77 = arith.constant 0 : index
    %252 = vector.load %arg8[%c224, %c0_77] : memref<336x64xf32, #tpu.memory_space<vmem>>, vector<32x64xf32>
    %cst_78 = arith.constant dense<0.000000e+00> : vector<2x64xf32>
    %253 = tpu.matmul %251, %252, %cst_78 {dimension_numbers = #tpu.dot_dimension_numbers<[1], [0], [0], [1], [0, 0, 1, 1], [], []>} : vector<2x32xf32>, vector<32x64xf32>, vector<2x64xf32> -> vector<2x64xf32>
    %254 = arith.addf %250, %253 : vector<2x64xf32>
    %255 = vector.broadcast %218 : vector<1x64xf32> to vector<2x64xf32>
    %256 = arith.addf %254, %255 : vector<2x64xf32>
    %c0_79 = arith.constant 0 : index
    %c0_80 = arith.constant 0 : index
    %257 = vector.load %arg4[%c0_79, %c0_80] : memref<16x151xf32, #tpu.memory_space<vmem>>, vector<16x151xf32>
    %c0_81 = arith.constant 0 : index
    %c0_82 = arith.constant 0 : index
    %258 = vector.load %arg5[%c0_81, %c0_82] : memref<16x17xf32, #tpu.memory_space<vmem>>, vector<16x17xf32>
    %259 = vector.extract_strided_slice %257 {offsets = [0, 0], sizes = [8, 151], strides = [1, 1]} : vector<16x151xf32> to vector<8x151xf32>
    %260 = vector.extract_strided_slice %257 {offsets = [8, 0], sizes = [8, 151], strides = [1, 1]} : vector<16x151xf32> to vector<8x151xf32>
    %261 = vector.extract_strided_slice %258 {offsets = [0, 13], sizes = [8, 1], strides = [1, 1]} : vector<16x17xf32> to vector<8x1xf32>
    %262 = vector.extract_strided_slice %258 {offsets = [0, 14], sizes = [8, 1], strides = [1, 1]} : vector<16x17xf32> to vector<8x1xf32>
    %263 = vector.extract_strided_slice %258 {offsets = [0, 15], sizes = [8, 1], strides = [1, 1]} : vector<16x17xf32> to vector<8x1xf32>
    %264 = vector.extract_strided_slice %258 {offsets = [0, 16], sizes = [8, 1], strides = [1, 1]} : vector<16x17xf32> to vector<8x1xf32>
    %265 = vector.extract_strided_slice %259 {offsets = [0, 0], sizes = [8, 150], strides = [1, 1]} : vector<8x151xf32> to vector<8x150xf32>
    %266 = vector.broadcast %261 : vector<8x1xf32> to vector<8x150xf32>
    %267 = arith.mulf %266, %265 : vector<8x150xf32>
    %268 = vector.extract_strided_slice %260 {offsets = [0, 0], sizes = [8, 150], strides = [1, 1]} : vector<8x151xf32> to vector<8x150xf32>
    %269 = vector.broadcast %262 : vector<8x1xf32> to vector<8x150xf32>
    %270 = arith.mulf %269, %268 : vector<8x150xf32>
    %271 = arith.addf %267, %270 : vector<8x150xf32>
    %272 = vector.extract_strided_slice %259 {offsets = [0, 1], sizes = [8, 150], strides = [1, 1]} : vector<8x151xf32> to vector<8x150xf32>
    %273 = vector.broadcast %263 : vector<8x1xf32> to vector<8x150xf32>
    %274 = arith.mulf %273, %272 : vector<8x150xf32>
    %275 = arith.addf %271, %274 : vector<8x150xf32>
    %276 = vector.broadcast %264 : vector<8x1xf32> to vector<8x150xf32>
    %277 = arith.addf %275, %276 : vector<8x150xf32>
    %278 = vector.extract_strided_slice %260 {offsets = [0, 0], sizes = [8, 150], strides = [1, 1]} : vector<8x151xf32> to vector<8x150xf32>
    %279 = vector.broadcast %261 : vector<8x1xf32> to vector<8x150xf32>
    %280 = arith.mulf %279, %278 : vector<8x150xf32>
    %281 = vector.extract_strided_slice %259 {offsets = [0, 1], sizes = [8, 150], strides = [1, 1]} : vector<8x151xf32> to vector<8x150xf32>
    %282 = vector.broadcast %262 : vector<8x1xf32> to vector<8x150xf32>
    %283 = arith.mulf %282, %281 : vector<8x150xf32>
    %284 = arith.addf %280, %283 : vector<8x150xf32>
    %285 = vector.extract_strided_slice %260 {offsets = [0, 1], sizes = [8, 150], strides = [1, 1]} : vector<8x151xf32> to vector<8x150xf32>
    %286 = vector.broadcast %263 : vector<8x1xf32> to vector<8x150xf32>
    %287 = arith.mulf %286, %285 : vector<8x150xf32>
    %288 = arith.addf %284, %287 : vector<8x150xf32>
    %289 = vector.broadcast %264 : vector<8x1xf32> to vector<8x150xf32>
    %290 = arith.addf %288, %289 : vector<8x150xf32>
    %291 = arith.maximumf %277, %290 : vector<8x150xf32>
    %cst_83 = arith.constant 0.000000e+00 : f32
    %292 = vector.broadcast %cst_83 : f32 to vector<8x150xf32>
    %293 = arith.maximumf %291, %292 : vector<8x150xf32>
    %294 = vector.extract_strided_slice %258 {offsets = [0, 12], sizes = [16, 1], strides = [1, 1]} : vector<16x17xf32> to vector<16x1xf32>
    %295 = vector.extract_strided_slice %293 {offsets = [0, 0], sizes = [2, 150], strides = [1, 1]} : vector<8x150xf32> to vector<2x150xf32>
    %296 = tpu.concatenate %295, %295, %295, %295, %295, %295, %295, %295 in 0 : vector<2x150xf32>, vector<2x150xf32>, vector<2x150xf32>, vector<2x150xf32>, vector<2x150xf32>, vector<2x150xf32>, vector<2x150xf32>, vector<2x150xf32> -> vector<16x150xf32>
    %297 = vector.extract_strided_slice %258 {offsets = [0, 0], sizes = [16, 1], strides = [1, 1]} : vector<16x17xf32> to vector<16x1xf32>
    %298 = vector.extract_strided_slice %296 {offsets = [0, 0], sizes = [16, 148], strides = [1, 1]} : vector<16x150xf32> to vector<16x148xf32>
    %299 = vector.broadcast %297 : vector<16x1xf32> to vector<16x148xf32>
    %300 = arith.mulf %299, %298 : vector<16x148xf32>
    %301 = vector.extract_strided_slice %258 {offsets = [0, 1], sizes = [16, 1], strides = [1, 1]} : vector<16x17xf32> to vector<16x1xf32>
    %302 = vector.extract_strided_slice %296 {offsets = [0, 1], sizes = [16, 148], strides = [1, 1]} : vector<16x150xf32> to vector<16x148xf32>
    %303 = vector.broadcast %301 : vector<16x1xf32> to vector<16x148xf32>
    %304 = arith.mulf %303, %302 : vector<16x148xf32>
    %305 = arith.addf %300, %304 : vector<16x148xf32>
    %306 = vector.extract_strided_slice %258 {offsets = [0, 2], sizes = [16, 1], strides = [1, 1]} : vector<16x17xf32> to vector<16x1xf32>
    %307 = vector.extract_strided_slice %296 {offsets = [0, 2], sizes = [16, 148], strides = [1, 1]} : vector<16x150xf32> to vector<16x148xf32>
    %308 = vector.broadcast %306 : vector<16x1xf32> to vector<16x148xf32>
    %309 = arith.mulf %308, %307 : vector<16x148xf32>
    %310 = arith.addf %305, %309 : vector<16x148xf32>
    %311 = vector.extract_strided_slice %293 {offsets = [2, 0], sizes = [2, 150], strides = [1, 1]} : vector<8x150xf32> to vector<2x150xf32>
    %312 = tpu.concatenate %311, %311, %311, %311, %311, %311, %311, %311 in 0 : vector<2x150xf32>, vector<2x150xf32>, vector<2x150xf32>, vector<2x150xf32>, vector<2x150xf32>, vector<2x150xf32>, vector<2x150xf32>, vector<2x150xf32> -> vector<16x150xf32>
    %313 = vector.extract_strided_slice %258 {offsets = [0, 3], sizes = [16, 1], strides = [1, 1]} : vector<16x17xf32> to vector<16x1xf32>
    %314 = vector.extract_strided_slice %312 {offsets = [0, 0], sizes = [16, 148], strides = [1, 1]} : vector<16x150xf32> to vector<16x148xf32>
    %315 = vector.broadcast %313 : vector<16x1xf32> to vector<16x148xf32>
    %316 = arith.mulf %315, %314 : vector<16x148xf32>
    %317 = arith.addf %310, %316 : vector<16x148xf32>
    %318 = vector.extract_strided_slice %258 {offsets = [0, 4], sizes = [16, 1], strides = [1, 1]} : vector<16x17xf32> to vector<16x1xf32>
    %319 = vector.extract_strided_slice %312 {offsets = [0, 1], sizes = [16, 148], strides = [1, 1]} : vector<16x150xf32> to vector<16x148xf32>
    %320 = vector.broadcast %318 : vector<16x1xf32> to vector<16x148xf32>
    %321 = arith.mulf %320, %319 : vector<16x148xf32>
    %322 = arith.addf %317, %321 : vector<16x148xf32>
    %323 = vector.extract_strided_slice %258 {offsets = [0, 5], sizes = [16, 1], strides = [1, 1]} : vector<16x17xf32> to vector<16x1xf32>
    %324 = vector.extract_strided_slice %312 {offsets = [0, 2], sizes = [16, 148], strides = [1, 1]} : vector<16x150xf32> to vector<16x148xf32>
    %325 = vector.broadcast %323 : vector<16x1xf32> to vector<16x148xf32>
    %326 = arith.mulf %325, %324 : vector<16x148xf32>
    %327 = arith.addf %322, %326 : vector<16x148xf32>
    %328 = vector.extract_strided_slice %293 {offsets = [4, 0], sizes = [2, 150], strides = [1, 1]} : vector<8x150xf32> to vector<2x150xf32>
    %329 = tpu.concatenate %328, %328, %328, %328, %328, %328, %328, %328 in 0 : vector<2x150xf32>, vector<2x150xf32>, vector<2x150xf32>, vector<2x150xf32>, vector<2x150xf32>, vector<2x150xf32>, vector<2x150xf32>, vector<2x150xf32> -> vector<16x150xf32>
    %330 = vector.extract_strided_slice %258 {offsets = [0, 6], sizes = [16, 1], strides = [1, 1]} : vector<16x17xf32> to vector<16x1xf32>
    %331 = vector.extract_strided_slice %329 {offsets = [0, 0], sizes = [16, 148], strides = [1, 1]} : vector<16x150xf32> to vector<16x148xf32>
    %332 = vector.broadcast %330 : vector<16x1xf32> to vector<16x148xf32>
    %333 = arith.mulf %332, %331 : vector<16x148xf32>
    %334 = arith.addf %327, %333 : vector<16x148xf32>
    %335 = vector.extract_strided_slice %258 {offsets = [0, 7], sizes = [16, 1], strides = [1, 1]} : vector<16x17xf32> to vector<16x1xf32>
    %336 = vector.extract_strided_slice %329 {offsets = [0, 1], sizes = [16, 148], strides = [1, 1]} : vector<16x150xf32> to vector<16x148xf32>
    %337 = vector.broadcast %335 : vector<16x1xf32> to vector<16x148xf32>
    %338 = arith.mulf %337, %336 : vector<16x148xf32>
    %339 = arith.addf %334, %338 : vector<16x148xf32>
    %340 = vector.extract_strided_slice %258 {offsets = [0, 8], sizes = [16, 1], strides = [1, 1]} : vector<16x17xf32> to vector<16x1xf32>
    %341 = vector.extract_strided_slice %329 {offsets = [0, 2], sizes = [16, 148], strides = [1, 1]} : vector<16x150xf32> to vector<16x148xf32>
    %342 = vector.broadcast %340 : vector<16x1xf32> to vector<16x148xf32>
    %343 = arith.mulf %342, %341 : vector<16x148xf32>
    %344 = arith.addf %339, %343 : vector<16x148xf32>
    %345 = vector.extract_strided_slice %293 {offsets = [6, 0], sizes = [2, 150], strides = [1, 1]} : vector<8x150xf32> to vector<2x150xf32>
    %346 = tpu.concatenate %345, %345, %345, %345, %345, %345, %345, %345 in 0 : vector<2x150xf32>, vector<2x150xf32>, vector<2x150xf32>, vector<2x150xf32>, vector<2x150xf32>, vector<2x150xf32>, vector<2x150xf32>, vector<2x150xf32> -> vector<16x150xf32>
    %347 = vector.extract_strided_slice %258 {offsets = [0, 9], sizes = [16, 1], strides = [1, 1]} : vector<16x17xf32> to vector<16x1xf32>
    %348 = vector.extract_strided_slice %346 {offsets = [0, 0], sizes = [16, 148], strides = [1, 1]} : vector<16x150xf32> to vector<16x148xf32>
    %349 = vector.broadcast %347 : vector<16x1xf32> to vector<16x148xf32>
    %350 = arith.mulf %349, %348 : vector<16x148xf32>
    %351 = arith.addf %344, %350 : vector<16x148xf32>
    %352 = vector.extract_strided_slice %258 {offsets = [0, 10], sizes = [16, 1], strides = [1, 1]} : vector<16x17xf32> to vector<16x1xf32>
    %353 = vector.extract_strided_slice %346 {offsets = [0, 1], sizes = [16, 148], strides = [1, 1]} : vector<16x150xf32> to vector<16x148xf32>
    %354 = vector.broadcast %352 : vector<16x1xf32> to vector<16x148xf32>
    %355 = arith.mulf %354, %353 : vector<16x148xf32>
    %356 = arith.addf %351, %355 : vector<16x148xf32>
    %357 = vector.extract_strided_slice %258 {offsets = [0, 11], sizes = [16, 1], strides = [1, 1]} : vector<16x17xf32> to vector<16x1xf32>
    %358 = vector.extract_strided_slice %346 {offsets = [0, 2], sizes = [16, 148], strides = [1, 1]} : vector<16x150xf32> to vector<16x148xf32>
    %359 = vector.broadcast %357 : vector<16x1xf32> to vector<16x148xf32>
    %360 = arith.mulf %359, %358 : vector<16x148xf32>
    %361 = arith.addf %356, %360 : vector<16x148xf32>
    %362 = vector.broadcast %294 : vector<16x1xf32> to vector<16x148xf32>
    %363 = arith.addf %361, %362 : vector<16x148xf32>
    %cst_84 = arith.constant 0.000000e+00 : f32
    %364 = vector.broadcast %cst_84 : f32 to vector<16x148xf32>
    %365 = arith.maximumf %363, %364 : vector<16x148xf32>
    %cst_85 = arith.constant 0.000000e+00 : f32
    %366 = vector.broadcast %cst_85 : f32 to vector<2x64xf32>
    %367 = vector.extract_strided_slice %365 {offsets = [0, 0], sizes = [2, 148], strides = [1, 1]} : vector<16x148xf32> to vector<2x148xf32>
    %c0_86 = arith.constant 0 : index
    %c0_87 = arith.constant 0 : index
    %c0_88 = arith.constant 0 : index
    %368 = vector.load %arg6[%c0_86, %c0_87, %c0_88] : memref<8x148x64xf32, #tpu.memory_space<vmem>>, vector<1x148x64xf32>
    %369 = vector.shape_cast %368 : vector<1x148x64xf32> to vector<148x64xf32>
    %cst_89 = arith.constant dense<0.000000e+00> : vector<2x64xf32>
    %370 = tpu.matmul %367, %369, %cst_89 {dimension_numbers = #tpu.dot_dimension_numbers<[1], [0], [0], [1], [0, 0, 1, 1], [], []>} : vector<2x148xf32>, vector<148x64xf32>, vector<2x64xf32> -> vector<2x64xf32>
    %371 = arith.addf %366, %370 : vector<2x64xf32>
    %372 = vector.extract_strided_slice %365 {offsets = [2, 0], sizes = [2, 148], strides = [1, 1]} : vector<16x148xf32> to vector<2x148xf32>
    %c1 = arith.constant 1 : index
    %c0_90 = arith.constant 0 : index
    %c0_91 = arith.constant 0 : index
    %373 = vector.load %arg6[%c1, %c0_90, %c0_91] : memref<8x148x64xf32, #tpu.memory_space<vmem>>, vector<1x148x64xf32>
    %374 = vector.shape_cast %373 : vector<1x148x64xf32> to vector<148x64xf32>
    %cst_92 = arith.constant dense<0.000000e+00> : vector<2x64xf32>
    %375 = tpu.matmul %372, %374, %cst_92 {dimension_numbers = #tpu.dot_dimension_numbers<[1], [0], [0], [1], [0, 0, 1, 1], [], []>} : vector<2x148xf32>, vector<148x64xf32>, vector<2x64xf32> -> vector<2x64xf32>
    %376 = arith.addf %371, %375 : vector<2x64xf32>
    %377 = vector.extract_strided_slice %365 {offsets = [4, 0], sizes = [2, 148], strides = [1, 1]} : vector<16x148xf32> to vector<2x148xf32>
    %c2 = arith.constant 2 : index
    %c0_93 = arith.constant 0 : index
    %c0_94 = arith.constant 0 : index
    %378 = vector.load %arg6[%c2, %c0_93, %c0_94] : memref<8x148x64xf32, #tpu.memory_space<vmem>>, vector<1x148x64xf32>
    %379 = vector.shape_cast %378 : vector<1x148x64xf32> to vector<148x64xf32>
    %cst_95 = arith.constant dense<0.000000e+00> : vector<2x64xf32>
    %380 = tpu.matmul %377, %379, %cst_95 {dimension_numbers = #tpu.dot_dimension_numbers<[1], [0], [0], [1], [0, 0, 1, 1], [], []>} : vector<2x148xf32>, vector<148x64xf32>, vector<2x64xf32> -> vector<2x64xf32>
    %381 = arith.addf %376, %380 : vector<2x64xf32>
    %382 = vector.extract_strided_slice %365 {offsets = [6, 0], sizes = [2, 148], strides = [1, 1]} : vector<16x148xf32> to vector<2x148xf32>
    %c3 = arith.constant 3 : index
    %c0_96 = arith.constant 0 : index
    %c0_97 = arith.constant 0 : index
    %383 = vector.load %arg6[%c3, %c0_96, %c0_97] : memref<8x148x64xf32, #tpu.memory_space<vmem>>, vector<1x148x64xf32>
    %384 = vector.shape_cast %383 : vector<1x148x64xf32> to vector<148x64xf32>
    %cst_98 = arith.constant dense<0.000000e+00> : vector<2x64xf32>
    %385 = tpu.matmul %382, %384, %cst_98 {dimension_numbers = #tpu.dot_dimension_numbers<[1], [0], [0], [1], [0, 0, 1, 1], [], []>} : vector<2x148xf32>, vector<148x64xf32>, vector<2x64xf32> -> vector<2x64xf32>
    %386 = arith.addf %381, %385 : vector<2x64xf32>
    %387 = vector.extract_strided_slice %365 {offsets = [8, 0], sizes = [2, 148], strides = [1, 1]} : vector<16x148xf32> to vector<2x148xf32>
    %c4 = arith.constant 4 : index
    %c0_99 = arith.constant 0 : index
    %c0_100 = arith.constant 0 : index
    %388 = vector.load %arg6[%c4, %c0_99, %c0_100] : memref<8x148x64xf32, #tpu.memory_space<vmem>>, vector<1x148x64xf32>
    %389 = vector.shape_cast %388 : vector<1x148x64xf32> to vector<148x64xf32>
    %cst_101 = arith.constant dense<0.000000e+00> : vector<2x64xf32>
    %390 = tpu.matmul %387, %389, %cst_101 {dimension_numbers = #tpu.dot_dimension_numbers<[1], [0], [0], [1], [0, 0, 1, 1], [], []>} : vector<2x148xf32>, vector<148x64xf32>, vector<2x64xf32> -> vector<2x64xf32>
    %391 = arith.addf %386, %390 : vector<2x64xf32>
    %392 = vector.extract_strided_slice %365 {offsets = [10, 0], sizes = [2, 148], strides = [1, 1]} : vector<16x148xf32> to vector<2x148xf32>
    %c5 = arith.constant 5 : index
    %c0_102 = arith.constant 0 : index
    %c0_103 = arith.constant 0 : index
    %393 = vector.load %arg6[%c5, %c0_102, %c0_103] : memref<8x148x64xf32, #tpu.memory_space<vmem>>, vector<1x148x64xf32>
    %394 = vector.shape_cast %393 : vector<1x148x64xf32> to vector<148x64xf32>
    %cst_104 = arith.constant dense<0.000000e+00> : vector<2x64xf32>
    %395 = tpu.matmul %392, %394, %cst_104 {dimension_numbers = #tpu.dot_dimension_numbers<[1], [0], [0], [1], [0, 0, 1, 1], [], []>} : vector<2x148xf32>, vector<148x64xf32>, vector<2x64xf32> -> vector<2x64xf32>
    %396 = arith.addf %391, %395 : vector<2x64xf32>
    %397 = vector.extract_strided_slice %365 {offsets = [12, 0], sizes = [2, 148], strides = [1, 1]} : vector<16x148xf32> to vector<2x148xf32>
    %c6 = arith.constant 6 : index
    %c0_105 = arith.constant 0 : index
    %c0_106 = arith.constant 0 : index
    %398 = vector.load %arg6[%c6, %c0_105, %c0_106] : memref<8x148x64xf32, #tpu.memory_space<vmem>>, vector<1x148x64xf32>
    %399 = vector.shape_cast %398 : vector<1x148x64xf32> to vector<148x64xf32>
    %cst_107 = arith.constant dense<0.000000e+00> : vector<2x64xf32>
    %400 = tpu.matmul %397, %399, %cst_107 {dimension_numbers = #tpu.dot_dimension_numbers<[1], [0], [0], [1], [0, 0, 1, 1], [], []>} : vector<2x148xf32>, vector<148x64xf32>, vector<2x64xf32> -> vector<2x64xf32>
    %401 = arith.addf %396, %400 : vector<2x64xf32>
    %402 = vector.extract_strided_slice %365 {offsets = [14, 0], sizes = [2, 148], strides = [1, 1]} : vector<16x148xf32> to vector<2x148xf32>
    %c7 = arith.constant 7 : index
    %c0_108 = arith.constant 0 : index
    %c0_109 = arith.constant 0 : index
    %403 = vector.load %arg6[%c7, %c0_108, %c0_109] : memref<8x148x64xf32, #tpu.memory_space<vmem>>, vector<1x148x64xf32>
    %404 = vector.shape_cast %403 : vector<1x148x64xf32> to vector<148x64xf32>
    %cst_110 = arith.constant dense<0.000000e+00> : vector<2x64xf32>
    %405 = tpu.matmul %402, %404, %cst_110 {dimension_numbers = #tpu.dot_dimension_numbers<[1], [0], [0], [1], [0, 0, 1, 1], [], []>} : vector<2x148xf32>, vector<148x64xf32>, vector<2x64xf32> -> vector<2x64xf32>
    %406 = arith.addf %401, %405 : vector<2x64xf32>
    %407 = vector.broadcast %219 : vector<1x64xf32> to vector<2x64xf32>
    %408 = arith.addf %406, %407 : vector<2x64xf32>
    %c256 = arith.constant 256 : index
    %c0_111 = arith.constant 0 : index
    %409 = vector.load %arg8[%c256, %c0_111] : memref<336x64xf32, #tpu.memory_space<vmem>>, vector<10x32xf32>
    %c266 = arith.constant 266 : index
    %c0_112 = arith.constant 0 : index
    %410 = vector.load %arg8[%c266, %c0_112] : memref<336x64xf32, #tpu.memory_space<vmem>>, vector<32x32xf32>
    %c298 = arith.constant 298 : index
    %c0_113 = arith.constant 0 : index
    %411 = vector.load %arg8[%c298, %c0_113] : memref<336x64xf32, #tpu.memory_space<vmem>>, vector<32x64xf32>
    %c0_114 = arith.constant 0 : index
    %c0_115 = arith.constant 0 : index
    %412 = vector.load %arg7[%c0_114, %c0_115] : memref<2x10xf32, #tpu.memory_space<vmem>>, vector<2x10xf32>
    %cst_116 = arith.constant dense<0.000000e+00> : vector<2x32xf32>
    %413 = tpu.matmul %412, %409, %cst_116 {dimension_numbers = #tpu.dot_dimension_numbers<[1], [0], [0], [1], [0, 0, 1, 1], [], []>} : vector<2x10xf32>, vector<10x32xf32>, vector<2x32xf32> -> vector<2x32xf32>
    %414 = vector.broadcast %216 : vector<1x32xf32> to vector<2x32xf32>
    %415 = arith.addf %413, %414 : vector<2x32xf32>
    %cst_117 = arith.constant 0.000000e+00 : f32
    %416 = vector.broadcast %cst_117 : f32 to vector<2x32xf32>
    %417 = arith.maximumf %415, %416 : vector<2x32xf32>
    %cst_118 = arith.constant dense<0.000000e+00> : vector<2x32xf32>
    %418 = tpu.matmul %417, %410, %cst_118 {dimension_numbers = #tpu.dot_dimension_numbers<[1], [0], [0], [1], [0, 0, 1, 1], [], []>} : vector<2x32xf32>, vector<32x32xf32>, vector<2x32xf32> -> vector<2x32xf32>
    %419 = vector.broadcast %217 : vector<1x32xf32> to vector<2x32xf32>
    %420 = arith.addf %418, %419 : vector<2x32xf32>
    %cst_119 = arith.constant 0.000000e+00 : f32
    %421 = vector.broadcast %cst_119 : f32 to vector<2x32xf32>
    %422 = arith.maximumf %420, %421 : vector<2x32xf32>
    %cst_120 = arith.constant dense<0.000000e+00> : vector<2x64xf32>
    %423 = tpu.matmul %422, %411, %cst_120 {dimension_numbers = #tpu.dot_dimension_numbers<[1], [0], [0], [1], [0, 0, 1, 1], [], []>} : vector<2x32xf32>, vector<32x64xf32>, vector<2x64xf32> -> vector<2x64xf32>
    %424 = vector.broadcast %220 : vector<1x64xf32> to vector<2x64xf32>
    %425 = arith.addf %423, %424 : vector<2x64xf32>
    %426 = arith.mulf %256, %256 : vector<2x64xf32>
    %cst_121 = arith.constant dense<0.000000e+00> : vector<2xf32>
    %427 = vector.multi_reduction <add>, %426, %cst_121 [1] : vector<2x64xf32> to vector<2xf32>
    %428 = vector.shape_cast %427 : vector<2xf32> to vector<2x1xf32>
    %cst_122 = arith.constant 9.99999996E-13 : f32
    %429 = vector.broadcast %cst_122 : f32 to vector<2x1xf32>
    %430 = arith.addf %428, %429 : vector<2x1xf32>
    %431 = math.rsqrt %430 : vector<2x1xf32>
    %432 = vector.broadcast %431 : vector<2x1xf32> to vector<2x64xf32>
    %433 = arith.mulf %256, %432 : vector<2x64xf32>
    %434 = arith.mulf %408, %408 : vector<2x64xf32>
    %cst_123 = arith.constant dense<0.000000e+00> : vector<2xf32>
    %435 = vector.multi_reduction <add>, %434, %cst_123 [1] : vector<2x64xf32> to vector<2xf32>
    %436 = vector.shape_cast %435 : vector<2xf32> to vector<2x1xf32>
    %cst_124 = arith.constant 9.99999996E-13 : f32
    %437 = vector.broadcast %cst_124 : f32 to vector<2x1xf32>
    %438 = arith.addf %436, %437 : vector<2x1xf32>
    %439 = math.rsqrt %438 : vector<2x1xf32>
    %440 = vector.broadcast %439 : vector<2x1xf32> to vector<2x64xf32>
    %441 = arith.mulf %408, %440 : vector<2x64xf32>
    %442 = arith.mulf %425, %425 : vector<2x64xf32>
    %cst_125 = arith.constant dense<0.000000e+00> : vector<2xf32>
    %443 = vector.multi_reduction <add>, %442, %cst_125 [1] : vector<2x64xf32> to vector<2xf32>
    %444 = vector.shape_cast %443 : vector<2xf32> to vector<2x1xf32>
    %cst_126 = arith.constant 9.99999996E-13 : f32
    %445 = vector.broadcast %cst_126 : f32 to vector<2x1xf32>
    %446 = arith.addf %444, %445 : vector<2x1xf32>
    %447 = math.rsqrt %446 : vector<2x1xf32>
    %448 = vector.broadcast %447 : vector<2x1xf32> to vector<2x64xf32>
    %449 = arith.mulf %425, %448 : vector<2x64xf32>
    %450 = vector.extract_strided_slice %221 {offsets = [0, 0], sizes = [1, 1], strides = [1, 1]} : vector<1x64xf32> to vector<1x1xf32>
    %cst_127 = arith.constant dense<0.000000e+00> : vector<2x2xf32>
    %451 = tpu.matmul %433, %441, %cst_127 {dimension_numbers = #tpu.dot_dimension_numbers<[1], [1], [0], [0], [0, 0, 1, 0], [], []>} : vector<2x64xf32>, vector<2x64xf32>, vector<2x2xf32> -> vector<2x2xf32>
    %452 = vector.broadcast %450 : vector<1x1xf32> to vector<2x2xf32>
    %453 = arith.mulf %452, %451 : vector<2x2xf32>
    %454 = vector.extract_strided_slice %221 {offsets = [0, 1], sizes = [1, 1], strides = [1, 1]} : vector<1x64xf32> to vector<1x1xf32>
    %cst_128 = arith.constant dense<0.000000e+00> : vector<2x2xf32>
    %455 = tpu.matmul %441, %449, %cst_128 {dimension_numbers = #tpu.dot_dimension_numbers<[1], [1], [0], [0], [0, 0, 1, 0], [], []>} : vector<2x64xf32>, vector<2x64xf32>, vector<2x2xf32> -> vector<2x2xf32>
    %456 = vector.broadcast %454 : vector<1x1xf32> to vector<2x2xf32>
    %457 = arith.mulf %456, %455 : vector<2x2xf32>
    %458 = vector.extract_strided_slice %221 {offsets = [0, 2], sizes = [1, 1], strides = [1, 1]} : vector<1x64xf32> to vector<1x1xf32>
    %cst_129 = arith.constant dense<0.000000e+00> : vector<2x2xf32>
    %459 = tpu.matmul %449, %433, %cst_129 {dimension_numbers = #tpu.dot_dimension_numbers<[1], [1], [0], [0], [0, 0, 1, 0], [], []>} : vector<2x64xf32>, vector<2x64xf32>, vector<2x2xf32> -> vector<2x2xf32>
    %460 = vector.broadcast %458 : vector<1x1xf32> to vector<2x2xf32>
    %461 = arith.mulf %460, %459 : vector<2x2xf32>
    %462 = tpu.concatenate %453, %457, %461 in 1 : vector<2x2xf32>, vector<2x2xf32>, vector<2x2xf32> -> vector<2x6xf32>
    %c0_130 = arith.constant 0 : index
    %c0_131 = arith.constant 0 : index
    %463 = vector.load %arg9[%c0_130, %c0_131] : memref<2x6xf32, #tpu.memory_space<vmem>>, vector<2x6xf32>
    tpu.vector_store %arg9[%c0_130, %c0_131], %462 {strides = array<i32>} : memref<2x6xf32, #tpu.memory_space<vmem>>, vector<2x6xf32>,
    return
  }
}

</mosaic_0001>

<bundles_post_ra>
// kernel: tile.14
= control target key start
LH: loop header
LB: loop body
LE: loop exit
PB: predicated region body
PF: predicated region fallthrough
CT: control target
= control target key end

     0   :  { %vm42_vm0 = vcmask 187392   ;;  %s152_s0 = inlined_call_operand.vmem [shape: f32[4,2,151], index: 0, kind: input, shape index: {}]   ;;  %s153_s1 = inlined_call_operand.vmem [shape: f32[8,151], index: 1, kind: output, shape index: {}]  }
   0x1   :  { %v80_v0 = vld [vmem:[%s152_s0 + $0xe] sm:$0x3]  ;;  %v81_v1 = vld [vmem:[%s152_s0 + $0xc] sm:$0x3]  ;;  %v82_v2 = vld [vmem:[%s152_s0 + $0xa] sm:$0x3] }
   0x2   :  { %8 = vst [vmem:[#allocation0 + $0x38] sm:$0x3] %v80_v0  ;;  %13 = vst [vmem:[#allocation0 + $0x30] sm:$0x3] %v81_v1  ;;  %v83_v3 = vld [vmem:[%s152_s0 + $0x8] sm:$0x3] }
   0x3   :  { %18 = vst [vmem:[#allocation0 + $0x28] sm:$0x3] %v82_v2  ;;  %v84_v4 = vld [vmem:[%s152_s0 + $0x6] sm:$0x3]  ;;  %v85_v5 = vld [vmem:[%s152_s0 + $0x4] sm:$0x3] }
   0x4   :  { %23 = vst [vmem:[#allocation0 + $0x20] sm:$0x3] %v83_v3  ;;  %28 = vst [vmem:[#allocation0 + $0x18] sm:$0x3] %v84_v4  ;;  %v86_v6 = vld [vmem:[%s152_s0 + $0x2] sm:$0x3] }
   0x5   :  { %33 = vst [vmem:[#allocation0 + $0x10] sm:$0x3] %v85_v5  ;;  %v38_v7 = vld [vmem:[%s152_s0] sm:$0x3]  ;;  %37 = vst [vmem:[#allocation0 + $0x8] sm:$0x3] %v86_v6 }
   0x6   :  { %39 = vst [vmem:[#allocation0] sm:$0x3] %v38_v7 }
   0x9   :  { %v56_v9 = vld [vmem:[#allocation0 + $0x38] sm:$0x3]   ;;  %v71_v10 = vld [vmem:[#allocation0 + $0x30] sm:$0x3]  }
   0xa   :  { %v51_v8 = vld [vmem:[#allocation0 + $0x28] sm:$0x3]   ;;  %90 = vst.msk [vmem:[%s153_s1 + $0xe] sm:$0x3] %vm42_vm0, %v56_v9   ;;  %93 = vst [vmem:[%s153_s1 + $0x6] sm:$0x3] %v71_v10  }
   0xb   :  { %v46_v11 = vld [vmem:[#allocation0 + $0x18] sm:$0x3]   ;;  %89 = vst.msk [vmem:[%s153_s1 + $0xc] sm:$0x3] %vm42_vm0, %v51_v8   ;;  %v67_v13 = vld [vmem:[#allocation0 + $0x20] sm:$0x3]  }
   0xc   :  { %v63_v12 = vld [vmem:[#allocation0 + $0x10] sm:$0x3]   ;;  %v41_v14 = vld [vmem:[#allocation0 + $0x8] sm:$0x3]   ;;  %88 = vst.msk [vmem:[%s153_s1 + $0xa] sm:$0x3] %vm42_vm0, %v46_v11  }
   0xd   :  { %v60_v15 = vld [vmem:[#allocation0] sm:$0x3]   ;;  %91 = vst [vmem:[%s153_s1 + $0x2] sm:$0x3] %v63_v12   ;;  %92 = vst [vmem:[%s153_s1 + $0x4] sm:$0x3] %v67_v13  }
   0xe   :  { %87 = vst.msk [vmem:[%s153_s1 + $0x8] sm:$0x3] %vm42_vm0, %v41_v14   ;;  %61 = vst [vmem:[%s153_s1] sm:$0x3] %v60_v15  }

// kernel: astro_m3_forward.1
= control target key start
LH: loop header
LB: loop body
LE: loop exit
PB: predicated region body
PF: predicated region fallthrough
CT: control target
= control target key end

     0   :  { %vm56_vm0 = vcmask 1043456   ;;  %vm49_vm1 = vcmask 97280   ;;  %vm5114_vm2 = vmmov 1   ;;  %vm41_vm4 = vcmask 1041408   ;;  %s5115_s10 = smov 120   ;;  %s5117_s11 = smov 88   ;;  %s6658_s1 = inlined_call_operand.vmem [shape: f32[30,32], index: 1, kind: input, shape index: {}]   ;;  %s6659_s0 = inlined_call_operand.vmem [shape: f32[16,13], index: 0, kind: input, shape index: {}]   ;;  %s6660_s2 = inlined_call_operand.vmem [shape: f32[1,64,224], index: 2, kind: input, shape index: {}]   ;;  %s6661_s3 = inlined_call_operand.vmem [shape: f32[1,4,96], index: 3, kind: input, shape index: {}]   ;;  %s6662_s5 = inlined_call_operand.vmem [shape: f32[16,17], index: 5, kind: input, shape index: {}]   ;;  %s6663_s4 = inlined_call_operand.vmem [shape: f32[16,151], index: 4, kind: input, shape index: {}]   ;;  %s6664_s8 = inlined_call_operand.vmem [shape: f32[336,64], index: 8, kind: input, shape index: {}]   ;;  %s6665_s6 = inlined_call_operand.vmem [shape: f32[8,148,64], index: 6, kind: input, shape index: {}]   ;;  %s6666_s7 = inlined_call_operand.vmem [shape: f32[2,10], index: 7, kind: input, shape index: {}]   ;;  %s6667_s9 = inlined_call_operand.vmem [shape: f32[2,6], index: 9, kind: output, shape index: {}]  }
   0x1   :  { %v34_v0 = vld [vmem:[%s6658_s1] sm:$0xff]  ;;  %v35_v1 = vld [vmem:[%s6658_s1 + $0x8] sm:$0xff]  ;;  %vm4547_vm3 = vmpackc.low %vm56_vm0, %vm5114_vm2  ;;  %vm196_vm5 = vcmask 261120   ;;  %v134_v23 = vlaneseq  ;;  %vm284_vm6 = vcmask 64512   ;;  %v5118_v50 = vmov -1e+30  }
   0x2   :  { %v4546_v2 = vpack.c.bf16 %v35_v1, %v34_v0  ;;  %v32_v3 = vld [vmem:[%s6659_s0] sm:$0xff]  ;;  %v5225_v5 = vld [vmem:[%s6660_s2 + $0x10] sm:$0xff]  ;;  %v33_v8 = vld [vmem:[%s6659_s0 + $0x8] sm:$0xff]  ;;  %v42_v16 = vrot.slane %v35_v1, 6  ;;  %vm372_vm10 = vcmask 130048   ;;  %s5119_s12 = smov 64  }
   0x3   :  { %4303 = vmatprep.mubr.msk.f32.mxu0 %vm49_vm1, %v32_v3  ;;  %v5220_v4 = vld [vmem:[%s6660_s2] sm:$0xff]  ;;  %v5243_v10 = vld [vmem:[%s6660_s2 + $0x30] sm:$0xff]  ;;  %v37_v13 = vld [vmem:[%s6658_s1 + $0x18] sm:$0x3f]  ;;  %v5263_v24 = vshrl.u32 %v134_v23, 7  ;;  %v162_v45 = vand.u32 127, %v134_v23 }
   0x4   :  { %4548 = vmatprep.subr.msk.bf16.mxu0 %vm4547_vm3, %v4546_v2  ;;  %v4999_v6 = vpack.i.bf16 %v5225_v5, %v5220_v4  ;;  %v4552_v7 = vpack.c.bf16 %v5225_v5, %v5220_v4  ;;  %v5238_v9 = vld [vmem:[%s6660_s2 + $0x20] sm:$0xff]  ;;  %v36_v12 = vld [vmem:[%s6658_s1 + $0x10] sm:$0xff]  ;;  %v45_v15 = vrot.slane %v37_v13, 6  ;;  %vm5291_vm7 = vmpackc.low %vm284_vm6, %vm284_vm6  ;;  %s5120_s13 = smov 80   ;;  %s5121_s14 = smov 56   ;;  %vm1122_vm11 = vcmask 195584  }
   0x5   :  { %4551 = vmatpush3.bf16.msk.msra.mxu0 %vm4547_vm3, %v4546_v2  ;;  %v4556_v11 = vpack.c.bf16 %v5243_v10, %v5238_v9  ;;  %v43_v14 = vrot.slane %v36_v12, 6  ;;  %v194_v25 = vsub.s32 0, %v5263_v24  ;;  %v5269_v26 = vld [vmem:[%s6661_s3] sm:$0xf]  ;;  %s5116_s3 = smov 96   ;;  %v136_v44 = vadd.s32 8, %v5263_v24 }
   0x6   :  { %4553 = vmatprep.subr.bf16.mxu1 %v4552_v7  ;;  %v167_v47 = vand.u32 1, %v162_v45  ;;  %v141_v48 = vand.u32 1, %v5263_v24  ;;  %s5122_s15 = smov 112   ;;  %s5123_s16 = smov 72   ;;  %vm1391_vm12 = vcmask 523264   ;;  %vm2285_vm13 = vcmask 1045504  }
   0x7   :  { %4555 = vmatpush3.bf16.msra.mxu1 %v4552_v7  ;;  %v46_v17 = vsel %vm41_vm4, %v43_v14, %v45_v15  ;;  %v44_v18 = vsel %vm41_vm4, %v42_v16, %v43_v14  ;;  %v195_v27 = vrot.slane %v5269_v26, %v194_v25  ;;  %v148_v46 = vand.u32 1, %v136_v44  ;;  %s5124_s17 = smov 104   ;;  %s5125_s18 = smov 48  }
   0x8   :  { %4304 = vmatmul.mubr.msk.f32.vlgmr.msra.gmra.mrb[0].mxu0 %vm49_vm1, %v33_v8  ;;  %4557 = vmatprep.subr.bf16.mxu1 %v4556_v11  ;;  %vm175_vm9 = vcmp.eq.s32.totalorder %v141_v48, %v167_v47  ;;  %s5126_s19 = smov 32   ;;  %s5127_s20 = smov 40   ;;  %vm2221_vm14 = vcmask 1039360   ;;  %vm5151_vm15 = vmmov 0   ;;  %vm2359_vm1 = vcmask 1031168  }
   0x9   :  { %vm176_vm8 = vcmp.eq.s32.totalorder %v148_v46, %v167_v47  ;;  %v5311_v54 = vsel %vm175_vm9, 0.0, %v5118_v50  ;;  %s5128_s21 = smov 8   ;;  %s5129_s22 = smov 16   ;;  %vm2700_vm3 = vcmask 162816  }
   0xa   :  { %v5309_v51 = vsel %vm176_vm8, 0.0, %v5118_v50  ;;  %s5130_s23 = smov 24   ;;  %s5148_s29 = smov 126  }
   0xb   :  { %4559 = vmatpush3.bf16.msra.mxu1 %v4556_v11 }
  0xdb   :  { %v4305_v19 = vpop.f32.mrb[0].mxu0 }
  0xdc   :  { %v5255_v20 = vadd.f32 %v4305_v19, %v46_v17  ;;  %v125_v21 = vpop.f32.mrb[1].mxu0 }
  0xdd   :  { %v5257_v22 = vadd.f32 %v125_v21, %v44_v18 }
  0xdf   :  { %4314 = vmatprep.mubr.msk.f32.mxu1 %vm196_vm5, %v5257_v22 }
  0xe0   :  { %4315 = vmatmul.mubr.msk.f32.vlgmr.msra.gmra.mrb[0].mxu1 %vm196_vm5, %v5255_v20 }
 0x1b3   :  { %v4316_v28 = vpop.f32.mrb[0].mxu1 }
 0x1b4   :  { %v5274_v29 = vadd.f32 %v4316_v28, %v195_v27  ;;  %v269_v30 = vpop.f32.mrb[1].mxu1 }
 0x1b5   :  { %v5276_v31 = vadd.f32 %v269_v30, %v195_v27 }
 0x1b7   :  { %482 = vrot.lane.b32.xlu1 %v5276_v31, %s5115_s10  ;;  %4321 = vmatprep.mubr.msk.f32.mxu0 %vm284_vm6, %v5276_v31  ;;  %v5283_v32 = vpack.i.bf16 %v5274_v29, %v5276_v31 }
 0x1b9   :  { %4960 = vrot.lane.b32.xlu0 %v5283_v32, %s5116_s3 }
 0x1bb   :  { %484 = vrot.lane.b32.xlu1 %v5274_v29, %s5115_s10 }
 0x1bd   :  { %4965 = vrot.lane.b32.xlu0 %v5283_v32, %s5117_s11 }
 0x229   :  { %v483_v42 = vpop.permute.xlu1 %482 }
 0x22b   :  { %v4961_v33 = vpop.permute.xlu0 %4960 }
 0x22c   :  { %v4963_v34 = vunpack.i.h.bf16 %v4961_v33  ;;  %v4962_v35 = vunpack.i.l.bf16 %v4961_v33 }
 0x22d   :  { %v485_v43 = vpop.permute.xlu1 %484 }
 0x22e   :  { %v4560_v37 = vpack.c.bf16 %v4963_v34, %v4962_v35 }
 0x22f   :  { %v4966_v38 = vpop.permute.xlu0 %4965 }
 0x230   :  { %v4968_v39 = vunpack.i.h.bf16 %v4966_v38  ;;  %v4967_v40 = vunpack.i.l.bf16 %v4966_v38  ;;  %4562 = vmatprep.subr.msk.bf16.mxu0 %vm5291_vm7, %v4560_v37 }
 0x231   :  { %4565 = vmatpush3.bf16.xpose.msk.msra.mxu0 %vm5291_vm7, %v4560_v37 }
 0x232   :  { %v4570_v41 = vpack.c.bf16 %v4968_v39, %v4967_v40 }
 0x234   :  { %4572 = vmatprep.subr.msk.bf16.mxu0 %vm5291_vm7, %v4570_v41 }
 0x238   :  { %4322 = vmatmul.mubr.msk.f32.vlgmr.msra.gmra.mrb[2].mxu0 %vm284_vm6, %v5274_v29 }
 0x239   :  { %4575 = vmatpush3.bf16.xpose.msk.msra.mxu0 %vm5291_vm7, %v4570_v41  ;;  %4335 = vmatprep.mubr.msk.f32.mxu0 %vm284_vm6, %v483_v42 }
 0x240   :  { %4336 = vmatmul.mubr.msk.f32.vlgmr.msra.gmra.mrb[4].mxu0 %vm284_vm6, %v485_v43 }
 0x30b   :  { %v4323_v49 = vpop.f32.mrb[2].mxu0 }
 0x30c   :  { %v369_v52 = vmul.f32 0.35355338, %v4323_v49  ;;  %v359_v53 = vpop.f32.mrb[3].mxu0 }
 0x30d   :  { %v368_v55 = vmul.f32 0.35355338, %v359_v53 }
 0x30e   :  { %v371_v56 = vadd.f32 %v369_v52, %v5309_v51 }
 0x30f   :  { %v370_v57 = vadd.f32 %v368_v55, %v5311_v54 }
 0x310   :  { %v376_v58 = vsel %vm372_vm10, %v371_v56, -inf }
 0x311   :  { %377 = vmax.xlane.f32.xlu1 %v376_v58  ;;  %v373_v59 = vsel %vm372_vm10, %v370_v57, -inf }
 0x312   :  { %374 = vmax.xlane.f32.xlu0 %v373_v59 }
 0x313   :  { %v4337_v60 = vpop.f32.mrb[4].mxu0 }
 0x314   :  { %v564_v61 = vpop.f32.mrb[5].mxu0  ;;  %v574_v62 = vmul.f32 0.35355338, %v4337_v60 }
 0x315   :  { %v573_v63 = vmul.f32 0.35355338, %v564_v61 }
 0x316   :  { %v576_v2 = vadd.f32 %v574_v62, %v5309_v51 }
 0x317   :  { %v575_v0 = vadd.f32 %v573_v63, %v5311_v54 }
 0x318   :  { %v580_v3 = vsel %vm372_vm10, %v576_v2, -inf }
 0x319   :  { %v577_v1 = vsel %vm372_vm10, %v575_v0, -inf }
 0x31a   :  { %578 = vmax.xlane.f32.xlu0 %v577_v1 }
 0x31e   :  { %581 = vmax.xlane.f32.xlu0 %v580_v3 }
 0x322   :  { %4970 = vrot.lane.b32.xlu1 %v5283_v32, %s5119_s12 }
 0x39e   :  { %v378_v7 = vpop.xlane.xlu1 %377 }
 0x39f   :  { %v380_v8 = vsub.f32 %v371_v56, %v378_v7  ;;  %v375_v11 = vpop.xlane.xlu0 %374 }
 0x3a0   :  { %v379_v12 = vsub.f32 %v370_v57, %v375_v11 }
 0x3a1   :  { %v383_v13 = vmul.f32 1.442695, %v380_v8 }
 0x3a2   :  { %v381_v14 = vmul.f32 1.442695, %v379_v12  ;;  %v4971_v15 = vpop.permute.xlu1 %4970 }
 0x3a3   :  { %5061 = vpow2.f32 %v383_v13  ;;  %v4973_v16 = vunpack.i.h.bf16 %v4971_v15  ;;  %v4972_v17 = vunpack.i.l.bf16 %v4971_v15 }
 0x3a4   :  { %5063 = vpow2.f32 %v381_v14 }
 0x3a5   :  { %v4566_v18 = vpack.c.bf16 %v4973_v16, %v4972_v17 }
 0x3a7   :  { %4567 = vmatprep.subr.bf16.mxu1 %v4566_v18  ;;  %v579_v19 = vpop.xlane.xlu0 %578 }
 0x3a8   :  { %4569 = vmatpush3.bf16.msra.mxu1 %v4566_v18  ;;  %v583_v38 = vsub.f32 %v575_v0, %v579_v19 }
 0x3aa   :  { %v585_v39 = vmul.f32 1.442695, %v583_v38 }
 0x3ab   :  { %v582_v21 = vpop.xlane.xlu0 %581 }
 0x3ac   :  { %v584_v23 = vsub.f32 %v576_v2, %v582_v21 }
 0x3ad   :  { %v5062_v27 = vpop.eup %5061 }
 0x3ae   :  { %v5064_v28 = vpop.eup %5063  ;;  %v587_v30 = vmul.f32 1.442695, %v584_v23  ;;  %v388_v33 = vsel %vm372_vm10, %v5062_v27, 0.0 }
 0x3af   :  { %389 = vadd.xlane.f32.xlu0 %v388_v33  ;;  %v385_v34 = vsel %vm372_vm10, %v5064_v28, 0.0 }
 0x3b0   :  { %5065 = vpow2.f32 %v587_v30  ;;  %386 = vadd.xlane.f32.xlu1 %v385_v34 }
 0x3b1   :  { %5067 = vpow2.f32 %v585_v39 }
 0x3ba   :  { %v5066_v35 = vpop.eup %5065 }
 0x3bb   :  { %v592_v37 = vsel %vm372_vm10, %v5066_v35, 0.0  ;;  %v5068_v40 = vpop.eup %5067 }
 0x3bc   :  { %593 = vadd.xlane.f32.xlu0 %v592_v37  ;;  %v589_v41 = vsel %vm372_vm10, %v5068_v40, 0.0 }
 0x3c1   :  { %4980 = vrot.lane.b32.xlu1 %v5283_v32, %s5120_s13 }
 0x3d2   :  { %4975 = vrot.lane.b32.xlu0 %v5283_v32, %s5121_s14 }
 0x3d6   :  { %688 = vrot.lane.b32.xlu0 %v5274_v29, %s5122_s15 }
 0x3e5   :  { %590 = vadd.xlane.f32.xlu1 %v589_v41 }
 0x3f6   :  { %686 = vrot.lane.b32.xlu1 %v5276_v31, %s5122_s15 }
 0x43c   :  { %v390_v42 = vpop.xlane.xlu0 %389 }
 0x43d   :  { %5069 = vrcp.f32 %v390_v42  ;;  %v387_v43 = vpop.xlane.xlu1 %386 }
 0x43e   :  { %5071 = vrcp.f32 %v387_v43 }
 0x441   :  { %v4981_v49 = vpop.permute.xlu1 %4980 }
 0x442   :  { %v4983_v52 = vunpack.i.h.bf16 %v4981_v49  ;;  %v4982_v53 = vunpack.i.l.bf16 %v4981_v49 }
 0x444   :  { %v4580_v58 = vpack.c.bf16 %v4983_v52, %v4982_v53 }
 0x447   :  { %v5070_v44 = vpop.eup %5069 }
 0x448   :  { %v5072_v45 = vpop.eup %5071  ;;  %v394_v48 = vmul.f32 %v5070_v44, %v5062_v27 }
 0x449   :  { %v594_v46 = vpop.xlane.xlu0 %593  ;;  %v393_v47 = vmul.f32 %v5072_v45, %v5064_v28 }
 0x44a   :  { %5073 = vrcp.f32 %v594_v46 }
 0x44b   :  { %4328 = vmatprep.mubr.msk.f32.mxu1 %vm372_vm10, %v393_v47 }
 0x44c   :  { %4329 = vmatmul.mubr.msk.f32.vlgmr.msra.gmra.mrb[2].mxu1 %vm372_vm10, %v394_v48 }
 0x44d   :  { %v4976_v50 = vpop.permute.xlu0 %4975 }
 0x44e   :  { %v4978_v55 = vunpack.i.h.bf16 %v4976_v50  ;;  %v4977_v56 = vunpack.i.l.bf16 %v4976_v50 }
 0x450   :  { %v4576_v57 = vpack.c.bf16 %v4978_v55, %v4977_v56 }
 0x451   :  { %v689_v1 = vpop.permute.xlu0 %688 }
 0x452   :  { %4577 = vmatprep.subr.bf16.mxu1 %v4576_v57 }
 0x453   :  { %4579 = vmatpush3.bf16.msra.mxu1 %v4576_v57 }
 0x454   :  { %4582 = vmatprep.subr.msk.bf16.mxu1 %vm5291_vm7, %v4580_v58  ;;  %v5074_v60 = vpop.eup %5073 }
 0x455   :  { %v598_v63 = vmul.f32 %v5074_v60, %v5066_v35 }
 0x472   :  { %v591_v59 = vpop.xlane.xlu1 %590 }
 0x473   :  { %5075 = vrcp.f32 %v591_v59 }
 0x476   :  { %v687_v0 = vpop.permute.xlu1 %686 }
 0x47d   :  { %v5076_v61 = vpop.eup %5075 }
 0x47e   :  { %v597_v62 = vmul.f32 %v5076_v61, %v5068_v40 }
 0x480   :  { %4342 = vmatprep.mubr.msk.f32.mxu1 %vm372_vm10, %v597_v62 }
 0x481   :  { %4343 = vmatmul.mubr.msk.f32.vlgmr.msra.gmra.mrb[4].mxu1 %vm372_vm10, %v598_v63 }
 0x482   :  { %4585 = vmatpush3.bf16.xpose.msk.msra.mxu1 %vm5291_vm7, %v4580_v58  ;;  %4349 = vmatprep.mubr.msk.f32.mxu1 %vm284_vm6, %v687_v0 }
 0x489   :  { %4350 = vmatmul.mubr.msk.f32.vlgmr.msra.gmra.mrb[6].mxu1 %vm284_vm6, %v689_v1 }
 0x51f   :  { %v5341_v2 = vpop.f32.mrb[2].mxu1 }
 0x520   :  { %v5343_v3 = vpop.f32.mrb[3].mxu1 }
 0x554   :  { %v5345_v7 = vpop.f32.mrb[4].mxu1 }
 0x555   :  { %v5347_v8 = vpop.f32.mrb[5].mxu1 }
 0x55c   :  { %v4351_v11 = vpop.f32.mrb[6].mxu1 }
 0x55d   :  { %v778_v12 = vmul.f32 0.35355338, %v4351_v11  ;;  %v768_v13 = vpop.f32.mrb[7].mxu1 }
 0x55e   :  { %v777_v14 = vmul.f32 0.35355338, %v768_v13 }
 0x55f   :  { %v780_v15 = vadd.f32 %v778_v12, %v5309_v51 }
 0x560   :  { %v779_v16 = vadd.f32 %v777_v14, %v5311_v54 }
 0x561   :  { %v784_v17 = vsel %vm372_vm10, %v780_v15, -inf }
 0x562   :  { %785 = vmax.xlane.f32.xlu0 %v784_v17  ;;  %v781_v18 = vsel %vm372_vm10, %v779_v16, -inf }
 0x563   :  { %782 = vmax.xlane.f32.xlu1 %v781_v18 }
 0x5ef   :  { %v786_v19 = vpop.xlane.xlu0 %785 }
 0x5f0   :  { %v788_v21 = vsub.f32 %v780_v15, %v786_v19  ;;  %v783_v23 = vpop.xlane.xlu1 %782 }
 0x5f1   :  { %v787_v27 = vsub.f32 %v779_v16, %v783_v23  ;;  %v5004_v16 = vpack.i.bf16 %v5243_v10, %v5238_v9 }
 0x5f2   :  { %v791_v28 = vmul.f32 1.442695, %v788_v21 }
 0x5f3   :  { %v789_v30 = vmul.f32 1.442695, %v787_v27 }
 0x5f4   :  { %5077 = vpow2.f32 %v791_v28 }
 0x5f5   :  { %5079 = vpow2.f32 %v789_v30 }
 0x5fe   :  { %v5078_v33 = vpop.eup %5077 }
 0x5ff   :  { %v5080_v34 = vpop.eup %5079  ;;  %v796_v35 = vsel %vm372_vm10, %v5078_v33, 0.0 }
 0x600   :  { %797 = vadd.xlane.f32.xlu1 %v796_v35  ;;  %v793_v37 = vsel %vm372_vm10, %v5080_v34, 0.0 }
 0x601   :  { %794 = vadd.xlane.f32.xlu0 %v793_v37 }
 0x611   :  { %4990 = vrot.lane.b32.xlu1 %v5283_v32, %s5123_s16 }
 0x615   :  { %890 = vrot.lane.b32.xlu1 %v5276_v31, %s5124_s17 }
 0x617   :  { %4985 = vrot.lane.b32.xlu0 %v5283_v32, %s5125_s18 }
 0x61b   :  { %892 = vrot.lane.b32.xlu0 %v5274_v29, %s5124_s17 }
 0x68d   :  { %v798_v38 = vpop.xlane.xlu1 %797 }
 0x68e   :  { %5081 = vrcp.f32 %v798_v38  ;;  %v795_v39 = vpop.xlane.xlu0 %794 }
 0x68f   :  { %5083 = vrcp.f32 %v795_v39 }
 0x691   :  { %v4991_v40 = vpop.permute.xlu1 %4990 }
 0x692   :  { %v4986_v41 = vpop.permute.xlu0 %4985  ;;  %v4993_v42 = vunpack.i.h.bf16 %v4991_v40  ;;  %v4992_v43 = vunpack.i.l.bf16 %v4991_v40 }
 0x693   :  { %v4988_v44 = vunpack.i.h.bf16 %v4986_v41  ;;  %v4987_v45 = vunpack.i.l.bf16 %v4986_v41 }
 0x694   :  { %v4590_v47 = vpack.c.bf16 %v4993_v42, %v4992_v43 }
 0x695   :  { %v4586_v46 = vpack.c.bf16 %v4988_v44, %v4987_v45  ;;  %v891_v50 = vpop.permute.xlu1 %890 }
 0x696   :  { %v893_v52 = vpop.permute.xlu0 %892 }
 0x697   :  { %4587 = vmatprep.subr.bf16.mxu0 %v4586_v46 }
 0x698   :  { %v5082_v48 = vpop.eup %5081  ;;  %4589 = vmatpush3.bf16.msra.mxu0 %v4586_v46 }
 0x699   :  { %v5084_v31 = vpop.eup %5083  ;;  %4592 = vmatprep.subr.msk.bf16.mxu0 %vm5291_vm7, %v4590_v47  ;;  %v802_v49 = vmul.f32 %v5082_v48, %v5078_v33 }
 0x69a   :  { %v801_v29 = vmul.f32 %v5084_v31, %v5080_v34 }
 0x69c   :  { %4356 = vmatprep.mubr.msk.f32.mxu0 %vm372_vm10, %v801_v29  ;;  %v1226_v29 = vsub.s32 1, %v5263_v24 }
 0x69d   :  { %4357 = vmatmul.mubr.msk.f32.vlgmr.msra.gmra.mrb[6].mxu0 %vm372_vm10, %v802_v49 }
 0x69e   :  { %4363 = vmatprep.mubr.msk.f32.mxu0 %vm284_vm6, %v891_v50 }
 0x6a1   :  { %4595 = vmatpush3.bf16.xpose.msk.msra.mxu0 %vm5291_vm7, %v4590_v47  ;;  %vm3968_vm7 = vcmask 41984  }
 0x6a8   :  { %4364 = vmatmul.mubr.msk.f32.vlgmr.msra.gmra.mrb[8].mxu0 %vm284_vm6, %v893_v52 }
 0x770   :  { %v4358_v53 = vpop.f32.mrb[6].mxu0 }
 0x771   :  { %v881_v55 = vpop.f32.mrb[7].mxu0 }
 0x77b   :  { %v4365_v56 = vpop.f32.mrb[8].mxu0 }
 0x77c   :  { %v982_v57 = vmul.f32 0.35355338, %v4365_v56  ;;  %v972_v58 = vpop.f32.mrb[9].mxu0 }
 0x77d   :  { %v981_v59 = vmul.f32 0.35355338, %v972_v58 }
 0x77e   :  { %v984_v60 = vadd.f32 %v982_v57, %v5309_v51 }
 0x77f   :  { %v983_v61 = vadd.f32 %v981_v59, %v5311_v54 }
 0x780   :  { %v988_v62 = vsel %vm372_vm10, %v984_v60, -inf }
 0x781   :  { %989 = vmax.xlane.f32.xlu0 %v988_v62  ;;  %v985_v63 = vsel %vm372_vm10, %v983_v61, -inf }
 0x782   :  { %986 = vmax.xlane.f32.xlu1 %v985_v63 }
 0x80e   :  { %v990_v36 = vpop.xlane.xlu0 %989 }
 0x80f   :  { %v992_v0 = vsub.f32 %v984_v60, %v990_v36  ;;  %v987_v1 = vpop.xlane.xlu1 %986 }
 0x810   :  { %v991_v11 = vsub.f32 %v983_v61, %v987_v1  ;;  %v180_v1 = vld [vmem:[%s6660_s2 + $0x8] sm:$0xff] }
 0x811   :  { %v995_v12 = vmul.f32 1.442695, %v992_v0 }
 0x812   :  { %v993_v13 = vmul.f32 1.442695, %v991_v11  ;;  %v182_v11 = vld [vmem:[%s6660_s2 + $0x18] sm:$0xff] }
 0x813   :  { %5085 = vpow2.f32 %v995_v12  ;;  %v4608_v12 = vpack.c.bf16 %v182_v11, %v180_v1 }
 0x814   :  { %5087 = vpow2.f32 %v993_v13  ;;  %v184_v13 = vld [vmem:[%s6660_s2 + $0x28] sm:$0xff] }
 0x815   :  { %4609 = vmatprep.subr.bf16.mxu0 %v4608_v12 }
 0x816   :  { %4611 = vmatpush3.bf16.msra.mxu0 %v4608_v12 }
 0x81d   :  { %v5086_v14 = vpop.eup %5085 }
 0x81e   :  { %v5088_v15 = vpop.eup %5087  ;;  %v1000_v51 = vsel %vm372_vm10, %v5086_v14, 0.0 }
 0x81f   :  { %1001 = vadd.xlane.f32.xlu1 %v1000_v51  ;;  %v997_v54 = vsel %vm372_vm10, %v5088_v15, 0.0  ;;  %v5009_v51 = vpack.i.bf16 %v182_v11, %v180_v1 }
 0x820   :  { %998 = vadd.xlane.f32.xlu0 %v997_v54  ;;  %v187_v54 = vld [vmem:[%s6660_s2 + $0x48] sm:$0xff] }
 0x830   :  { %5000 = vrot.lane.b32.xlu1 %v4999_v6, %s5126_s19 }
 0x834   :  { %5005 = vrot.lane.b32.xlu1 %v5004_v16, %s5126_s19  ;;  %v188_v16 = vld [vmem:[%s6660_s2 + $0x58] sm:$0xff] }
 0x836   :  { %4995 = vrot.lane.b32.xlu0 %v5283_v32, %s5127_s20 }
 0x838   :  { %1098 = vrot.lane.b32.xlu1 %v5345_v7, %s5128_s21 }
 0x83a   :  { %1096 = vrot.lane.b32.xlu0 %v5347_v8, %s5128_s21 }
 0x83c   :  { %1106 = vrot.lane.b32.xlu1 %v4358_v53, %s5129_s22 }
 0x83e   :  { %1104 = vrot.lane.b32.xlu0 %v881_v55, %s5129_s22  ;;  %s5135_s22 = smov 127  }
 0x8ac   :  { %v1002_v17 = vpop.xlane.xlu1 %1001 }
 0x8ad   :  { %5089 = vrcp.f32 %v1002_v17  ;;  %v999_v18 = vpop.xlane.xlu0 %998  ;;  %v5019_v17 = vpack.i.bf16 %v188_v16, %v187_v54 }
 0x8ae   :  { %5091 = vrcp.f32 %v999_v18 }
 0x8b0   :  { %v5001_v7 = vpop.permute.xlu1 %5000 }
 0x8b1   :  { %v4996_v4 = vpop.permute.xlu0 %4995  ;;  %v5003_v23 = vunpack.i.h.bf16 %v5001_v7  ;;  %v5002_v27 = vunpack.i.l.bf16 %v5001_v7 }
 0x8b2   :  { %v4998_v5 = vunpack.i.h.bf16 %v4996_v4  ;;  %v4997_v6 = vunpack.i.l.bf16 %v4996_v4  ;;  %v189_v4 = vld [vmem:[%s6660_s2 + $0x68] sm:$0xff] }
 0x8b3   :  { %v4600_v33 = vpack.c.bf16 %v5003_v23, %v5002_v27 }
 0x8b4   :  { %v4596_v9 = vpack.c.bf16 %v4998_v5, %v4997_v6  ;;  %v5006_v8 = vpop.permute.xlu1 %5005  ;;  %v190_v5 = vld [vmem:[%s6660_s2 + $0x78] sm:$0xff] }
 0x8b5   :  { %v5008_v28 = vunpack.i.h.bf16 %v5006_v8  ;;  %v5007_v30 = vunpack.i.l.bf16 %v5006_v8  ;;  %v1097_v39 = vpop.permute.xlu0 %1096  ;;  %v5024_v6 = vpack.i.bf16 %v190_v5, %v189_v4  ;;  %v5136_v5 = vmov 2  }
 0x8b6   :  { %4597 = vmatprep.subr.bf16.mxu1 %v4596_v9  ;;  %v1118_v42 = vsel %vm284_vm6, %v5343_v3, %v1097_v39  ;;  %v1227_v3 = vrot.slane %v5269_v26, %v1226_v29 }
 0x8b7   :  { %v5090_v10 = vpop.eup %5089  ;;  %4599 = vmatpush3.bf16.msra.mxu1 %v4596_v9  ;;  %v4604_v34 = vpack.c.bf16 %v5008_v28, %v5007_v30 }
 0x8b8   :  { %v5092_v32 = vpop.eup %5091  ;;  %v1006_v21 = vmul.f32 %v5090_v10, %v5086_v14  ;;  %4601 = vmatprep.subr.bf16.mxu1 %v4600_v33  ;;  %v1099_v38 = vpop.permute.xlu1 %1098  ;;  %v186_v14 = vld [vmem:[%s6660_s2 + $0x38] sm:$0xff] }
 0x8b9   :  { %v1005_v19 = vmul.f32 %v5092_v32, %v5088_v15  ;;  %v1105_v41 = vpop.permute.xlu0 %1104  ;;  %v1119_v44 = vsel %vm284_vm6, %v5341_v2, %v1099_v38  ;;  %v4612_v15 = vpack.c.bf16 %v186_v14, %v184_v13  ;;  %v5014_v18 = vpack.i.bf16 %v186_v14, %v184_v13  ;;  %vm4898_vm6 = vmpackc.low %vm41_vm4, %vm5114_vm2 }
 0x8ba   :  { %v1120_v45 = vsel %vm372_vm10, %v1118_v42, %v1105_v41  ;;  %vm3464_vm2 = vcmask 80896  }
 0x8bb   :  { %4370 = vmatprep.mubr.msk.f32.mxu1 %vm372_vm10, %v1005_v19  ;;  %4613 = vmatprep.subr.bf16.mxu0 %v4612_v15 }
 0x8bc   :  { %4371 = vmatmul.mubr.msk.f32.vlgmr.msra.gmra.mrb[8].mxu1 %vm372_vm10, %v1006_v21  ;;  %v1107_v40 = vpop.permute.xlu1 %1106  ;;  %4615 = vmatpush3.bf16.msra.mxu0 %v4612_v15 }
 0x8bd   :  { %4603 = vmatpush3.bf16.msra.mxu1 %v4600_v33  ;;  %v1121_v47 = vsel %vm372_vm10, %v1119_v44, %v1107_v40 }
 0x8be   :  { %4605 = vmatprep.subr.bf16.mxu1 %v4604_v34 }
 0x8c1   :  { %4607 = vmatpush3.bf16.msra.mxu1 %v4604_v34 }
 0x98f   :  { %v4372_v35 = vpop.f32.mrb[8].mxu1 }
 0x990   :  { %1114 = vrot.lane.b32.xlu1 %v4372_v35, %s5130_s23  ;;  %v1085_v37 = vpop.f32.mrb[9].mxu1 }
 0x991   :  { %1112 = vrot.lane.b32.xlu0 %v1085_v37, %s5130_s23 }
 0xa02   :  { %v1115_v43 = vpop.permute.xlu1 %1114 }
 0xa03   :  { %v1113_v46 = vpop.permute.xlu0 %1112  ;;  %v1124_v31 = vsel %vm1122_vm11, %v1121_v47, %v1115_v43 }
 0xa04   :  { %v1123_v48 = vsel %vm1122_vm11, %v1120_v45, %v1113_v46 }
 0xa05   :  { %4381 = vmatprep.mubr.msk.f32.mxu1 %vm196_vm5, %v1123_v48 }
 0xa06   :  { %4382 = vmatmul.mubr.msk.f32.vlgmr.msra.gmra.mrb[10].mxu1 %vm196_vm5, %v1124_v31 }
 0xad9   :  { %v4383_v49 = vpop.f32.mrb[10].mxu1 }
 0xada   :  { %v1223_v2 = vadd.f32 %v4383_v49, %v5255_v20  ;;  %v1213_v50 = vpop.f32.mrb[11].mxu1 }
 0xadb   :  { %v1222_v52 = vadd.f32 %v1213_v50, %v5257_v22 }
 0xadc   :  { %v1229_v53 = vadd.f32 %v1227_v3, %v1223_v2 }
 0xadd   :  { %v1228_v55 = vadd.f32 %v1227_v3, %v1222_v52 }
 0xade   :  { %v1233_v56 = vsel %vm196_vm5, %v1229_v53, 0.0 }
 0xadf   :  { %1234 = vadd.xlane.f32.xlu1 %v1233_v56  ;;  %v1230_v57 = vsel %vm196_vm5, %v1228_v55, 0.0 }
 0xae0   :  { %1231 = vadd.xlane.f32.xlu0 %v1230_v57  ;;  %v5441_v57 = vld [vmem:[%s6662_s5] sm:$0xff] }
 0xaf0   :  { %1258 = vrot.lane.b32.xlu1 %v1227_v3, %s5116_s3 }
 0xaf4   :  { %5010 = vrot.lane.b32.xlu1 %v5009_v51, %s5119_s12 }
 0xaf8   :  { %5015 = vrot.lane.b32.xlu1 %v5014_v18, %s5119_s12  ;;  %v5134_v18 = vmov 16  }
 0xafc   :  { %5025 = vrot.lane.b32.xlu1 %v5024_v6, %s5119_s12  ;;  %v5137_v6 = vmov 1  }
 0xb6c   :  { %v1235_v58 = vpop.xlane.xlu1 %1234 }
 0xb6d   :  { %v1238_v59 = vmul.f32 0.03125, %v1235_v58  ;;  %v1232_v60 = vpop.xlane.xlu0 %1231  ;;  %v1270_v58 = vsub.s32 2, %v5263_v24 }
 0xb6e   :  { %v1237_v61 = vmul.f32 0.03125, %v1232_v60 }
 0xb6f   :  { %v1240_v62 = vsub.f32 %v1229_v53, %v1238_v59  ;;  %v1357_v53 = vsub.s32 3, %v5263_v24  ;;  %v1271_v59 = vrot.slane %v5269_v26, %v1270_v58 }
 0xb70   :  { %v1239_v63 = vsub.f32 %v1228_v55, %v1237_v61  ;;  %v1259_v8 = vpop.permute.xlu1 %1258  ;;  %v5131_v55 = vmov 14  }
 0xb71   :  { %v1242_v22 = vmul.f32 %v1240_v62, %v1240_v62  ;;  %5029 = vset.pattern.permute.xlu0 %v5131_v55  ;;  %v1358_v56 = vrot.slane %v5269_v26, %v1357_v53 }
 0xb72   :  { %v1241_v20 = vmul.f32 %v1239_v63, %v1239_v63 }
 0xb73   :  { %v1246_v0 = vsel %vm196_vm5, %v1242_v22, 0.0  ;;  %v5132_v22 = vmov 13  }
 0xb74   :  { %v1243_v36 = vsel %vm196_vm5, %v1241_v20, 0.0  ;;  %v5011_v27 = vpop.permute.xlu1 %5010  ;;  %5031 = vset.pattern.permute.xlu1 %v5132_v22 }
 0xb75   :  { %1244 = vadd.xlane.f32.xlu0 %v1243_v36  ;;  %v5013_v30 = vunpack.i.h.bf16 %v5011_v27  ;;  %v5012_v33 = vunpack.i.l.bf16 %v5011_v27 }
 0xb77   :  { %v4616_v37 = vpack.c.bf16 %v5013_v30, %v5012_v33  ;;  %v5479_v30 = vld [vmem:[%s6663_s4] sm:$0xff] }
 0xb78   :  { %v5016_v41 = vpop.permute.xlu1 %5015 }
 0xb79   :  { %1247 = vadd.xlane.f32.xlu0 %v1246_v0  ;;  %v5018_v43 = vunpack.i.h.bf16 %v5016_v41  ;;  %v5017_v44 = vunpack.i.l.bf16 %v5016_v41  ;;  %4617 = vmatprep.subr.bf16.mxu1 %v4616_v37  ;;  %v5133_v0 = vmov 15   ;;  %v5138_v41 = vmov 8  }
 0xb7a   :  { %4619 = vmatpush3.bf16.msra.mxu1 %v4616_v37  ;;  %v5487_v37 = vld [vmem:[%s6663_s4 + $0x10] sm:$0xff] }
 0xb7b   :  { %v4620_v48 = vpack.c.bf16 %v5018_v43, %v5017_v44  ;;  %v5139_v43 = vmov 10   ;;  %v5140_v44 = vmov 4  }
 0xb7c   :  { %v5026_v49 = vpop.permute.xlu1 %5025 }
 0xb7d   :  { %4621 = vmatprep.subr.bf16.mxu1 %v4620_v48  ;;  %v5028_v2 = vunpack.i.h.bf16 %v5026_v49  ;;  %v5027_v50 = vunpack.i.l.bf16 %v5026_v49 }
 0xb7e   :  { %4623 = vmatpush3.bf16.msra.mxu1 %v4620_v48 }
 0xb7f   :  { %v4628_v52 = vpack.c.bf16 %v5028_v2, %v5027_v50 }
 0xb8f   :  { %1263 = vrot.lane.b32.xlu0 %v1227_v3, %s5119_s12 }
 0xb93   :  { %5020 = vrot.lane.b32.xlu0 %v5019_v17, %s5119_s12  ;;  %v2189_v17 = vld [vmem:[%s6663_s4 + $0x8] sm:$0xff] }
 0xb97   :  { %1507 = vrot.lane.b32.xlu0 %v1358_v56, %s5119_s12 }
 0xb9b   :  { %2202 = vperm.xlu0 %5029, %v5441_v57  }
 0xb9f   :  { %5030 = vset.pattern.permute.xlu0 %v5133_v0 }
 0xc02   :  { %v1245_v9 = vpop.xlane.xlu0 %1244 }
 0xc03   :  { %v1249_v10 = vmul.f32 0.03125, %v1245_v9 }
 0xc05   :  { %v1251_v32 = vadd.f32 1e-05, %v1249_v10 }
 0xc06   :  { %v1248_v19 = vpop.xlane.xlu0 %1247 }
 0xc07   :  { %5093 = vrsqrt.f32 %v1251_v32  ;;  %v1250_v21 = vmul.f32 0.03125, %v1248_v19 }
 0xc09   :  { %v1252_v7 = vadd.f32 1e-05, %v1250_v21 }
 0xc0a   :  { %v1264_v23 = vpop.permute.xlu0 %1263 }
 0xc0b   :  { %5095 = vrsqrt.f32 %v1252_v7 }
 0xc0e   :  { %v5021_v34 = vpop.permute.xlu0 %5020 }
 0xc0f   :  { %v5023_v38 = vunpack.i.h.bf16 %v5021_v34  ;;  %v5022_v39 = vunpack.i.l.bf16 %v5021_v34 }
 0xc11   :  { %v5094_v28 = vpop.eup %5093  ;;  %v4624_v47 = vpack.c.bf16 %v5023_v38, %v5022_v39  ;;  %v2191_v39 = vld [vmem:[%s6663_s4 + $0x18] sm:$0xff]  ;;  %s5154_s4 = smov 2  }
 0xc12   :  { %v1255_v35 = vmul.f32 %v5094_v28, %v1239_v63  ;;  %v5453_v54 = vpop.permute.xlu0 %1507 }
 0xc13   :  { %4625 = vmatprep.subr.bf16.mxu1 %v4624_v47 }
 0xc14   :  { %v1261_v40 = vmul.f32 %v1259_v8, %v1255_v35  ;;  %4627 = vmatpush3.bf16.msra.mxu1 %v4624_v47  ;;  %v5143_v47 = vmov 7  }
 0xc15   :  { %v5096_v42 = vpop.eup %5095  ;;  %4629 = vmatprep.subr.bf16.mxu1 %v4628_v52 }
 0xc16   :  { %v1256_v45 = vmul.f32 %v5096_v42, %v1240_v62  ;;  %v1266_v46 = vadd.f32 %v1264_v23, %v1261_v40 }
 0xc18   :  { %v1262_v31 = vmul.f32 %v1259_v8, %v1256_v45  ;;  %4392 = vmatprep.mubr.msk.f32.mxu0 %vm196_vm5, %v1266_v46  ;;  %4631 = vmatpush3.bf16.msra.mxu1 %v4628_v52  ;;  %v5141_v45 = vmov 5  }
 0xc1a   :  { %v1267_v3 = vadd.f32 %v1264_v23, %v1262_v31  ;;  %v5457_v16 = vpop.permute.xlu0 %2202 }
 0xc1b   :  { %v2236_v4 = vmul.f32 %v5457_v16, %v2189_v17  ;;  %v2235_v42 = vmul.f32 %v5457_v16, %v5479_v30 }
 0xc1c   :  { %4393 = vmatmul.mubr.msk.f32.vlgmr.msra.gmra.mrb[10].mxu0 %vm196_vm5, %v1267_v3 }
 0xcef   :  { %v4394_v60 = vpop.f32.mrb[10].mxu0 }
 0xcf0   :  { %v1350_v61 = vadd.f32 %v4394_v60, %v1271_v59  ;;  %v1344_v62 = vpop.f32.mrb[11].mxu0 }
 0xcf1   :  { %v1345_v63 = vadd.f32 %v1344_v62, %v1271_v59 }
 0xcf2   :  { %v1354_v36 = vmax.f32 %v1350_v61, 0.0 }
 0xcf3   :  { %v1353_v20 = vmax.f32 %v1345_v63, 0.0 }
 0xcf5   :  { %4411 = vmatprep.mubr.msk.f32.mxu1 %vm1391_vm12, %v1353_v20 }
 0xcf6   :  { %4412 = vmatmul.mubr.msk.f32.vlgmr.msra.gmra.mrb[12].mxu1 %vm1391_vm12, %v1354_v36 }
 0xdc9   :  { %v4413_v1 = vpop.f32.mrb[12].mxu1 }
 0xdca   :  { %v1470_v11 = vadd.f32 %v4413_v1, %v1358_v56  ;;  %v1464_v12 = vpop.f32.mrb[13].mxu1 }
 0xdcb   :  { %v1465_v13 = vadd.f32 %v1464_v12, %v1358_v56 }
 0xdcc   :  { %v1474_v26 = vadd.f32 %v1470_v11, %v1267_v3 }
 0xdcd   :  { %v1473_v14 = vadd.f32 %v1465_v13, %v1266_v46  ;;  %v5142_v46 = vmov 11  }
 0xdce   :  { %v1478_v15 = vsel %vm196_vm5, %v1474_v26, 0.0 }
 0xdcf   :  { %1479 = vadd.xlane.f32.xlu1 %v1478_v15  ;;  %v1475_v51 = vsel %vm196_vm5, %v1473_v14, 0.0 }
 0xdd0   :  { %1476 = vadd.xlane.f32.xlu0 %v1475_v51 }
 0xde0   :  { %1502 = vrot.lane.b32.xlu1 %v1358_v56, %s5116_s3  ;;  %v2206_v56 = vmul.f32 %v5457_v16, %v2191_v39 }
 0xde4   :  { %2196 = vperm.xlu1 %5031, %v5441_v57  }
 0xde6   :  { %2210 = vperm.xlu0 %5030, %v5441_v57  }
 0xde8   :  { %5032 = vset.pattern.permute.xlu1 %v5134_v18 }
 0xde9   :  { %2228 = vperm.xlu1 %5032, %v5441_v57  }
 0xdea   :  { %5033 = vset.pattern.permute.xlu0 %v5137_v6 }
 0xded   :  { %2241 = vrot.lane.b32.xlu1 %v2236_v4, %s5135_s22 }
 0xdee   :  { %5034 = vset.pattern.permute.xlu1 %v5136_v5 }
 0xe5c   :  { %v1480_v9 = vpop.xlane.xlu1 %1479 }
 0xe5d   :  { %v1482_v10 = vmul.f32 0.03125, %v1480_v9  ;;  %v1477_v32 = vpop.xlane.xlu0 %1476 }
 0xe5e   :  { %v1481_v19 = vmul.f32 0.03125, %v1477_v32 }
 0xe5f   :  { %v5467_v21 = vsub.f32 %v1474_v26, %v1482_v10 }
 0xe60   :  { %v5469_v7 = vsub.f32 %v1473_v14, %v1481_v19  ;;  %v5511_v48 = vpop.permute.xlu1 %1502 }
 0xe61   :  { %v1486_v8 = vmul.f32 %v5467_v21, %v5467_v21 }
 0xe62   :  { %v1485_v27 = vmul.f32 %v5469_v7, %v5469_v7 }
 0xe63   :  { %v1490_v23 = vsel %vm196_vm5, %v1486_v8, 0.0 }
 0xe64   :  { %1491 = vadd.xlane.f32.xlu0 %v1490_v23  ;;  %v1487_v34 = vsel %vm196_vm5, %v1485_v27, 0.0  ;;  %v2197_v31 = vpop.permute.xlu1 %2196 }
 0xe65   :  { %v2211_v28 = vpop.permute.xlu0 %2210  ;;  %v2200_v52 = vmul.f32 %v2197_v31, %v2189_v17  ;;  %v2234_v55 = vmul.f32 %v2197_v31, %v2191_v39  ;;  %v2199_v23 = vmul.f32 %v2197_v31, %v5479_v30 }
 0xe66   :  { %v2213_v33 = vmul.f32 %v2211_v28, %v5479_v30  ;;  %v2214_v35 = vmul.f32 %v2211_v28, %v2189_v17  ;;  %v2248_v38 = vmul.f32 %v2211_v28, %v5487_v37  ;;  %v2249_v40 = vmul.f32 %v2211_v28, %v2191_v39 }
 0xe67   :  { %v2208_v60 = vadd.f32 %v2206_v56, %v2200_v52 }
 0xe68   :  { %1488 = vadd.xlane.f32.xlu0 %v1487_v34  ;;  %2217 = vrot.lane.b32.xlu1 %v2213_v33, %s5135_s22  ;;  %v2229_v3 = vpop.permute.xlu1 %2228  ;;  %v2205_v33 = vmul.f32 %v5457_v16, %v5487_v37  ;;  %v2233_v34 = vmul.f32 %v2197_v31, %v5487_v37 }
 0xe6a   :  { %v2207_v39 = vadd.f32 %v2205_v33, %v2199_v23  ;;  %v5111_v23 = vld [vmem:[%s6659_s0 + $0x8] sm:$0xff] }
 0xe6c   :  { %2219 = vrot.lane.b32.xlu1 %v2214_v35, %s5135_s22  ;;  %v2242_v49 = vpop.permute.xlu1 %2241 }
 0xe6d   :  { %v2247_v61 = vadd.f32 %v2242_v49, %v2234_v55 }
 0xe70   :  { %2252 = vrot.lane.b32.xlu1 %v2248_v38, %s5135_s22 }
 0xe74   :  { %2254 = vrot.lane.b32.xlu1 %v2249_v40, %s5135_s22 }
 0xe78   :  { %2336 = vperm.xlu1 %5034, %v5441_v57  }
 0xe7c   :  { %5038 = vset.pattern.permute.xlu1 %v5138_v41 }
 0xe7d   :  { %2517 = vperm.xlu1 %5038, %v5441_v57  }
 0xe7e   :  { %2239 = vrot.lane.b32.xlu0 %v2235_v42, %s5135_s22 }
 0xe81   :  { %5039 = vset.pattern.permute.xlu1 %v5139_v43 }
 0xe82   :  { %2302 = vperm.xlu0 %5033, %v5441_v57   ;;  %2573 = vperm.xlu1 %5039, %v5441_v57  }
 0xe86   :  { %5035 = vset.pattern.permute.xlu0 %v5140_v44  ;;  %5040 = vset.pattern.permute.xlu1 %v5142_v46 }
 0xe87   :  { %2393 = vperm.xlu0 %5035, %v5441_v57  }
 0xe8b   :  { %5036 = vset.pattern.permute.xlu0 %v5141_v45 }
 0xe8c   :  { %2427 = vperm.xlu0 %5036, %v5441_v57  }
 0xe90   :  { %5037 = vset.pattern.permute.xlu0 %v5143_v47 }
 0xeda   :  { %v2218_v2 = vpop.permute.xlu1 %2217 }
 0xede   :  { %v2220_v50 = vpop.permute.xlu1 %2219 }
 0xedf   :  { %v2226_v62 = vadd.f32 %v2220_v50, %v2208_v60  ;;  %v2222_v35 = vsel %vm2221_vm14, %v2218_v2, %v2220_v50 }
 0xee0   :  { %v2225_v30 = vadd.f32 %v2222_v35, %v2207_v39 }
 0xee1   :  { %v2232_v36 = vadd.f32 %v2229_v3, %v2226_v62 }
 0xee2   :  { %v2253_v59 = vpop.permute.xlu1 %2252  ;;  %v2231_v60 = vadd.f32 %v2229_v3, %v2225_v30 }
 0xee6   :  { %v2255_v63 = vpop.permute.xlu1 %2254 }
 0xee7   :  { %v2260_v20 = vadd.f32 %v2255_v63, %v2247_v61  ;;  %v2256_v42 = vsel %vm2221_vm14, %v2253_v59, %v2255_v63 }
 0xee9   :  { %v2262_v22 = vadd.f32 %v2260_v20, %v2229_v3 }
 0xeeb   :  { %v2264_v0 = vmax.f32 %v2232_v36, %v2262_v22 }
 0xeed   :  { %v5514_v1 = vmax.f32 %v2264_v0, 0.0 }
 0xeef   :  { %v5517_v11 = vrot.slane %v5514_v1, 6  ;;  %v5520_v12 = vrot.slane %v5514_v1, 4  ;;  %v5523_v13 = vrot.slane %v5514_v1, 2 }
 0xef1   :  { %v1492_v26 = vpop.xlane.xlu0 %1491  ;;  %v2461_v14 = vsel %vm41_vm4, %v5520_v12, %v5523_v13  ;;  %v2551_v15 = vsel %vm41_vm4, %v5517_v11, %v5520_v12  ;;  %v2371_v51 = vsel %vm41_vm4, %v5523_v13, %v5514_v1 }
 0xef2   :  { %v1494_v17 = vmul.f32 0.03125, %v1492_v26  ;;  %v2463_v18 = vsel %vm56_vm0, %v2461_v14, %v5514_v1  ;;  %v2553_v4 = vsel %vm56_vm0, %v2551_v15, %v5523_v13  ;;  %v2373_v32 = vsel %vm56_vm0, %v2371_v51, %v5517_v11 }
 0xef3   :  { %v5540_v9 = vsel %vm2285_vm13, %v2463_v18, %v5517_v11  ;;  %v5544_v10 = vsel %vm2285_vm13, %v2553_v4, %v5514_v1  ;;  %v5550_v8 = vsel %vm2285_vm13, %v2373_v32, %v5520_v12 }
 0xef4   :  { %v1496_v19 = vadd.f32 1e-05, %v1494_v17 }
 0xef5   :  { %v1489_v27 = vpop.xlane.xlu0 %1488 }
 0xef6   :  { %5097 = vrsqrt.f32 %v1496_v19  ;;  %v1493_v28 = vmul.f32 0.03125, %v1489_v27  ;;  %v5144_v19 = vmov 12  }
 0xef8   :  { %v1495_v38 = vadd.f32 1e-05, %v1493_v28  ;;  %v2282_v28 = vsel %vm41_vm4, %v5514_v1, %v5517_v11  ;;  %v5147_v1 = vmov 6  }
 0xef9   :  { %v2240_v40 = vpop.permute.xlu0 %2239 }
 0xefa   :  { %5099 = vrsqrt.f32 %v1495_v38  ;;  %v2243_v52 = vsel %vm2221_vm14, %v2240_v40, %v2242_v49  ;;  %v2284_v38 = vsel %vm56_vm0, %v2282_v28, %v5520_v12  ;;  %v1566_v28 = vld [vmem:[%s6664_s8 + $0x28] sm:$0xff] }
 0xefb   :  { %v2246_v55 = vadd.f32 %v2243_v52, %v2233_v34  ;;  %v5146_v34 = vmov 3   ;;  %v5607_v40 = vsel %vm2285_vm13, %v2284_v38, %v5523_v13  ;;  %v5149_v52 = vmov 9   ;;  %v1716_v38 = vld [vmem:[%s6664_s8 + $0x48] sm:$0xff] }
 0xefd   :  { %v2259_v56 = vadd.f32 %v2256_v42, %v2246_v55  ;;  %v2337_v42 = vpop.permute.xlu1 %2336 }
 0xeff   :  { %v2261_v61 = vadd.f32 %v2259_v56, %v2229_v3 }
 0xf00   :  { %v5098_v62 = vpop.eup %5097 }
 0xf01   :  { %v2263_v20 = vmax.f32 %v2231_v60, %v2261_v61  ;;  %v1500_v16 = vmul.f32 %v5098_v62, %v5467_v21  ;;  %v2303_v35 = vpop.permute.xlu0 %2302  ;;  %v5616_v30 = vpop.permute.xlu1 %2517 }
 0xf02   :  { %v2310_v11 = vmul.f32 %v2303_v35, %v5607_v40 }
 0xf03   :  { %v2265_v37 = vmax.f32 %v2263_v20, 0.0  ;;  %v1506_v31 = vmul.f32 %v5511_v48, %v1500_v16 }
 0xf04   :  { %v5100_v2 = vpop.eup %5099 }
 0xf05   :  { %v2269_v50 = vrot.slane %v2265_v37, 6  ;;  %v2273_v36 = vrot.slane %v2265_v37, 4  ;;  %v2277_v22 = vrot.slane %v2265_v37, 2  ;;  %v1511_v59 = vadd.f32 %v5453_v54, %v1506_v31  ;;  %v5618_v56 = vpop.permute.xlu1 %2573 }
 0xf06   :  { %v1499_v3 = vmul.f32 %v5100_v2, %v5469_v7  ;;  %v2394_v13 = vpop.permute.xlu0 %2393 }
 0xf07   :  { %v2460_v49 = vsel %vm41_vm4, %v2273_v36, %v2277_v22  ;;  %v2550_v63 = vsel %vm41_vm4, %v2269_v50, %v2273_v36  ;;  %v2370_v0 = vsel %vm41_vm4, %v2277_v22, %v2265_v37  ;;  %v1515_v18 = vsel %vm196_vm5, %v1511_v59, 0.0 }
 0xf08   :  { %v2462_v26 = vsel %vm56_vm0, %v2460_v49, %v2265_v37  ;;  %v2552_v21 = vsel %vm56_vm0, %v2550_v63, %v2277_v22  ;;  %v2372_v14 = vsel %vm56_vm0, %v2370_v0, %v2269_v50  ;;  %v1505_v4 = vmul.f32 %v5511_v48, %v1499_v3  ;;  %1516 = vadd.xlane.f32.xlu0 %v1515_v18 }
 0xf09   :  { %v5570_v15 = vsel %vm2285_vm13, %v2462_v26, %v2269_v50  ;;  %v5573_v51 = vsel %vm2285_vm13, %v2552_v21, %v2265_v37  ;;  %v5576_v17 = vsel %vm2285_vm13, %v2372_v14, %v2273_v36  ;;  %v2281_v48 = vsel %vm41_vm4, %v2265_v37, %v2269_v50  ;;  %v5112_v14 = vld [vmem:[%s6659_s0] sm:$0xff] }
 0xf0a   :  { %v1510_v7 = vadd.f32 %v5453_v54, %v1505_v4  ;;  %v5145_v54 = vmov 0   ;;  %v2283_v27 = vsel %vm56_vm0, %v2281_v48, %v2273_v36  ;;  %v2344_v3 = vmul.f32 %v2337_v42, %v5607_v40 }
 0xf0b   :  { %v5597_v33 = vsel %vm2285_vm13, %v2283_v27, %v2277_v22  ;;  %v2428_v55 = vpop.permute.xlu0 %2427  ;;  %v2400_v4 = vmul.f32 %v2394_v13, %v5576_v17  ;;  %v2401_v48 = vmul.f32 %v2394_v13, %v5550_v8  ;;  %v1565_v27 = vld [vmem:[%s6664_s8 + $0x20] sm:$0xff]  ;;  %v1568_v13 = vld [vmem:[%s6664_s8 + $0x38] sm:$0xff]  ;;  %vm3964_vm4 = vcmask 15360  }
 0xf0c   :  { %v1512_v32 = vsel %vm196_vm5, %v1510_v7, 0.0  ;;  %v2309_v39 = vmul.f32 %v2303_v35, %v5597_v33  ;;  %v2343_v12 = vmul.f32 %v2337_v42, %v5597_v33  ;;  %v4633_v35 = vpack.c.bf16 %v1566_v28, %v1565_v27 }
 0xf0d   :  { %1513 = vadd.xlane.f32.xlu1 %v1512_v32  ;;  %v2435_v42 = vmul.f32 %v2428_v55, %v5550_v8  ;;  %v1540_v27 = vsub.s32 4, %v5263_v24 }
 0xf1e   :  { %2607 = vperm.xlu1 %5040, %v5441_v57   ;;  %2483 = vperm.xlu0 %5037, %v5441_v57  }
 0xf22   :  { %5042 = vset.pattern.permute.xlu1 %v5144_v19  ;;  %5041 = vset.pattern.permute.xlu0 %v5144_v19 }
 0xf23   :  { %1555 = vperm.xlu1 %5042, %v5111_v23   ;;  %v5659_v23 = vld [vmem:[%s6662_s5 + $0x8] sm:$0xff] }
 0xf27   :  { %5043 = vset.pattern.permute.xlu1 %v5145_v54 }
 0xf28   :  { %2289 = vperm.xlu1 %5043, %v5441_v57  }
 0xf2c   :  { %5044 = vset.pattern.permute.xlu1 %v5146_v34 }
 0xf2d   :  { %2377 = vperm.xlu1 %5044, %v5441_v57  }
 0xf31   :  { %2317 = vrot.lane.b32.xlu1 %v2309_v39, %s5135_s22  ;;  %v5150_v39 = vmov 0.0|0.0  }
 0xf32   :  { %5045 = vset.pattern.permute.xlu1 %v5147_v1  ;;  %4632 = vmatprep.subr.bf16.mxu0 %v5150_v39 }
 0xf33   :  { %4644 = vmatprep.subr.bf16.mxu1 %v5150_v39  ;;  %4634 = vmatpush3.bf16.msra.mxu0 %v4633_v35 }
 0xf34   :  { %4635 = vmatprep.subr.bf16.mxu0 %v5150_v39 }
 0xf35   :  { %2319 = vrot.lane.b32.xlu1 %v2310_v11, %s5135_s22 }
 0xf39   :  { %2467 = vperm.xlu1 %5045, %v5441_v57  }
 0xf3d   :  { %2351 = vrot.lane.b32.xlu1 %v2343_v12, %s5148_s29 }
 0xf3e   :  { %5046 = vset.pattern.permute.xlu1 %v5149_v52 }
 0xf95   :  { %v1517_v60 = vpop.xlane.xlu0 %1516 }
 0xf96   :  { %v1519_v61 = vmul.f32 0.03125, %v1517_v60  ;;  %v1717_v60 = vld [vmem:[%s6664_s8 + $0x50] sm:$0xff] }
 0xf98   :  { %v5620_v62 = vsub.f32 %v1511_v59, %v1519_v61  ;;  %v1718_v61 = vld [vmem:[%s6664_s8 + $0x58] sm:$0xff] }
 0xf9a   :  { %v1514_v20 = vpop.xlane.xlu1 %1513  ;;  %v1523_v37 = vmul.f32 %v5620_v62, %v5620_v62 }
 0xf9b   :  { %v1518_v16 = vmul.f32 0.03125, %v1514_v20  ;;  %v4648_v20 = vpack.c.bf16 %v1718_v61, %v1717_v60 }
 0xf9c   :  { %v1527_v2 = vsel %vm196_vm5, %v1523_v37, 0.0  ;;  %v2581_v37 = vmul.f32 %v5618_v56, %v5544_v10 }
 0xf9d   :  { %v5624_v31 = vsub.f32 %v1510_v7, %v1518_v16  ;;  %1528 = vadd.xlane.f32.xlu0 %v1527_v2  ;;  %v2434_v7 = vmul.f32 %v2428_v55, %v5576_v17  ;;  %v2484_v12 = vpop.permute.xlu0 %2483  ;;  %v5152_v2 = vmov 0.0  }
 0xf9e   :  { %v5627_v50 = vpop.permute.xlu1 %2607  ;;  %v2490_v16 = vmul.f32 %v2484_v12, %v5570_v15  ;;  %4422 = vmatprep.mubr.msk.f32.mxu0 %vm5151_vm15, %v5152_v2  ;;  %4444 = vmatprep.mubr.msk.f32.mxu1 %vm5151_vm15, %v5152_v2 }
 0xf9f   :  { %v1522_v36 = vmul.f32 %v5624_v31, %v5624_v31 }
 0xfa1   :  { %v1524_v22 = vsel %vm196_vm5, %v1522_v36, 0.0  ;;  %v2524_v36 = vmul.f32 %v5616_v30, %v5570_v15 }
 0xfa2   :  { %v5632_v49 = vpop.permute.xlu1 %1555  ;;  %1525 = vadd.xlane.f32.xlu1 %v1524_v22  ;;  %v2525_v22 = vmul.f32 %v5616_v30, %v5540_v9  ;;  %v2615_v30 = vmul.f32 %v5627_v50, %v5544_v10 }
 0xfa7   :  { %v5634_v59 = vpop.permute.xlu1 %2289 }
 0xfa8   :  { %v2297_v26 = vmul.f32 %v5634_v59, %v5597_v33 }
 0xfac   :  { %v5636_v63 = vpop.permute.xlu1 %2377 }
 0xfb0   :  { %v2318_v0 = vpop.permute.xlu1 %2317 }
 0xfb3   :  { %2353 = vrot.lane.b32.xlu1 %v2344_v3, %s5148_s29  ;;  %1551 = vperm.xlu0 %5041, %v5112_v14  }
 0xfb4   :  { %v5642_v21 = vpop.permute.xlu1 %2319 }
 0xfb5   :  { %v2325_v18 = vsel %vm2221_vm14, %v2318_v0, %v5642_v21 }
 0xfb6   :  { %v5651_v32 = vadd.f32 %v2325_v18, %v2297_v26 }
 0xfb7   :  { %2408 = vrot.lane.b32.xlu1 %v2400_v4, %s5135_s22  ;;  %2442 = vrot.lane.b32.xlu0 %v2434_v7, %s5148_s29 }
 0xfb8   :  { %5047 = vset.pattern.permute.xlu0 %v5137_v6  ;;  %v1715_v6 = vld [vmem:[%s6664_s8 + $0x40] sm:$0xff] }
 0xfb9   :  { %v4645_v11 = vpack.c.bf16 %v1716_v38, %v1715_v6  ;;  %v1546_v38 = vsub.s32 5, %v5263_v24 }
 0xfbb   :  { %2410 = vrot.lane.b32.xlu1 %v2401_v48, %s5135_s22  ;;  %2306 = vperm.xlu0 %5047, %v5659_v23  }
 0xfbc   :  { %4646 = vmatpush3.bf16.msra.mxu1 %v4645_v11 }
 0xfbd   :  { %4647 = vmatprep.subr.bf16.mxu1 %v5150_v39 }
 0xfbf   :  { %2557 = vperm.xlu1 %5046, %v5441_v57   ;;  %5048 = vset.pattern.permute.xlu0 %v5136_v5  ;;  %v1567_v5 = vld [vmem:[%s6664_s8 + $0x30] sm:$0xff] }
 0xfc0   :  { %2340 = vperm.xlu0 %5048, %v5659_v23   ;;  %v4636_v55 = vpack.c.bf16 %v1568_v13, %v1567_v5  ;;  %4649 = vmatpush3.bf16.msra.mxu1 %v4648_v20 }
 0xfc1   :  { %4656 = vmatprep.subr.bf16.mxu1 %v5150_v39 }
 0xfc2   :  { %4637 = vmatpush3.bf16.msra.mxu0 %v4636_v55 }
 0xfc3   :  { %2444 = vrot.lane.b32.xlu1 %v2435_v42, %s5148_s29  ;;  %4638 = vmatprep.subr.bf16.mxu0 %v5150_v39  ;;  %v5113_v42 = vld [vmem:[%s6658_s1 + $0x8] sm:$0xff] }
 0xfc4   :  { %5049 = vset.pattern.permute.xlu0 %v5144_v19  ;;  %5050 = vset.pattern.permute.xlu1 %v5140_v44  ;;  %v2614_v44 = vmul.f32 %v5627_v50, %v5573_v51 }
 0xfc5   :  { %2641 = vperm.xlu0 %5049, %v5441_v57   ;;  %v2491_v57 = vmul.f32 %v2484_v12, %v5540_v9  ;;  %v1541_v12 = vrot.slane %v5113_v42, %v1540_v27 }
 0xfc7   :  { %2498 = vrot.lane.b32.xlu1 %v2490_v16, %s5135_s22  ;;  %v1547_v16 = vrot.slane %v5113_v42, %v1546_v38 }
 0xfc9   :  { %2590 = vrot.lane.b32.xlu0 %v2581_v37, %s5135_s22 }
 0xfca   :  { %5052 = vset.pattern.permute.xlu0 %v5143_v47  ;;  %v2580_v47 = vmul.f32 %v5618_v56, %v5573_v51 }
 0xfcb   :  { %2500 = vrot.lane.b32.xlu1 %v2491_v57, %s5135_s22 }
 0xfcd   :  { %2622 = vrot.lane.b32.xlu0 %v2614_v44, %s5148_s29 }
 0xfcf   :  { %2532 = vrot.lane.b32.xlu1 %v2524_v36, %s5148_s29 }
 0xfd1   :  { %2487 = vperm.xlu0 %5052, %v5659_v23  }
 0xfd3   :  { %2534 = vrot.lane.b32.xlu1 %v2525_v22, %s5148_s29  ;;  %v1562_v22 = vld [vmem:[%s6664_s8 + $0x8] sm:$0xff] }
 0xfd5   :  { %5055 = vset.pattern.permute.xlu0 %v5142_v46 }
 0xfd6   :  { %2611 = vperm.xlu0 %5055, %v5659_v23  }
 0xfd7   :  { %2397 = vperm.xlu1 %5050, %v5659_v23  }
 0xfda   :  { %5058 = vset.pattern.permute.xlu0 %v5147_v1 }
 0xfdb   :  { %2588 = vrot.lane.b32.xlu1 %v2580_v47, %s5135_s22  ;;  %v1871_v47 = vld [vmem:[%s6664_s8 + $0x80] sm:$0xff] }
 0xfdc   :  { %5051 = vset.pattern.permute.xlu1 %v5141_v45  ;;  %v5744_v45 = vpop.permute.xlu1 %2467 }
 0xfdf   :  { %2431 = vperm.xlu1 %5051, %v5659_v23  }
 0xfe0   :  { %v2352_v46 = vpop.permute.xlu1 %2351 }
 0xfe3   :  { %2624 = vrot.lane.b32.xlu1 %v2615_v30, %s5148_s29  ;;  %v1872_v30 = vld [vmem:[%s6664_s8 + $0x88] sm:$0xff] }
 0xfe4   :  { %5053 = vset.pattern.permute.xlu1 %v5138_v41 }
 0xfe7   :  { %2521 = vperm.xlu1 %5053, %v5659_v23  }
 0xfeb   :  { %5054 = vset.pattern.permute.xlu1 %v5139_v43 }
 0xfec   :  { %2577 = vperm.xlu1 %5054, %v5659_v23  }
 0xff0   :  { %5056 = vset.pattern.permute.xlu1 %v5145_v54 }
 0xff1   :  { %2294 = vperm.xlu1 %5056, %v5659_v23  }
 0xff5   :  { %5057 = vset.pattern.permute.xlu1 %v5146_v34  ;;  %v2384_v34 = vmul.f32 %v5636_v63, %v5576_v17 }
 0xff6   :  { %2381 = vperm.xlu1 %5057, %v5659_v23  }
0x102a   :  { %v1529_v1 = vpop.xlane.xlu0 %1528 }
0x102b   :  { %v1531_v56 = vmul.f32 0.03125, %v1529_v1 }
0x102d   :  { %v1533_v0 = vadd.f32 1e-05, %v1531_v56 }
0x102f   :  { %v1526_v41 = vpop.xlane.xlu1 %1525 }
0x1030   :  { %v1530_v50 = vmul.f32 0.03125, %v1526_v41 }
0x1032   :  { %v1532_v43 = vadd.f32 1e-05, %v1530_v50  ;;  %v1552_v3 = vpop.permute.xlu0 %1551  ;;  %v2298_v50 = vmul.f32 %v5634_v59, %v5607_v40  ;;  %v1873_v59 = vld [vmem:[%s6664_s8 + $0x90] sm:$0xff] }
0x1033   :  { %v2354_v26 = vpop.permute.xlu1 %2353 }
0x1034   :  { %5101 = vrsqrt.f32 %v1532_v43  ;;  %v2360_v54 = vsel %vm2359_vm1, %v2352_v46, %v2354_v26  ;;  %v4657_v43 = vpack.c.bf16 %v1872_v30, %v1871_v47 }
0x1035   :  { %v2366_v14 = vadd.f32 %v2360_v54, %v5651_v32  ;;  %5103 = vrsqrt.f32 %v1533_v0  ;;  %v1563_v54 = vld [vmem:[%s6664_s8 + $0x10] sm:$0xff] }
0x1036   :  { %v2443_v18 = vpop.permute.xlu0 %2442 }
0x1037   :  { %v2409_v4 = vpop.permute.xlu1 %2408  ;;  %v2388_v7 = vadd.f32 %v2384_v34, %v2366_v14 }
0x103a   :  { %v2307_v48 = vpop.permute.xlu0 %2306 }
0x103b   :  { %v5751_v28 = vpop.permute.xlu1 %2410  ;;  %v2311_v6 = vmul.f32 %v2307_v48, %v5597_v33  ;;  %v2312_v35 = vmul.f32 %v2307_v48, %v5607_v40  ;;  %v2332_v48 = vadd.f32 %v5642_v21, %v2298_v50  ;;  %v1794_v21 = vld [vmem:[%s6664_s8 + $0x68] sm:$0xff]  ;;  %v2475_v50 = vmul.f32 %v5744_v45, %v5540_v9 }
0x103c   :  { %v2416_v55 = vsel %vm2221_vm14, %v2409_v4, %v5751_v28 }
0x103d   :  { %2323 = vrot.lane.b32.xlu1 %v2312_v35, %s5135_s22  ;;  %2321 = vrot.lane.b32.xlu0 %v2311_v6, %s5135_s22  ;;  %v2422_v44 = vadd.f32 %v2416_v55, %v2388_v7  ;;  %v1874_v7 = vld [vmem:[%s6664_s8 + $0x98] sm:$0xff]  ;;  %v2367_v6 = vadd.f32 %v2354_v26, %v2332_v48  ;;  %v2027_v26 = vld [vmem:[%s6664_s8 + $0xc0] sm:$0xff] }
0x103e   :  { %v5102_v32 = vpop.eup %5101  ;;  %v4660_v38 = vpack.c.bf16 %v1874_v7, %v1873_v59  ;;  %v4019_v59 = vld [vmem:[%s6665_s6 + $0xa8] sm:$0xff]  ;;  %v4020_v7 = vld [vmem:[%s6665_s6 + $0xb0] sm:$0xff] }
0x103f   :  { %v1536_v11 = vmul.f32 %v5102_v32, %v5624_v31  ;;  %v5764_v5 = vpop.permute.xlu1 %2557  ;;  %v2341_v13 = vpop.permute.xlu0 %2340  ;;  %v1561_v31 = vld [vmem:[%s6664_s8] sm:$0xff] }
0x1040   :  { %v5104_v60 = vpop.eup %5103  ;;  %v2345_v61 = vmul.f32 %v2341_v13, %v5597_v33  ;;  %v2346_v46 = vmul.f32 %v2341_v13, %v5607_v40  ;;  %v4639_v0 = vpack.c.bf16 %v1562_v22, %v1561_v31  ;;  %v1793_v32 = vld [vmem:[%s6664_s8 + $0x60] sm:$0xff]  ;;  %v2385_v13 = vmul.f32 %v5636_v63, %v5550_v8 }
0x1041   :  { %v1542_v20 = vmul.f32 %v1541_v12, %v1536_v11  ;;  %2471 = vperm.xlu0 %5058, %v5659_v23   ;;  %v1537_v37 = vmul.f32 %v5104_v60, %v5620_v62  ;;  %v2474_v62 = vmul.f32 %v5744_v45, %v5570_v15 }
0x1042   :  { %2355 = vrot.lane.b32.xlu1 %v2345_v61, %s5148_s29  ;;  %v2389_v55 = vadd.f32 %v2385_v13, %v2367_v6  ;;  %v4651_v61 = vpack.c.bf16 %v1794_v21, %v1793_v32  ;;  %v2105_v21 = vld [vmem:[%s6664_s8 + $0xe0] sm:$0xff]  ;;  %v4021_v13 = vld [vmem:[%s6665_s6 + $0xb8] sm:$0xff] }
0x1043   :  { %v1548_v57 = vadd.f32 %v1547_v16, %v1542_v20  ;;  %v2445_v36 = vpop.permute.xlu1 %2444  ;;  %v1543_v34 = vmul.f32 %v1541_v12, %v1537_v37  ;;  %v2028_v12 = vld [vmem:[%s6664_s8 + $0xc8] sm:$0xff]  ;;  %v1796_v37 = vld [vmem:[%s6664_s8 + $0x78] sm:$0xff] }
0x1044   :  { %v2450_v1 = vsel %vm2359_vm1, %v2443_v18, %v2445_v36  ;;  %v5833_v60 = vpop.permute.xlu0 %2641  ;;  %v4669_v20 = vpack.c.bf16 %v2028_v12, %v2027_v26  ;;  %v2106_v26 = vld [vmem:[%s6664_s8 + $0xe8] sm:$0xff] }
0x1045   :  { %v5788_v56 = vmul.f32 %v1552_v3, %v1548_v57  ;;  %v2456_v41 = vadd.f32 %v2450_v1, %v2422_v44  ;;  %5059 = vset.pattern.permute.xlu0 %v5149_v52  ;;  %v1564_v52 = vld [vmem:[%s6664_s8 + $0x18] sm:$0xff]  ;;  %v1549_v11 = vadd.f32 %v1547_v16, %v1543_v34  ;;  %v1795_v16 = vld [vmem:[%s6664_s8 + $0x70] sm:$0xff]  ;;  %v1949_v1 = vld [vmem:[%s6664_s8 + $0xa0] sm:$0xff] }
0x1046   :  { %2357 = vrot.lane.b32.xlu1 %v2346_v46, %s5148_s29  ;;  %v4642_v35 = vpack.c.bf16 %v1564_v52, %v1563_v54  ;;  %v2029_v57 = vld [vmem:[%s6664_s8 + $0xd0] sm:$0xff]  ;;  %v2030_v44 = vld [vmem:[%s6664_s8 + $0xd8] sm:$0xff]  ;;  %v4654_v30 = vpack.c.bf16 %v1796_v37, %v1795_v16  ;;  %v4675_v37 = vpack.c.bf16 %v2106_v26, %v2105_v21 }
0x1047   :  { %v1570_v14 = vrot.slane %v5788_v56, 2  ;;  %v1719_v3 = vrot.slane %v5788_v56, 4  ;;  %v5799_v18 = vpop.permute.xlu1 %2498  ;;  %v5801_v4 = vadd.f32 %v2474_v62, %v2456_v41  ;;  %v5843_v31 = vmul.f32 %v5632_v49, %v1549_v11  ;;  %v4018_v41 = vld [vmem:[%s6665_s6 + $0xa0] sm:$0xff]  ;;  %v1951_v34 = vld [vmem:[%s6664_s8 + $0xb0] sm:$0xff]  ;;  %v1952_v52 = vld [vmem:[%s6664_s8 + $0xb8] sm:$0xff] }
0x1048   :  { %v2423_v49 = vadd.f32 %v5751_v28, %v2389_v55  ;;  %v5863_v47 = vpop.permute.xlu0 %2590  ;;  %v4672_v46 = vpack.c.bf16 %v2030_v44, %v2029_v57  ;;  %v1950_v28 = vld [vmem:[%s6664_s8 + $0xa8] sm:$0xff]  ;;  %v4666_v32 = vpack.c.bf16 %v1952_v52, %v1951_v34  ;;  %v4684_v11 = vpack.c.bf16 %v4020_v7, %v4019_v59  ;;  %v4022_v55 = vld [vmem:[%s6665_s6 + $0xc0] sm:$0xff]  ;;  %v2107_v44 = vld [vmem:[%s6664_s8 + $0xf0] sm:$0xff] }
0x1049   :  { %4423 = vmatmul.mubr.msk.f32.vlgmr.msra.gmra.mrb[12].mxu0 %vm196_vm5, %v1570_v14  ;;  %4445 = vmatmul.mubr.msk.f32.vlgmr.msra.gmra.mrb[14].mxu1 %vm196_vm5, %v1719_v3  ;;  %v1797_v14 = vrot.slane %v5788_v56, 6  ;;  %v2031_v45 = vrot.slane %v5843_v31, 4  ;;  %v4687_v57 = vpack.c.bf16 %v4022_v55, %v4021_v13 }
0x104a   :  { %4640 = vmatpush3.bf16.msra.mxu0 %v4639_v0  ;;  %4658 = vmatpush3.bf16.msra.mxu1 %v4657_v43  ;;  %v2457_v22 = vadd.f32 %v2445_v36, %v2423_v49  ;;  %v4017_v36 = vld [vmem:[%s6665_s6 + $0x98] sm:$0xff]  ;;  %v4663_v43 = vpack.c.bf16 %v1950_v28, %v1949_v1  ;;  %v4024_v1 = vld [vmem:[%s6665_s6 + $0xd0] sm:$0xff] }
0x104b   :  { %v5818_v42 = vpop.permute.xlu1 %2500  ;;  %4641 = vmatprep.subr.bf16.mxu0 %v5150_v39  ;;  %4659 = vmatprep.subr.bf16.mxu1 %v5150_v39  ;;  %v4681_v54 = vpack.c.bf16 %v4018_v41, %v4017_v36 }
0x104c   :  { %4433 = vmatprep.mubr.msk.f32.mxu0 %vm5151_vm15, %v5152_v2  ;;  %4466 = vmatprep.mubr.msk.f32.mxu1 %vm5151_vm15, %v5152_v2  ;;  %v2479_v0 = vadd.f32 %v2475_v50, %v2457_v22  ;;  %v5904_v48 = vpop.permute.xlu0 %2622  ;;  %v1953_v22 = vrot.slane %v5843_v31, 2 }
0x104e   :  { %4643 = vmatpush3.bf16.msra.mxu0 %v4642_v35  ;;  %4661 = vmatpush3.bf16.msra.mxu1 %v4660_v38 }
0x104f   :  { %v5845_v63 = vpop.permute.xlu1 %2532  ;;  %4650 = vmatprep.subr.bf16.mxu0 %v5150_v39  ;;  %4668 = vmatprep.subr.bf16.mxu1 %v5150_v39 }
0x1051   :  { %4434 = vmatmul.mubr.msk.f32.vlgmr.msra.gmra.mrb[14].mxu0 %vm196_vm5, %v5788_v56  ;;  %4467 = vmatmul.mubr.msk.f32.vlgmr.msra.gmra.mrb[16].mxu1 %vm196_vm5, %v5843_v31  ;;  %v2513_v56 = vadd.f32 %v5818_v42, %v2479_v0 }
0x1052   :  { %4652 = vmatpush3.bf16.msra.mxu0 %v4651_v61  ;;  %4670 = vmatpush3.bf16.msra.mxu1 %v4669_v20  ;;  %v2565_v61 = vmul.f32 %v5764_v5, %v5544_v10  ;;  %v2488_v20 = vpop.permute.xlu0 %2487 }
0x1053   :  { %v5868_v62 = vpop.permute.xlu1 %2534  ;;  %4653 = vmatprep.subr.bf16.mxu0 %v5150_v39  ;;  %4671 = vmatprep.subr.bf16.mxu1 %v5150_v39  ;;  %v2492_v36 = vmul.f32 %v2488_v20, %v5570_v15 }
0x1054   :  { %4455 = vmatprep.mubr.msk.f32.mxu0 %vm5151_vm15, %v5152_v2  ;;  %4488 = vmatprep.mubr.msk.f32.mxu1 %vm5151_vm15, %v5152_v2  ;;  %v2547_v38 = vadd.f32 %v5868_v62, %v2513_v56  ;;  %v2540_v56 = vsel %vm2359_vm1, %v5845_v63, %v5868_v62  ;;  %v4028_v63 = vld [vmem:[%s6665_s6 + $0xf0] sm:$0xff] }
0x1055   :  { %v2658_v62 = vld [vmem:[%s6665_s6 + $0x10] sm:$0xff] }
0x1056   :  { %4655 = vmatpush3.bf16.msra.mxu0 %v4654_v30  ;;  %4673 = vmatpush3.bf16.msra.mxu1 %v4672_v46  ;;  %v2569_v16 = vadd.f32 %v2565_v61, %v2547_v38  ;;  %v2108_v30 = vld [vmem:[%s6664_s8 + $0xf8] sm:$0xff]  ;;  %v4023_v46 = vld [vmem:[%s6665_s6 + $0xc8] sm:$0xff] }
0x1057   :  { %v2398_v3 = vpop.permute.xlu1 %2397  ;;  %4662 = vmatprep.subr.bf16.mxu0 %v5150_v39  ;;  %4680 = vmatprep.subr.bf16.mxu1 %v5150_v39  ;;  %v4678_v50 = vpack.c.bf16 %v2108_v30, %v2107_v44  ;;  %v4690_v0 = vpack.c.bf16 %v4024_v1, %v4023_v46  ;;  %v4029_v61 = vld [vmem:[%s6665_s6 + $0xf8] sm:$0xff] }
0x1058   :  { %v2402_v6 = vmul.f32 %v2398_v3, %v5576_v17  ;;  %v2403_v35 = vmul.f32 %v2398_v3, %v5550_v8  ;;  %v2603_v41 = vadd.f32 %v5863_v47, %v2569_v16  ;;  %v2657_v3 = vld [vmem:[%s6665_s6 + $0x8] sm:$0xff]  ;;  %v2564_v16 = vmul.f32 %v5764_v5, %v5573_v51 }
0x1059   :  { %4456 = vmatmul.mubr.msk.f32.vlgmr.msra.gmra.mrb[16].mxu0 %vm196_vm5, %v1797_v14  ;;  %4489 = vmatmul.mubr.msk.f32.vlgmr.msra.gmra.mrb[18].mxu1 %vm196_vm5, %v2031_v45  ;;  %v2656_v14 = vld [vmem:[%s6665_s6] sm:$0xff]  ;;  %v2506_v45 = vsel %vm2221_vm14, %v5799_v18, %v5818_v42  ;;  %v4027_v42 = vld [vmem:[%s6665_s6 + $0xe8] sm:$0xff] }
0x105a   :  { %4664 = vmatpush3.bf16.msra.mxu0 %v4663_v43  ;;  %4682 = vmatpush1.bf16.msra.mxu1 %v4681_v54  ;;  %v4025_v43 = vld [vmem:[%s6665_s6 + $0xd8] sm:$0xff]  ;;  %v4026_v54 = vld [vmem:[%s6665_s6 + $0xe0] sm:$0xff]  ;;  %v4708_v18 = vpack.c.bf16 %v2657_v3, %v2656_v14  ;;  %v4696_v13 = vpack.c.bf16 %v4028_v63, %v4027_v42  ;;  %v4035_v63 = vld [vmem:[%s6665_s6 + $0x128] sm:$0xf] }
0x105b   :  { %2412 = vrot.lane.b32.xlu0 %v2402_v6, %s5135_s22  ;;  %2414 = vrot.lane.b32.xlu1 %v2403_v35, %s5135_s22  ;;  %v5919_v12 = vpop.permute.xlu1 %2588  ;;  %v4693_v7 = vpack.c.bf16 %v4026_v54, %v4025_v43  ;;  %v2512_v35 = vadd.f32 %v2506_v45, %v5801_v4  ;;  %v4033_v14 = vld [vmem:[%s6665_s6 + $0x118] sm:$0xff]  ;;  %v2664_v3 = vld [vmem:[%s6665_s6 + $0x40] sm:$0xff] }
0x105c   :  { %4665 = vmatprep.subr.bf16.mxu0 %v5150_v39  ;;  %4683 = vmatprep.subr.bf16.mxu1 %v5150_v39  ;;  %v2596_v5 = vsel %vm2221_vm14, %v5919_v12, %v5863_v47  ;;  %v4031_v47 = vld [vmem:[%s6665_s6 + $0x108] sm:$0xff]  ;;  %v2612_v12 = vpop.permute.xlu0 %2611 }
0x105d   :  { %4477 = vmatprep.mubr.msk.f32.mxu0 %vm5151_vm15, %v5152_v2  ;;  %v2546_v21 = vadd.f32 %v2540_v56, %v2512_v35  ;;  %v2616_v43 = vmul.f32 %v2612_v12, %v5573_v51  ;;  %v2665_v45 = vld [vmem:[%s6665_s6 + $0x48] sm:$0xff]  ;;  %v4040_v35 = vld [vmem:[%s6665_s6 + $0x130] sm:$0xff] }
0x105e   :  { %4667 = vmatpush3.bf16.msra.mxu0 %v4666_v32  ;;  %4685 = vmatpush1.bf16.msra.mxu1 %v4684_v11  ;;  %v2659_v32 = vld [vmem:[%s6665_s6 + $0x18] sm:$0xff]  ;;  %v4720_v56 = vpack.c.bf16 %v2665_v45, %v2664_v3 }
0x105f   :  { %2561 = vperm.xlu0 %5059, %v5659_v23   ;;  %v2432_v49 = vpop.permute.xlu1 %2431  ;;  %4674 = vmatprep.subr.bf16.mxu0 %v5150_v39  ;;  %v4711_v55 = vpack.c.bf16 %v2659_v32, %v2658_v62  ;;  %v2568_v44 = vadd.f32 %v2564_v16, %v2546_v21  ;;  %v2668_v62 = vld [vmem:[%s6665_s6 + $0x60] sm:$0xff]  ;;  %v2669_v32 = vld [vmem:[%s6665_s6 + $0x68] sm:$0xff]  ;;  %v2671_v16 = vld [vmem:[%s6665_s6 + $0x78] sm:$0xff] }
0x1060   :  { %v2436_v28 = vmul.f32 %v2432_v49, %v5576_v17  ;;  %4686 = vmatprep.subr.bf16.mxu1 %v5150_v39  ;;  %v2437_v59 = vmul.f32 %v2432_v49, %v5550_v8  ;;  %v4042_v21 = vld [vmem:[%s6665_s6 + $0x140] sm:$0xff] }
0x1061   :  { %4478 = vmatmul.mubr.msk.f32.vlgmr.msra.gmra.mrb[18].mxu0 %vm196_vm5, %v1953_v22 }
0x1062   :  { %4676 = vmatpush3.bf16.msra.mxu0 %v4675_v37  ;;  %4688 = vmatpush1.bf16.msra.mxu1 %v4687_v57  ;;  %v2660_v37 = vld [vmem:[%s6665_s6 + $0x20] sm:$0xff]  ;;  %v2661_v57 = vld [vmem:[%s6665_s6 + $0x28] sm:$0xff] }
0x1063   :  { %2446 = vrot.lane.b32.xlu1 %v2436_v28, %s5148_s29  ;;  %2502 = vrot.lane.b32.xlu0 %v2492_v36, %s5135_s22  ;;  %v2625_v34 = vpop.permute.xlu1 %2624  ;;  %v4714_v1 = vpack.c.bf16 %v2661_v57, %v2660_v37  ;;  %v2602_v28 = vadd.f32 %v2596_v5, %v2568_v44  ;;  %v4032_v36 = vld [vmem:[%s6665_s6 + $0x110] sm:$0xff]  ;;  %v4045_v57 = vld [vmem:[%s6665_s6 + $0x158] sm:$0xff] }
0x1064   :  { %v2637_v52 = vadd.f32 %v2625_v34, %v2603_v41  ;;  %4677 = vmatprep.subr.bf16.mxu0 %v5150_v39  ;;  %4689 = vmatprep.subr.bf16.mxu1 %v5150_v39  ;;  %v2630_v22 = vsel %vm2359_vm1, %v5904_v48, %v2625_v34  ;;  %v2662_v48 = vld [vmem:[%s6665_s6 + $0x30] sm:$0xff]  ;;  %v2663_v41 = vld [vmem:[%s6665_s6 + $0x38] sm:$0xff]  ;;  %v4702_v54 = vpack.c.bf16 %v4032_v36, %v4031_v47  ;;  %v2672_v44 = vld [vmem:[%s6665_s6 + $0x80] sm:$0xff] }
0x1065   :  { %4499 = vmatprep.mubr.msk.f32.mxu0 %vm5151_vm15, %v5152_v2  ;;  %5060 = vset.pattern.permute.xlu0 %v5144_v19  ;;  %v2109_v19 = vrot.slane %v5843_v31, 6  ;;  %v2493_v31 = vmul.f32 %v2488_v20, %v5540_v9  ;;  %v4030_v20 = vld [vmem:[%s6665_s6 + $0x100] sm:$0xff]  ;;  %v4717_v34 = vpack.c.bf16 %v2663_v41, %v2662_v48  ;;  %v4044_v37 = vld [vmem:[%s6665_s6 + $0x150] sm:$0xff]  ;;  %v4061_v36 = vld [vmem:[%s6665_s6 + $0x1c8] sm:$0xff] }
0x1066   :  { %v2649_v6 = vadd.f32 %v5833_v60, %v2637_v52  ;;  %4679 = vmatpush3.bf16.msra.mxu0 %v4678_v50  ;;  %4691 = vmatpush1.bf16.msra.mxu1 %v4690_v0  ;;  %v4699_v46 = vpack.c.bf16 %v4030_v20, %v4029_v61  ;;  %v2636_v50 = vadd.f32 %v2630_v22, %v2602_v28  ;;  %v2670_v61 = vld [vmem:[%s6665_s6 + $0x70] sm:$0xff]  ;;  %v4049_v28 = vld [vmem:[%s6665_s6 + $0x178] sm:$0xff] }
0x1067   :  { %2448 = vrot.lane.b32.xlu1 %v2437_v59, %s5148_s29  ;;  %v2522_v38 = vpop.permute.xlu1 %2521  ;;  %4692 = vmatprep.subr.bf16.mxu1 %v5150_v39  ;;  %v4729_v5 = vpack.c.bf16 %v2671_v16, %v2670_v61  ;;  %v4741_v22 = vpack.c.bf16 %v4045_v57, %v4044_v37  ;;  %v4062_v48 = vld [vmem:[%s6665_s6 + $0x1d0] sm:$0xff]  ;;  %v4082_v16 = vld [vmem:[%s6665_s6 + $0x260] sm:$0xff]  ;;  %v4073_v57 = vld [vmem:[%s6665_s6 + $0x228] sm:$0xff] }
0x1068   :  { %v5996_v4 = vmax.f32 %v2649_v6, 0.0  ;;  %v2526_v11 = vmul.f32 %v2522_v38, %v5570_v15  ;;  %4707 = vmatprep.subr.bf16.mxu0 %v5150_v39  ;;  %v2527_v49 = vmul.f32 %v2522_v38, %v5540_v9  ;;  %v2648_v52 = vadd.f32 %v5833_v60, %v2636_v50  ;;  %v2666_v6 = vld [vmem:[%s6665_s6 + $0x50] sm:$0xff]  ;;  %v4041_v38 = vld [vmem:[%s6665_s6 + $0x138] sm:$0xff]  ;;  %v4058_v37 = vld [vmem:[%s6665_s6 + $0x1c0] sm:$0xf] }
0x1069   :  { %4500 = vmatmul.mubr.msk.f32.vlgmr.msra.gmra.mrb[20].mxu0 %vm196_vm5, %v2109_v19  ;;  %v2617_v60 = vmul.f32 %v2612_v12, %v5544_v10  ;;  %v4048_v12 = vld [vmem:[%s6665_s6 + $0x170] sm:$0xff] }
0x106a   :  { %4694 = vmatpush1.bf16.msra.mxu1 %v4693_v7  ;;  %4709 = vmatpush1.bf16.msra.mxu0 %v4708_v18  ;;  %v2698_v26 = vrot.slane %v5996_v4, 2  ;;  %v2667_v18 = vld [vmem:[%s6665_s6 + $0x58] sm:$0xff]  ;;  %v6076_v42 = vmax.f32 %v2648_v52, 0.0  ;;  %v2674_v41 = vld [vmem:[%s6665_s6 + $0x90] sm:$0xf]  ;;  %v4747_v50 = vpack.c.bf16 %v4049_v28, %v4048_v12 }
0x106b   :  { %4039 = vmatprep.mubr.msk.f32.mxu0 %vm2700_vm3, %v5996_v4  ;;  %2504 = vrot.lane.b32.xlu1 %v2493_v31, %s5135_s22  ;;  %v2578_v30 = vpop.permute.xlu1 %2577  ;;  %v4723_v19 = vpack.c.bf16 %v2667_v18, %v2666_v6  ;;  %v4052_v52 = vld [vmem:[%s6665_s6 + $0x190] sm:$0xff]  ;;  %v4054_v18 = vld [vmem:[%s6665_s6 + $0x1a0] sm:$0xff] }
0x106c   :  { %2536 = vrot.lane.b32.xlu0 %v2526_v11, %s5148_s29  ;;  %4695 = vmatprep.subr.bf16.mxu1 %v5150_v39  ;;  %v2582_v0 = vmul.f32 %v2578_v30, %v5573_v51  ;;  %v2583_v59 = vmul.f32 %v2578_v30, %v5544_v10  ;;  %v4735_v11 = vpack.c.bf16 %v4041_v38, %v4040_v35  ;;  %v2697_v31 = vrot.slane %v6076_v42, 2  ;;  %v4046_v30 = vld [vmem:[%s6665_s6 + $0x160] sm:$0xff]  ;;  %v4067_v35 = vld [vmem:[%s6665_s6 + $0x1f8] sm:$0xff] }
0x106d   :  { %4037 = vmatprep.mubr.msk.f32.mxu1 %vm2700_vm3, %v2698_v26  ;;  %4710 = vmatprep.subr.bf16.mxu0 %v5150_v39  ;;  %v4043_v26 = vld [vmem:[%s6665_s6 + $0x148] sm:$0xff]  ;;  %v4068_v38 = vld [vmem:[%s6665_s6 + $0x200] sm:$0xff] }
0x106e   :  { %4697 = vmatpush1.bf16.msra.mxu1 %v4696_v13  ;;  %4712 = vmatpush1.bf16.msra.mxu0 %v4711_v55  ;;  %v2872_v13 = vrot.slane %v5996_v4, 4  ;;  %v4726_v55 = vpack.c.bf16 %v2669_v32, %v2668_v62  ;;  %v4738_v20 = vpack.c.bf16 %v4043_v26, %v4042_v21  ;;  %v4056_v62 = vld [vmem:[%s6665_s6 + $0x1b0] sm:$0xff]  ;;  %v4057_v32 = vld [vmem:[%s6665_s6 + $0x1b8] sm:$0xff] }
0x106f   :  { %2538 = vrot.lane.b32.xlu1 %v2527_v49, %s5148_s29  ;;  %4698 = vmatprep.subr.bf16.mxu1 %v5150_v39  ;;  %v2673_v49 = vld [vmem:[%s6665_s6 + $0x88] sm:$0xff]  ;;  %v4759_v21 = vpack.c.bf16 %v4057_v32, %v4056_v62  ;;  %v4094_v32 = vld [vmem:[%s6665_s6 + $0x2c0] sm:$0xff] }
0x1070   :  { %2645 = vperm.xlu0 %5060, %v5659_v23   ;;  %4713 = vmatprep.subr.bf16.mxu0 %v5150_v39  ;;  %v4034_v23 = vld [vmem:[%s6665_s6 + $0x120] sm:$0xff] }
0x1071   :  { %v4705_v7 = vpack.c.bf16 %v4034_v23, %v4033_v14  ;;  %v4064_v14 = vld [vmem:[%s6665_s6 + $0x1e0] sm:$0xff]  ;;  %v2971_v23 = vrot.slane %v5996_v4, 6  ;;  %v4065_v4 = vld [vmem:[%s6665_s6 + $0x1e8] sm:$0xff] }
0x1072   :  { %4700 = vmatpush1.bf16.msra.mxu1 %v4699_v46  ;;  %4715 = vmatpush1.bf16.msra.mxu0 %v4714_v1  ;;  %v4047_v46 = vld [vmem:[%s6665_s6 + $0x168] sm:$0xff]  ;;  %v4732_v1 = vpack.c.bf16 %v2673_v49, %v2672_v44  ;;  %v2871_v44 = vrot.slane %v6076_v42, 4 }
0x1073   :  { %2592 = vrot.lane.b32.xlu1 %v2582_v0, %s5135_s22  ;;  %4701 = vmatprep.subr.bf16.mxu1 %v5150_v39  ;;  %v4744_v47 = vpack.c.bf16 %v4047_v46, %v4046_v30  ;;  %v4762_v0 = vpack.c.bf16 %v4062_v48, %v4061_v36  ;;  %v4084_v30 = vld [vmem:[%s6665_s6 + $0x270] sm:$0xff]  ;;  %v4085_v46 = vld [vmem:[%s6665_s6 + $0x278] sm:$0xff]  ;;  %v4086_v36 = vld [vmem:[%s6665_s6 + $0x280] sm:$0xff] }
0x1074   :  { %2626 = vrot.lane.b32.xlu0 %v2616_v43, %s5148_s29  ;;  %4716 = vmatprep.subr.bf16.mxu0 %v5150_v39  ;;  %v4050_v43 = vld [vmem:[%s6665_s6 + $0x180] sm:$0xff]  ;;  %v4792_v12 = vpack.c.bf16 %v4085_v46, %v4084_v30  ;;  %v4087_v48 = vld [vmem:[%s6665_s6 + $0x288] sm:$0xff] }
0x1075   :  { %v4113_v46 = vld [vmem:[%s6665_s6 + $0x348] sm:$0xff] }
0x1076   :  { %4703 = vmatpush1.bf16.msra.mxu1 %v4702_v54  ;;  %4718 = vmatpush1.bf16.msra.mxu0 %v4717_v34  ;;  %v4051_v54 = vld [vmem:[%s6665_s6 + $0x188] sm:$0xff]  ;;  %v4063_v34 = vld [vmem:[%s6665_s6 + $0x1d8] sm:$0xff] }
0x1077   :  { %2594 = vrot.lane.b32.xlu1 %v2583_v59, %s5135_s22  ;;  %4704 = vmatprep.subr.bf16.mxu1 %v5150_v39  ;;  %v4750_v3 = vpack.c.bf16 %v4051_v54, %v4050_v43  ;;  %v4765_v45 = vpack.c.bf16 %v4064_v14, %v4063_v34  ;;  %v4053_v59 = vld [vmem:[%s6665_s6 + $0x198] sm:$0xff]  ;;  %v4088_v54 = vld [vmem:[%s6665_s6 + $0x290] sm:$0xff] }
0x1078   :  { %4719 = vmatprep.subr.bf16.mxu0 %v5150_v39  ;;  %v4089_v34 = vld [vmem:[%s6665_s6 + $0x298] sm:$0xff] }
0x1079   :  { %v4103_v14 = vld [vmem:[%s6665_s6 + $0x2f8] sm:$0xff] }
0x107a   :  { %4706 = vmatpush1.bf16.msra.mxu1 %v4705_v7  ;;  %4721 = vmatpush1.bf16.msra.mxu0 %v4720_v56  ;;  %v4066_v7 = vld [vmem:[%s6665_s6 + $0x1f0] sm:$0xff]  ;;  %v4753_v56 = vpack.c.bf16 %v4053_v59, %v4052_v52  ;;  %v4091_v52 = vld [vmem:[%s6665_s6 + $0x2a8] sm:$0xff]  ;;  %v4079_v59 = vld [vmem:[%s6665_s6 + $0x258] sm:$0xf] }
0x107b   :  { %2628 = vrot.lane.b32.xlu1 %v2617_v60, %s5148_s29  ;;  %2742 = vmatprep.subr.mxu1 %v5152_v2  ;;  %v4768_v6 = vpack.c.bf16 %v4066_v7, %v4065_v4  ;;  %v4055_v60 = vld [vmem:[%s6665_s6 + $0x1a8] sm:$0xff]  ;;  %v2970_v7 = vrot.slane %v6076_v42, 6 }
0x107c   :  { %4722 = vmatprep.subr.bf16.mxu0 %v5150_v39 }
0x107e   :  { %4036 = vmatpush1.msk.msra.mxu1 %vm56_vm0, %v4035_v63  ;;  %4724 = vmatpush1.bf16.msra.mxu0 %v4723_v19  ;;  %v4756_v19 = vpack.c.bf16 %v4055_v60, %v4054_v18  ;;  %v4771_v63 = vpack.c.bf16 %v4068_v38, %v4067_v35  ;;  %v4092_v60 = vld [vmem:[%s6665_s6 + $0x2b0] sm:$0xff]  ;;  %v6309_v38 = vpop.permute.xlu1 %2294 }
0x107f   :  { %2771 = vmatmul.mubr.f32.vlgmr.msra.gmra.mrb[20].mxu1 %v2697_v31  ;;  %4734 = vmatprep.subr.bf16.mxu1 %v5150_v39  ;;  %v4070_v31 = vld [vmem:[%s6665_s6 + $0x210] sm:$0xff] }
0x1080   :  { %4736 = vmatpush1.bf16.msra.mxu1 %v4735_v11  ;;  %4060 = vmatprep.mubr.msk.f32.mxu1 %vm2700_vm3, %v2872_v13  ;;  %v4069_v11 = vld [vmem:[%s6665_s6 + $0x208] sm:$0xff]  ;;  %v4071_v13 = vld [vmem:[%s6665_s6 + $0x218] sm:$0xff] }
0x1081   :  { %4725 = vmatprep.subr.bf16.mxu0 %v5150_v39  ;;  %4737 = vmatprep.subr.bf16.mxu1 %v5150_v39  ;;  %v4774_v26 = vpack.c.bf16 %v4070_v31, %v4069_v11  ;;  %v4095_v11 = vld [vmem:[%s6665_s6 + $0x2c8] sm:$0xff] }
0x1082   :  { %4727 = vmatpush1.bf16.msra.mxu0 %v4726_v55  ;;  %v4072_v55 = vld [vmem:[%s6665_s6 + $0x220] sm:$0xff] }
0x1083   :  { %4728 = vmatprep.subr.bf16.mxu0 %v5150_v39  ;;  %v4777_v61 = vpack.c.bf16 %v4072_v55, %v4071_v13  ;;  %v4807_v13 = vpack.c.bf16 %v4095_v11, %v4094_v32  ;;  %v4096_v55 = vld [vmem:[%s6665_s6 + $0x2d0] sm:$0xff] }
0x1084   :  { %4739 = vmatpush1.bf16.msra.mxu1 %v4738_v20  ;;  %v4083_v20 = vld [vmem:[%s6665_s6 + $0x268] sm:$0xff] }
0x1085   :  { %4740 = vmatprep.subr.bf16.mxu1 %v5150_v39  ;;  %v4789_v49 = vpack.c.bf16 %v4083_v20, %v4082_v16  ;;  %v6339_v16 = vpop.permute.xlu1 %2381 }
0x1086   :  { %4730 = vmatpush1.bf16.msra.mxu0 %v4729_v5  ;;  %v4074_v5 = vld [vmem:[%s6665_s6 + $0x230] sm:$0xff] }
0x1087   :  { %4731 = vmatprep.subr.bf16.mxu0 %v5150_v39 }
0x1088   :  { %4742 = vmatpush1.bf16.msra.mxu1 %v4741_v22  ;;  %v4780_v22 = vpack.c.bf16 %v4074_v5, %v4073_v57  ;;  %v4112_v57 = vld [vmem:[%s6665_s6 + $0x340] sm:$0xff] }
0x1089   :  { %4743 = vmatprep.subr.bf16.mxu1 %v5150_v39 }
0x108a   :  { %4733 = vmatpush1.bf16.msra.mxu0 %v4732_v1  ;;  %v4075_v1 = vld [vmem:[%s6665_s6 + $0x238] sm:$0xff] }
0x108b   :  { %2817 = vmatprep.subr.mxu0 %v5152_v2 }
0x108c   :  { %4745 = vmatpush1.bf16.msra.mxu1 %v4744_v47  ;;  %v4076_v47 = vld [vmem:[%s6665_s6 + $0x240] sm:$0xff] }
0x108d   :  { %4746 = vmatprep.subr.bf16.mxu1 %v5150_v39  ;;  %v4783_v28 = vpack.c.bf16 %v4076_v47, %v4075_v1  ;;  %v4114_v1 = vld [vmem:[%s6665_s6 + $0x350] sm:$0xff] }
0x108e   :  { %4038 = vmatpush1.msk.msra.mxu0 %vm56_vm0, %v2674_v41  ;;  %v4077_v41 = vld [vmem:[%s6665_s6 + $0x248] sm:$0xff] }
0x108f   :  { %2846 = vmatmul.mubr.f32.vlgmr.msra.gmra.mrb[22].mxu0 %v6076_v42  ;;  %4761 = vmatprep.subr.bf16.mxu0 %v5150_v39  ;;  %v4093_v42 = vld [vmem:[%s6665_s6 + $0x2b8] sm:$0xff] }
0x1090   :  { %4748 = vmatpush1.bf16.msra.mxu1 %v4747_v50  ;;  %4763 = vmatpush1.bf16.msra.mxu0 %v4762_v0  ;;  %v4078_v50 = vld [vmem:[%s6665_s6 + $0x250] sm:$0xff]  ;;  %v4795_v0 = vpack.c.bf16 %v4087_v48, %v4086_v36  ;;  %v4804_v62 = vpack.c.bf16 %v4093_v42, %v4092_v60  ;;  %v4115_v36 = vld [vmem:[%s6665_s6 + $0x358] sm:$0xff]  ;;  %v4116_v48 = vld [vmem:[%s6665_s6 + $0x360] sm:$0xff]  ;;  %v2299_v42 = vmul.f32 %v6309_v38, %v5597_v33 }
0x1091   :  { %4081 = vmatprep.mubr.msk.f32.mxu0 %vm2700_vm3, %v2971_v23  ;;  %4749 = vmatprep.subr.bf16.mxu1 %v5150_v39  ;;  %v4786_v43 = vpack.c.bf16 %v4078_v50, %v4077_v41  ;;  %v4104_v23 = vld [vmem:[%s6665_s6 + $0x300] sm:$0xff]  ;;  %v4100_v41 = vld [vmem:[%s6665_s6 + $0x2f0] sm:$0xf]  ;;  %v4834_v50 = vpack.c.bf16 %v4116_v48, %v4115_v36  ;;  %v2386_v33 = vmul.f32 %v6339_v16, %v5576_v17 }
0x1092   :  { %4764 = vmatprep.subr.bf16.mxu0 %v5150_v39  ;;  %v4816_v4 = vpack.c.bf16 %v4104_v23, %v4103_v14  ;;  %v4119_v14 = vld [vmem:[%s6665_s6 + $0x378] sm:$0xff]  ;;  %v4120_v23 = vld [vmem:[%s6665_s6 + $0x380] sm:$0xff] }
0x1094   :  { %4751 = vmatpush1.bf16.msra.mxu1 %v4750_v3  ;;  %4766 = vmatpush1.bf16.msra.mxu0 %v4765_v45  ;;  %v4798_v3 = vpack.c.bf16 %v4089_v34, %v4088_v54  ;;  %v4090_v45 = vld [vmem:[%s6665_s6 + $0x2a0] sm:$0xff] }
0x1095   :  { %4752 = vmatprep.subr.bf16.mxu1 %v5150_v39  ;;  %4767 = vmatprep.subr.bf16.mxu0 %v5150_v39  ;;  %v4801_v18 = vpack.c.bf16 %v4091_v52, %v4090_v45 }
0x1098   :  { %4754 = vmatpush1.bf16.msra.mxu1 %v4753_v56  ;;  %4769 = vmatpush1.bf16.msra.mxu0 %v4768_v6  ;;  %v4105_v56 = vld [vmem:[%s6665_s6 + $0x308] sm:$0xff]  ;;  %v4106_v6 = vld [vmem:[%s6665_s6 + $0x310] sm:$0xff] }
0x1099   :  { %4755 = vmatprep.subr.bf16.mxu1 %v5150_v39  ;;  %4770 = vmatprep.subr.bf16.mxu0 %v5150_v39  ;;  %v4819_v35 = vpack.c.bf16 %v4106_v6, %v4105_v56  ;;  %v2387_v6 = vmul.f32 %v6339_v16, %v5550_v8 }
0x109c   :  { %4757 = vmatpush1.bf16.msra.mxu1 %v4756_v19  ;;  %4772 = vmatpush1.bf16.msra.mxu0 %v4771_v63  ;;  %v4107_v19 = vld [vmem:[%s6665_s6 + $0x318] sm:$0xff]  ;;  %v4108_v63 = vld [vmem:[%s6665_s6 + $0x320] sm:$0xff] }
0x109d   :  { %4758 = vmatprep.subr.bf16.mxu1 %v5150_v39  ;;  %4773 = vmatprep.subr.bf16.mxu0 %v5150_v39  ;;  %v4822_v31 = vpack.c.bf16 %v4108_v63, %v4107_v19 }
0x10a0   :  { %4760 = vmatpush1.bf16.msra.mxu1 %v4759_v21  ;;  %4775 = vmatpush1.bf16.msra.mxu0 %v4774_v26  ;;  %v4109_v21 = vld [vmem:[%s6665_s6 + $0x328] sm:$0xff]  ;;  %v4110_v26 = vld [vmem:[%s6665_s6 + $0x330] sm:$0xff] }
0x10a1   :  { %2915 = vmatprep.subr.mxu1 %v5152_v2  ;;  %4776 = vmatprep.subr.bf16.mxu0 %v5150_v39  ;;  %v4825_v20 = vpack.c.bf16 %v4110_v26, %v4109_v21 }
0x10a4   :  { %4059 = vmatpush1.msk.msra.mxu1 %vm56_vm0, %v4058_v37  ;;  %4778 = vmatpush1.bf16.msra.mxu0 %v4777_v61  ;;  %v4097_v61 = vld [vmem:[%s6665_s6 + $0x2d8] sm:$0xff] }
0x10a5   :  { %2944 = vmatmul.mubr.f32.vlgmr.msra.gmra.mrb[22].mxu1 %v2871_v44  ;;  %4779 = vmatprep.subr.bf16.mxu0 %v5150_v39  ;;  %v4111_v37 = vld [vmem:[%s6665_s6 + $0x338] sm:$0xff]  ;;  %v4810_v5 = vpack.c.bf16 %v4097_v61, %v4096_v55  ;;  %v4098_v44 = vld [vmem:[%s6665_s6 + $0x2e0] sm:$0xff] }
0x10a6   :  { %4788 = vmatprep.subr.bf16.mxu1 %v5150_v39  ;;  %v4828_v30 = vpack.c.bf16 %v4112_v57, %v4111_v37 }
0x10a7   :  { %4790 = vmatpush1.bf16.msra.mxu1 %v4789_v49  ;;  %v4099_v49 = vld [vmem:[%s6665_s6 + $0x2e8] sm:$0xff] }
0x10a8   :  { %4781 = vmatpush1.bf16.msra.mxu0 %v4780_v22  ;;  %4791 = vmatprep.subr.bf16.mxu1 %v5150_v39  ;;  %v4813_v47 = vpack.c.bf16 %v4099_v49, %v4098_v44 }
0x10a9   :  { %4782 = vmatprep.subr.bf16.mxu0 %v5150_v39 }
0x10ab   :  { %4793 = vmatpush1.bf16.msra.mxu1 %v4792_v12  ;;  %v4831_v12 = vpack.c.bf16 %v4114_v1, %v4113_v46 }
0x10ac   :  { %4784 = vmatpush1.bf16.msra.mxu0 %v4783_v28  ;;  %4794 = vmatprep.subr.bf16.mxu1 %v5150_v39 }
0x10ad   :  { %4785 = vmatprep.subr.bf16.mxu0 %v5150_v39 }
0x10af   :  { %4796 = vmatpush1.bf16.msra.mxu1 %v4795_v0  ;;  %v2324_v22 = vpop.permute.xlu1 %2323  ;;  %v4117_v0 = vld [vmem:[%s6665_s6 + $0x368] sm:$0xff] }
0x10b0   :  { %4787 = vmatpush1.bf16.msra.mxu0 %v4786_v43  ;;  %4797 = vmatprep.subr.bf16.mxu1 %v5150_v39  ;;  %v4118_v43 = vld [vmem:[%s6665_s6 + $0x370] sm:$0xff] }
0x10b1   :  { %3014 = vmatprep.subr.mxu0 %v5152_v2  ;;  %v4837_v34 = vpack.c.bf16 %v4118_v43, %v4117_v0 }
0x10b3   :  { %4799 = vmatpush1.bf16.msra.mxu1 %v4798_v3  ;;  %v2300_v3 = vmul.f32 %v6309_v38, %v5607_v40  ;;  %v4121_v40 = vld [vmem:[%s6665_s6 + $0x388] sm:$0xf] }
0x10b4   :  { %4080 = vmatpush1.msk.msra.mxu0 %vm56_vm0, %v4079_v59  ;;  %4800 = vmatprep.subr.bf16.mxu1 %v5150_v39  ;;  %v2356_v28 = vpop.permute.xlu1 %2355  ;;  %v2322_v59 = vpop.permute.xlu0 %2321 }
0x10b5   :  { %3043 = vmatmul.mubr.f32.vlgmr.msra.gmra.mrb[24].mxu0 %v2970_v7  ;;  %4815 = vmatprep.subr.bf16.mxu0 %v5150_v39  ;;  %v2334_v52 = vadd.f32 %v2324_v22, %v2300_v3 }
0x10b6   :  { %4817 = vmatpush1.bf16.msra.mxu0 %v4816_v4  ;;  %v4840_v4 = vpack.c.bf16 %v4120_v23, %v4119_v14 }
0x10b7   :  { %4818 = vmatprep.subr.bf16.mxu0 %v5150_v39  ;;  %4802 = vmatpush1.bf16.msra.mxu1 %v4801_v18  ;;  %v2326_v18 = vsel %vm2221_vm14, %v2322_v59, %v2324_v22 }
0x10b8   :  { %4803 = vmatprep.subr.bf16.mxu1 %v5150_v39  ;;  %v2358_v54 = vpop.permute.xlu1 %2357  ;;  %v2333_v63 = vadd.f32 %v2326_v18, %v2299_v42  ;;  %v4126_v42 = vld [vmem:[%s6665_s6 + $0x3a0] sm:$0xff] }
0x10b9   :  { %v2369_v7 = vadd.f32 %v2358_v54, %v2334_v52 }
0x10ba   :  { %4820 = vmatpush1.bf16.msra.mxu0 %v4819_v35  ;;  %v2361_v35 = vsel %vm2359_vm1, %v2356_v28, %v2358_v54 }
0x10bb   :  { %4821 = vmatprep.subr.bf16.mxu0 %v5150_v39  ;;  %4805 = vmatpush1.bf16.msra.mxu1 %v4804_v62  ;;  %v2391_v19 = vadd.f32 %v2387_v6, %v2369_v7  ;;  %v2368_v11 = vadd.f32 %v2361_v35, %v2333_v63  ;;  %v4146_v6 = vld [vmem:[%s6665_s6 + $0x430] sm:$0xff] }
0x10bc   :  { %4806 = vmatprep.subr.bf16.mxu1 %v5150_v39 }
0x10bd   :  { %v2390_v55 = vadd.f32 %v2386_v33, %v2368_v11  ;;  %v4129_v33 = vld [vmem:[%s6665_s6 + $0x3b8] sm:$0xff] }
0x10be   :  { %4823 = vmatpush1.bf16.msra.mxu0 %v4822_v31 }
0x10bf   :  { %4824 = vmatprep.subr.bf16.mxu0 %v5150_v39  ;;  %4808 = vmatpush1.bf16.msra.mxu1 %v4807_v13 }
0x10c0   :  { %4809 = vmatprep.subr.bf16.mxu1 %v5150_v39  ;;  %v2472_v60 = vpop.permute.xlu0 %2471 }
0x10c1   :  { %v2477_v21 = vmul.f32 %v2472_v60, %v5540_v9  ;;  %v2476_v22 = vmul.f32 %v2472_v60, %v5570_v15 }
0x10c2   :  { %4826 = vmatpush1.bf16.msra.mxu0 %v4825_v20 }
0x10c3   :  { %4827 = vmatprep.subr.bf16.mxu0 %v5150_v39  ;;  %4811 = vmatpush1.bf16.msra.mxu1 %v4810_v5 }
0x10c4   :  { %4812 = vmatprep.subr.bf16.mxu1 %v5150_v39 }
0x10c6   :  { %4829 = vmatpush1.bf16.msra.mxu0 %v4828_v30 }
0x10c7   :  { %4830 = vmatprep.subr.bf16.mxu0 %v5150_v39  ;;  %4814 = vmatpush1.bf16.msra.mxu1 %v4813_v47 }
0x10c8   :  { %3111 = vmatprep.subr.mxu1 %v5152_v2 }
0x10ca   :  { %4832 = vmatpush1.bf16.msra.mxu0 %v4831_v12 }
0x10cb   :  { %4833 = vmatprep.subr.bf16.mxu0 %v5150_v39  ;;  %4101 = vmatpush1.msk.msra.mxu1 %vm56_vm0, %v4100_v41 }
0x10cc   :  { %4842 = vmatprep.subr.bf16.mxu1 %v5150_v39 }
0x10cd   :  { %v2415_v45 = vpop.permute.xlu1 %2414  ;;  %v2413_v8 = vpop.permute.xlu0 %2412 }
0x10ce   :  { %4835 = vmatpush1.bf16.msra.mxu0 %v4834_v50  ;;  %v2425_v32 = vadd.f32 %v2415_v45, %v2391_v19  ;;  %v2417_v26 = vsel %vm2221_vm14, %v2413_v8, %v2415_v45 }
0x10cf   :  { %4836 = vmatprep.subr.bf16.mxu0 %v5150_v39  ;;  %v2424_v37 = vadd.f32 %v2417_v26, %v2390_v55  ;;  %v4150_v26 = vld [vmem:[%s6665_s6 + $0x450] sm:$0xff]  ;;  %v4130_v55 = vld [vmem:[%s6665_s6 + $0x3c0] sm:$0xff] }
0x10d2   :  { %4838 = vmatpush1.bf16.msra.mxu0 %v4837_v34 }
0x10d3   :  { %4839 = vmatprep.subr.bf16.mxu0 %v5150_v39 }
0x10d5   :  { %v2447_v56 = vpop.permute.xlu1 %2446 }
0x10d6   :  { %4841 = vmatpush1.bf16.msra.mxu0 %v4840_v4  ;;  %v4125_v4 = vld [vmem:[%s6665_s6 + $0x398] sm:$0xff] }
0x10d7   :  { %3211 = vmatprep.subr.mxu0 %v5152_v2 }
0x10d9   :  { %v2449_v62 = vpop.permute.xlu1 %2448 }
0x10da   :  { %4122 = vmatpush1.msk.msra.mxu0 %vm56_vm0, %v4121_v40  ;;  %v2459_v31 = vadd.f32 %v2449_v62, %v2425_v32  ;;  %v2451_v61 = vsel %vm2359_vm1, %v2447_v56, %v2449_v62  ;;  %v4145_v56 = vld [vmem:[%s6665_s6 + $0x428] sm:$0xff]  ;;  %v4147_v62 = vld [vmem:[%s6665_s6 + $0x438] sm:$0xff]  ;;  %v4148_v32 = vld [vmem:[%s6665_s6 + $0x440] sm:$0xff] }
0x10db   :  { %4869 = vmatprep.subr.bf16.mxu0 %v5150_v39  ;;  %v2458_v44 = vadd.f32 %v2451_v61, %v2424_v37  ;;  %v4127_v40 = vld [vmem:[%s6665_s6 + $0x3a8] sm:$0xff]  ;;  %v4870_v19 = vpack.c.bf16 %v4146_v6, %v4145_v56  ;;  %v4151_v37 = vld [vmem:[%s6665_s6 + $0x458] sm:$0xff]  ;;  %v3449_v56 = vld [vmem:[%s6664_s8 + $0x100] sm:$0xff] }
0x10dc   :  { %v2481_v20 = vadd.f32 %v2477_v21, %v2459_v31  ;;  %v4846_v11 = vpack.c.bf16 %v4127_v40, %v4126_v42  ;;  %v4128_v31 = vld [vmem:[%s6665_s6 + $0x3b0] sm:$0xff]  ;;  %v4149_v21 = vld [vmem:[%s6665_s6 + $0x448] sm:$0xff] }
0x10dd   :  { %v2505_v38 = vpop.permute.xlu1 %2504  ;;  %v2480_v9 = vadd.f32 %v2476_v22, %v2458_v44  ;;  %v4131_v61 = vld [vmem:[%s6665_s6 + $0x3c8] sm:$0xff]  ;;  %v4132_v44 = vld [vmem:[%s6665_s6 + $0x3d0] sm:$0xff] }
0x10de   :  { %v2562_v13 = vpop.permute.xlu0 %2561  ;;  %v2515_v49 = vadd.f32 %v2505_v38, %v2481_v20  ;;  %v4876_v20 = vpack.c.bf16 %v4150_v26, %v4149_v21  ;;  %v3450_v6 = vld [vmem:[%s6664_s8 + $0x108] sm:$0x3] }
0x10df   :  { %v2567_v1 = vmul.f32 %v2562_v13, %v5544_v10  ;;  %v2566_v50 = vmul.f32 %v2562_v13, %v5573_v51  ;;  %v4124_v51 = vld [vmem:[%s6665_s6 + $0x390] sm:$0xff]  ;;  %v4849_v13 = vpack.c.bf16 %v4129_v33, %v4128_v31 }
0x10e0   :  { %v4843_v18 = vpack.c.bf16 %v4125_v4, %v4124_v51  ;;  %v4162_v51 = vld [vmem:[%s6665_s6 + $0x4b0] sm:$0xff] }
0x10e1   :  { %v2539_v57 = vpop.permute.xlu1 %2538 }
0x10e2   :  { %v2503_v5 = vpop.permute.xlu0 %2502  ;;  %v2549_v46 = vadd.f32 %v2539_v57, %v2515_v49  ;;  %v4133_v49 = vld [vmem:[%s6665_s6 + $0x3d8] sm:$0xff] }
0x10e3   :  { %v2507_v17 = vsel %vm2221_vm14, %v2503_v5, %v2505_v38  ;;  %v4873_v38 = vpack.c.bf16 %v4148_v32, %v4147_v62  ;;  %v4852_v5 = vpack.c.bf16 %v4131_v61, %v4130_v55  ;;  %v4163_v32 = vld [vmem:[%s6665_s6 + $0x4b8] sm:$0xf] }
0x10e4   :  { %v2514_v12 = vadd.f32 %v2507_v17, %v2480_v9  ;;  %v2571_v36 = vadd.f32 %v2567_v1, %v2549_v46  ;;  %v4154_v46 = vld [vmem:[%s6665_s6 + $0x470] sm:$0xff]  ;;  %v4855_v17 = vpack.c.bf16 %v4133_v49, %v4132_v44  ;;  %v4135_v9 = vld [vmem:[%s6665_s6 + $0x3e8] sm:$0xff] }
0x10e5   :  { %v2593_v30 = vpop.permute.xlu1 %2592 }
0x10e6   :  { %v2537_v16 = vpop.permute.xlu0 %2536 }
0x10e7   :  { %v2541_v47 = vsel %vm2359_vm1, %v2537_v16, %v2539_v57  ;;  %v4152_v57 = vld [vmem:[%s6665_s6 + $0x460] sm:$0xff] }
0x10e8   :  { %v2548_v48 = vadd.f32 %v2541_v47, %v2514_v12  ;;  %v4879_v22 = vpack.c.bf16 %v4152_v57, %v4151_v37  ;;  %v4134_v16 = vld [vmem:[%s6665_s6 + $0x3e0] sm:$0xff]  ;;  %v4155_v47 = vld [vmem:[%s6665_s6 + $0x478] sm:$0xff] }
0x10e9   :  { %v2595_v28 = vpop.permute.xlu1 %2594  ;;  %v4156_v12 = vld [vmem:[%s6665_s6 + $0x480] sm:$0xff] }
0x10ea   :  { %v2605_v41 = vadd.f32 %v2595_v28, %v2571_v36  ;;  %v2570_v15 = vadd.f32 %v2566_v50, %v2548_v48  ;;  %v2597_v34 = vsel %vm2221_vm14, %v2593_v30, %v2595_v28  ;;  %v4153_v30 = vld [vmem:[%s6665_s6 + $0x468] sm:$0xff]  ;;  %v4858_v28 = vpack.c.bf16 %v4135_v9, %v4134_v16  ;;  %v4136_v36 = vld [vmem:[%s6665_s6 + $0x3f0] sm:$0xff]  ;;  %v4137_v48 = vld [vmem:[%s6665_s6 + $0x3f8] sm:$0xff] }
0x10eb   :  { %v4882_v1 = vpack.c.bf16 %v4154_v46, %v4153_v30  ;;  %v4157_v50 = vld [vmem:[%s6665_s6 + $0x488] sm:$0xff] }
0x10ec   :  { %v2604_v3 = vadd.f32 %v2597_v34, %v2570_v15  ;;  %v4138_v15 = vld [vmem:[%s6665_s6 + $0x400] sm:$0xff]  ;;  %v6584_v30 = vld [vmem:[%s6664_s8 + $0x14a] sm:$0x3f] }
0x10ed   :  { %v2629_v0 = vpop.permute.xlu1 %2628  ;;  %v2186_v46 = vrot.slane %v6584_v30, %v1270_v58  ;;  %v3451_v58 = vld [vmem:[%s6664_s8 + $0x10a] sm:$0xff] }
0x10ee   :  { %v2639_v43 = vadd.f32 %v2629_v0, %v2605_v41  ;;  %v4885_v41 = vpack.c.bf16 %v4156_v12, %v4155_v47 }
0x10ef   :  { %v2646_v54 = vpop.permute.xlu0 %2645 }
0x10f0   :  { %v2651_v14 = vadd.f32 %v2646_v54, %v2639_v43  ;;  %v4861_v43 = vpack.c.bf16 %v4137_v48, %v4136_v36 }
0x10f2   :  { %v2655_v23 = vmax.f32 %v2651_v14, 0.0  ;;  %v4159_v14 = vld [vmem:[%s6665_s6 + $0x498] sm:$0xff] }
0x10f3   :  { %v2627_v45 = vpop.permute.xlu0 %2626 }
0x10f4   :  { %v2631_v10 = vsel %vm2359_vm1, %v2627_v45, %v2629_v0  ;;  %4102 = vmatprep.mubr.msk.f32.mxu1 %vm2700_vm3, %v2655_v23  ;;  %v3168_v52 = vrot.slane %v2655_v23, 2  ;;  %v3267_v35 = vrot.slane %v2655_v23, 4  ;;  %v3366_v8 = vrot.slane %v2655_v23, 6  ;;  %v4158_v0 = vld [vmem:[%s6665_s6 + $0x490] sm:$0xff]  ;;  %v4160_v23 = vld [vmem:[%s6665_s6 + $0x4a0] sm:$0xff] }
0x10f5   :  { %v2638_v59 = vadd.f32 %v2631_v10, %v2604_v3  ;;  %v4888_v34 = vpack.c.bf16 %v4158_v0, %v4157_v50  ;;  %v4140_v45 = vld [vmem:[%s6665_s6 + $0x410] sm:$0xff]  ;;  %v4141_v10 = vld [vmem:[%s6665_s6 + $0x418] sm:$0xff] }
0x10f6   :  { %4123 = vmatprep.mubr.msk.f32.mxu0 %vm2700_vm3, %v3168_v52  ;;  %v4891_v52 = vpack.c.bf16 %v4160_v23, %v4159_v14  ;;  %v4867_v4 = vpack.c.bf16 %v4141_v10, %v4140_v45  ;;  %v3452_v0 = vld [vmem:[%s6664_s8 + $0x112] sm:$0xff] }
0x10f7   :  { %v2650_v7 = vadd.f32 %v2646_v54, %v2638_v59  ;;  %v4139_v54 = vld [vmem:[%s6665_s6 + $0x408] sm:$0xff] }
0x10f8   :  { %v4864_v3 = vpack.c.bf16 %v4139_v54, %v4138_v15  ;;  %v4161_v59 = vld [vmem:[%s6665_s6 + $0x4a8] sm:$0xff]  ;;  %v3453_v15 = vld [vmem:[%s6664_s8 + $0x11a] sm:$0xff] }
0x10f9   :  { %v6431_v60 = vmax.f32 %v2650_v7, 0.0  ;;  %v4894_v7 = vpack.c.bf16 %v4162_v51, %v4161_v59  ;;  %v3454_v54 = vld [vmem:[%s6664_s8 + $0x122] sm:$0xff] }
0x10fa   :  { %v4904_v14 = vpack.c.bf16 %v3454_v54, %v3453_v15 }
0x10fb   :  { %3140 = vmatmul.mubr.f32.vlgmr.msra.gmra.mrb[24].mxu1 %v6431_v60  ;;  %v3167_v63 = vrot.slane %v6431_v60, 2  ;;  %v3266_v62 = vrot.slane %v6431_v60, 4 }
0x10fc   :  { %4844 = vmatpush1.bf16.msra.mxu1 %v4843_v18  ;;  %4144 = vmatprep.mubr.msk.f32.mxu1 %vm2700_vm3, %v3267_v35 }
0x10fd   :  { %3240 = vmatmul.mubr.f32.vlgmr.msra.gmra.mrb[26].mxu0 %v3167_v63  ;;  %4845 = vmatprep.subr.bf16.mxu1 %v5150_v39  ;;  %v4897_v63 = vpack.c.bf16 %v3450_v6, %v3449_v56 }
0x10fe   :  { %4871 = vmatpush1.bf16.msra.mxu0 %v4870_v19  ;;  %4165 = vmatprep.mubr.msk.f32.mxu0 %vm2700_vm3, %v3366_v8  ;;  %v4142_v19 = vld [vmem:[%s6665_s6 + $0x420] sm:$0xf]  ;;  %v3365_v8 = vrot.slane %v6431_v60, 6 }
0x10ff   :  { %4872 = vmatprep.subr.bf16.mxu0 %v5150_v39 }
0x1100   :  { %4847 = vmatpush1.bf16.msra.mxu1 %v4846_v11  ;;  %v3459_v11 = vld [vmem:[%s6666_s7] sm:$0x3] }
0x1101   :  { %4848 = vmatprep.subr.bf16.mxu1 %v5150_v39 }
0x1102   :  { %4874 = vmatpush1.bf16.msra.mxu0 %v4873_v38 }
0x1103   :  { %4875 = vmatprep.subr.bf16.mxu0 %v5150_v39 }
0x1104   :  { %4850 = vmatpush1.bf16.msra.mxu1 %v4849_v13 }
0x1105   :  { %4851 = vmatprep.subr.bf16.mxu1 %v5150_v39 }
0x1106   :  { %4877 = vmatpush1.bf16.msra.mxu0 %v4876_v20 }
0x1107   :  { %4878 = vmatprep.subr.bf16.mxu0 %v5150_v39 }
0x1108   :  { %4853 = vmatpush1.bf16.msra.mxu1 %v4852_v5 }
0x1109   :  { %4854 = vmatprep.subr.bf16.mxu1 %v5150_v39 }
0x110a   :  { %4880 = vmatpush1.bf16.msra.mxu0 %v4879_v22 }
0x110b   :  { %4881 = vmatprep.subr.bf16.mxu0 %v5150_v39 }
0x110c   :  { %4856 = vmatpush1.bf16.msra.mxu1 %v4855_v17 }
0x110d   :  { %4857 = vmatprep.subr.bf16.mxu1 %v5150_v39 }
0x110e   :  { %4883 = vmatpush1.bf16.msra.mxu0 %v4882_v1 }
0x110f   :  { %4884 = vmatprep.subr.bf16.mxu0 %v5150_v39 }
0x1110   :  { %4859 = vmatpush1.bf16.msra.mxu1 %v4858_v28 }
0x1111   :  { %4860 = vmatprep.subr.bf16.mxu1 %v5150_v39 }
0x1112   :  { %4886 = vmatpush1.bf16.msra.mxu0 %v4885_v41 }
0x1113   :  { %4887 = vmatprep.subr.bf16.mxu0 %v5150_v39 }
0x1114   :  { %4862 = vmatpush1.bf16.msra.mxu1 %v4861_v43  ;;  %v4901_v43 = vpack.c.bf16 %v3452_v0, %v3451_v58 }
0x1115   :  { %4863 = vmatprep.subr.bf16.mxu1 %v5150_v39 }
0x1116   :  { %4889 = vmatpush1.bf16.msra.mxu0 %v4888_v34 }
0x1117   :  { %4890 = vmatprep.subr.bf16.mxu0 %v5150_v39 }
0x1118   :  { %4865 = vmatpush1.bf16.msra.mxu1 %v4864_v3 }
0x1119   :  { %4866 = vmatprep.subr.bf16.mxu1 %v5150_v39 }
0x111a   :  { %4892 = vmatpush1.bf16.msra.mxu0 %v4891_v52 }
0x111b   :  { %4893 = vmatprep.subr.bf16.mxu0 %v5150_v39 }
0x111c   :  { %4868 = vmatpush1.bf16.msra.mxu1 %v4867_v4  ;;  %v1639_v18 = vpop.f32.mrb[12].mxu0  ;;  %v1788_v42 = vpop.f32.mrb[14].mxu1 }
0x111d   :  { %3310 = vmatprep.subr.mxu1 %v5152_v2  ;;  %v4424_v40 = vpop.f32.mrb[13].mxu0  ;;  %v4446_v35 = vpop.f32.mrb[15].mxu1 }
0x111e   :  { %4895 = vmatpush1.bf16.msra.mxu0 %v4894_v7  ;;  %v3447_v35 = vrot.slane %v6584_v30, %v1357_v53  ;;  %v3456_v53 = vld [vmem:[%s6664_s8 + $0x132] sm:$0xff] }
0x111f   :  { %3409 = vmatprep.subr.mxu0 %v5152_v2 }
0x1120   :  { %4143 = vmatpush1.msk.msra.mxu1 %vm56_vm0, %v4142_v19  ;;  %v3463_v19 = vrot.slane %v6584_v30, %v194_v25  ;;  %v3455_v25 = vld [vmem:[%s6664_s8 + $0x12a] sm:$0xff] }
0x1121   :  { %3339 = vmatmul.mubr.f32.vlgmr.msra.gmra.mrb[26].mxu1 %v3266_v62  ;;  %4896 = vmatprep.subr.bf16.mxu1 %v5150_v39 }
0x1122   :  { %4164 = vmatpush1.msk.msra.mxu0 %vm56_vm0, %v4163_v32  ;;  %4899 = vmatpush3.bf16.msk.msra.mxu1 %vm4898_vm6, %v4897_v63  ;;  %vm3698_vm0 = vcmask 517120  }
0x1123   :  { %3438 = vmatmul.mubr.f32.vlgmr.msra.gmra.mrb[28].mxu0 %v3365_v8  ;;  %4506 = vmatprep.mubr.msk.f32.mxu1 %vm5151_vm15, %v5152_v2 }
0x1124   :  { %v1711_v31 = vpop.f32.mrb[14].mxu0  ;;  %v1944_v33 = vpop.f32.mrb[16].mxu1  ;;  %4900 = vmatprep.subr.bf16.mxu0 %v5150_v39  ;;  %4517 = vmatprep.mubr.msk.f32.mxu0 %vm5151_vm15, %v5152_v2 }
0x1125   :  { %4507 = vmatmul.mubr.msk.f32.vlgmr.msra.gmra.mrb[28].mxu1 %vm3464_vm2, %v3459_v11  ;;  %v1712_v60 = vadd.f32 %v1711_v31, %v1639_v18  ;;  %v4435_v38 = vpop.f32.mrb[15].mxu0  ;;  %v4468_v21 = vpop.f32.mrb[17].mxu1  ;;  %4906 = vmatprep.subr.bf16.mxu1 %v5150_v39 }
0x1126   :  { %4528 = vmatprep.mubr.msk.f32.mxu1 %vm5151_vm15, %v5152_v2  ;;  %4902 = vmatpush3.bf16.msra.mxu0 %v4901_v43 }
0x1127   :  { %v1792_v26 = vadd.f32 %v1788_v42, %v1712_v60  ;;  %4903 = vmatprep.subr.bf16.mxu0 %v5150_v39 }
0x112a   :  { %4905 = vmatpush3.bf16.msra.mxu0 %v4904_v14 }
0x112b   :  { %4531 = vmatprep.subr.mxu0 %v5152_v2 }
0x112c   :  { %v1866_v13 = vpop.f32.mrb[16].mxu0  ;;  %v2100_v55 = vpop.f32.mrb[18].mxu1 }
0x112d   :  { %v1870_v61 = vadd.f32 %v1866_v13, %v1792_v26  ;;  %v4457_v20 = vpop.f32.mrb[17].mxu0  ;;  %v4490_v37 = vpop.f32.mrb[19].mxu1  ;;  %v4907_v26 = vpack.c.bf16 %v3456_v53, %v3455_v25  ;;  %v3457_v13 = vld [vmem:[%s6664_s8 + $0x13a] sm:$0xff] }
0x112e   :  { %v3796_v20 = vrot.slane %v6584_v30, 5 }
0x112f   :  { %v1948_v57 = vadd.f32 %v1944_v33, %v1870_v61  ;;  %4908 = vmatpush3.bf16.msra.mxu1 %v4907_v26 }
0x1130   :  { %4909 = vmatprep.subr.bf16.mxu1 %v5150_v39  ;;  %4912 = vpush %v3796_v20 }
0x1134   :  { %v2022_v5 = vpop.f32.mrb[18].mxu0 }
0x1135   :  { %v2026_v44 = vadd.f32 %v2022_v5, %v1948_v57  ;;  %v4479_v49 = vpop.f32.mrb[19].mxu0 }
0x1137   :  { %v2104_v22 = vadd.f32 %v2100_v55, %v2026_v44  ;;  %v3458_v55 = vld [vmem:[%s6664_s8 + $0x142] sm:$0xff] }
0x1138   :  { %v4910_v61 = vpack.c.bf16 %v3458_v55, %v3457_v13 }
0x113a   :  { %4911 = vmatpush3.bf16.msra.mxu1 %v4910_v61 }
0x113b   :  { %4536 = vmatprep.subr.mxu1 %v5152_v2 }
0x113c   :  { %v2178_v17 = vpop.f32.mrb[20].mxu0 }
0x113d   :  { %v2182_v16 = vadd.f32 %v2178_v17, %v2104_v22  ;;  %v4501_v9 = vpop.f32.mrb[21].mxu0  ;;  %v3545_v17 = vrot.slane %v6584_v30, %v1226_v29 }
0x113f   :  { %v6589_v1 = vadd.f32 %v2186_v46, %v2182_v16 }
0x1141   :  { %v3697_v47 = vmul.f32 %v6589_v1, %v6589_v1 }
0x1143   :  { %v3699_v12 = vsel %vm3698_vm0, %v3697_v47, 0.0 }
0x1144   :  { %3700 = vadd.xlane.f32.xlu1 %v3699_v12 }
0x1152   :  { %v2772_v28 = vpop.f32.mrb[20].mxu1 }
0x1153   :  { %v2774_v36 = vpop.f32.mrb[21].mxu1 }
0x1154   :  { %v3623_v36 = vrot.slane %v6584_v30, %v1540_v27 }
0x1155   :  { %3950 = vrot.lane.b32.xlu1 %v3796_v20, %s5148_s29 }
0x1161   :  { %s4913_s8 = spop %4912 }
0x1162   :  { %v2847_v48 = vpop.f32.mrb[22].mxu0 }
0x1163   :  { %v2848_v41 = vadd.f32 %v2847_v48, %v2772_v28  ;;  %v2849_v50 = vpop.f32.mrb[23].mxu0 }
0x1178   :  { %v2945_v34 = vpop.f32.mrb[22].mxu1 }
0x1179   :  { %v2949_v23 = vadd.f32 %v2945_v34, %v2848_v41  ;;  %v2947_v3 = vpop.f32.mrb[23].mxu1 }
0x1188   :  { %v3044_v45 = vpop.f32.mrb[24].mxu0 }
0x1189   :  { %v3048_v10 = vadd.f32 %v3044_v45, %v2949_v23  ;;  %v3046_v52 = vpop.f32.mrb[25].mxu0 }
0x118a   :  { %v3798_v52 = vstv %s4913_s8 }
0x11ce   :  { %v3141_v59 = vpop.f32.mrb[24].mxu1 }
0x11cf   :  { %v3145_v51 = vadd.f32 %v3141_v59, %v3048_v10  ;;  %v3143_v4 = vpop.f32.mrb[25].mxu1 }
0x11d0   :  { %v3241_v7 = vpop.f32.mrb[26].mxu0 }
0x11d1   :  { %v3245_v56 = vadd.f32 %v3241_v7, %v3145_v51  ;;  %v3243_v6 = vpop.f32.mrb[27].mxu0  ;;  %v3701_v37 = vpop.xlane.xlu1 %3700 }
0x11d2   :  { %v3702_v57 = vadd.f32 1e-12, %v3701_v37 }
0x11d5   :  { %v3951_v15 = vpop.permute.xlu1 %3950 }
0x11f4   :  { %v3340_v18 = vpop.f32.mrb[26].mxu1 }
0x11f5   :  { %v3344_v42 = vadd.f32 %v3340_v18, %v3245_v56  ;;  %v3342_v40 = vpop.f32.mrb[27].mxu1 }
0x11f6   :  { %v3439_v63 = vpop.f32.mrb[28].mxu0 }
0x11f7   :  { %v3443_v62 = vadd.f32 %v3439_v63, %v3344_v42  ;;  %v3441_v32 = vpop.f32.mrb[29].mxu0 }
0x11f8   :  { %v3537_v8 = vpop.f32.mrb[28].mxu1 }
0x11f9   :  { %v3448_v11 = vadd.f32 %v3447_v35, %v3443_v62  ;;  %v3538_v31 = vadd.f32 %v3537_v8, %v3463_v19  ;;  %v4508_v33 = vpop.f32.mrb[29].mxu1 }
0x11fb   :  { %v3541_v60 = vmax.f32 %v3538_v31, 0.0  ;;  %v3705_v38 = vmul.f32 %v3448_v11, %v3448_v11 }
0x11fd   :  { %4518 = vmatmul.mubr.msk.f32.vlgmr.msra.gmra.mrb[30].mxu0 %vm196_vm5, %v3541_v60  ;;  %v3706_v21 = vsel %vm3698_vm0, %v3705_v38, 0.0 }
0x11fe   :  { %3707 = vadd.xlane.f32.xlu0 %v3706_v21  ;;  %4533 = vmatprep.mubr.msk.f32.mxu0 %vm5151_vm15, %v5152_v2 }
0x128b   :  { %v3708_v39 = vpop.xlane.xlu0 %3707 }
0x128c   :  { %v3709_v5 = vadd.f32 1e-12, %v3708_v39 }
0x128e   :  { %5105 = vrsqrt.f32 %v3709_v5 }
0x128f   :  { %5107 = vrsqrt.f32 %v3702_v57 }
0x1298   :  { %v5106_v44 = vpop.eup %5105 }
0x1299   :  { %v5108_v49 = vpop.eup %5107  ;;  %v3711_v22 = vmul.f32 %v5106_v44, %v3448_v11 }
0x129a   :  { %v3704_v46 = vmul.f32 %v5108_v49, %v6589_v1 }
0x129b   :  { %4532 = vmatpush3.xpose.msk.msra.mxu0 %vm1391_vm12, %v3711_v22 }
0x129c   :  { %4541 = vmatprep.subr.mxu0 %v5152_v2 }
0x129e   :  { %4534 = vmatmul.mubr.msk.f32.vlgmr.msra.gmra.mrb[32].mxu0 %vm1391_vm12, %v3704_v46 }
0x129f   :  { %4542 = vmatpush3.xpose.msk.msra.mxu0 %vm1391_vm12, %v3704_v46  ;;  %4543 = vmatprep.mubr.msk.f32.mxu0 %vm5151_vm15, %v5152_v2 }
0x12d0   :  { %v3615_v16 = vpop.f32.mrb[30].mxu0 }
0x12d1   :  { %v3616_v9 = vadd.f32 %v3615_v16, %v3545_v17  ;;  %v4519_v47 = vpop.f32.mrb[31].mxu0 }
0x12d3   :  { %v3619_v12 = vmax.f32 %v3616_v9, 0.0 }
0x12d5   :  { %4529 = vmatmul.mubr.msk.f32.vlgmr.msra.gmra.mrb[30].mxu1 %vm196_vm5, %v3619_v12  ;;  %vm3966_vm5 = vcmask 31744  }
0x12d6   :  { %4538 = vmatprep.mubr.msk.f32.mxu1 %vm5151_vm15, %v5152_v2 }
0x1371   :  { %v3791_v1 = vpop.f32.mrb[32].mxu0 }
0x1372   :  { %v4535_v28 = vpop.f32.mrb[33].mxu0  ;;  %v3800_v59 = vmul.f32 %v3798_v52, %v3791_v1 }
0x13a8   :  { %v3693_v48 = vpop.f32.mrb[30].mxu1 }
0x13a9   :  { %v3694_v41 = vadd.f32 %v3693_v48, %v3623_v36  ;;  %v4530_v50 = vpop.f32.mrb[31].mxu1 }
0x13ab   :  { %v3712_v58 = vmul.f32 %v3694_v41, %v3694_v41 }
0x13ad   :  { %v3713_v29 = vsel %vm3698_vm0, %v3712_v58, 0.0 }
0x13ae   :  { %3714 = vadd.xlane.f32.xlu0 %v3713_v29 }
0x13c4   :  { %3874 = vrot.lane.b32.xlu0 %v3796_v20, %s5135_s22  ;;  %s5153_s22 = smov 4  }
0x143b   :  { %v3715_v0 = vpop.xlane.xlu0 %3714 }
0x143c   :  { %v3716_v43 = vadd.f32 1e-12, %v3715_v0 }
0x143e   :  { %5109 = vrsqrt.f32 %v3716_v43 }
0x143f   :  { %v3875_v2 = vpop.permute.xlu0 %3874 }
0x1440   :  { %4914 = vpush %v3875_v2 }
0x1441   :  { %4916 = vpush %v3951_v15 }
0x1448   :  { %v5110_v54 = vpop.eup %5109 }
0x1449   :  { %v3718_v24 = vmul.f32 %v5110_v54, %v3694_v41 }
0x144b   :  { %4537 = vmatpush3.xpose.msk.msra.mxu1 %vm1391_vm12, %v3718_v24  ;;  %4544 = vmatmul.mubr.msk.f32.vlgmr.msra.gmra.mrb[34].mxu0 %vm1391_vm12, %v3718_v24 }
0x144e   :  { %4539 = vmatmul.mubr.msk.f32.vlgmr.msra.gmra.mrb[32].mxu1 %vm1391_vm12, %v3711_v22 }
0x1471   :  { %s4915_s29 = spop %4914 }
0x1472   :  { %s4917_s27 = spop %4916  ;;  %v3877_v34 = vstv %s4915_s29 }
0x1473   :  { %v3953_v27 = vstv %s4917_s27 }
0x151e   :  { %v3946_v30 = vpop.f32.mrb[34].mxu0 }
0x151f   :  { %v3955_v14 = vmul.f32 %v3953_v27, %v3946_v30  ;;  %v4545_v23 = vpop.f32.mrb[35].mxu0 }
0x1521   :  { %3961 = vrot.lane.b32.xlu0 %v3955_v14, %s5153_s22  ;;  %v3870_v3 = vpop.f32.mrb[32].mxu1 }
0x1522   :  { %v3879_v45 = vmul.f32 %v3877_v34, %v3870_v3  ;;  %v4540_v10 = vpop.f32.mrb[33].mxu1 }
0x1524   :  { %3957 = vrot.lane.b32.xlu1 %v3879_v45, %s5154_s4 }
0x1593   :  { %v3962_v4 = vpop.permute.xlu0 %3961 }
0x1596   :  { %v3958_v51 = vpop.permute.xlu1 %3957 }
0x1597   :  { %v3965_v7 = vsel %vm3964_vm4, %v3800_v59, %v3958_v51 }
0x1598   :  { %v3967_v56 = vsel %vm3966_vm5, %v3965_v7, %v3962_v4 }
0x1599   :  { %3969 = vst.msk [vmem:[%s6667_s9] sm:$0x3] %vm3968_vm7, %v3967_v56 }

</bundles_post_ra>
